<compile_context>
chip_gen: v7x
topology: tpu7x:2x2x1
jax: 0.10.0
libtpu: 0.0.40
codegen_flags: <defaults>
</compile_context>

<pallas_src>
import math

import numpy as np

import jax
import jax.numpy as jnp
from jax.experimental import pallas as pl
from jax.experimental.pallas import tpu as pltpu


# -----------------------------------------------------------------------------
# Fused kernel.  refs = [x_flat, (S, W, b) * n_layers, out]
# -----------------------------------------------------------------------------
def _fused_convnet_kernel(*refs):
    n_layers = (len(refs) - 2) // 3
    x_ref = refs[0]
    o_ref = refs[-1]

    x = x_ref[...]                                   # (M_in, C_in) bf16
    out_f32 = None
    for l in range(n_layers):
        s_ref, w_ref, b_ref = refs[1 + 3 * l: 4 + 3 * l]
        m_out = s_ref.shape[0] // 9                  # rows of this layer's output

        # im2col on the MXU: stack the 9 shifted/strided/zero-padded taps.
        patches = jnp.dot(s_ref[...], x, preferred_element_type=jnp.float32)
        patches = patches.astype(jnp.bfloat16)       # (9*m_out, C_in), exact gather

        # Conv = sum of the 9 per-tap GEMMs, f32 accumulation on the MXU.
        acc = None
        for t in range(9):
            p_t = patches[t * m_out:(t + 1) * m_out, :]        # tile-aligned slice
            contrib = jnp.dot(p_t, w_ref[t], preferred_element_type=jnp.float32)
            acc = contrib if acc is None else acc + contrib

        acc = acc + b_ref[...]                       # (m_out, C_out) + (1, C_out)
        if l < n_layers - 1:
            acc = jnp.maximum(acc, 0.0)              # ReLU in f32 (v5e-safe)
            x = acc.astype(jnp.bfloat16)             # next layer input, VMEM-resident
        else:
            out_f32 = acc                            # last conv: no activation

    o_ref[...] = out_f32                             # single lane-dense HBM store


# -----------------------------------------------------------------------------
# Host-side, shape-only constants: 0/1 patch-gather matrices.
# -----------------------------------------------------------------------------
def _build_patch_gather(n, hi, wi, stride):
    """S (9*M_out, M_in) with S @ x_flat stacking the 3x3 taps of a pad=1 conv
    over the NHWC-flattened activation (handles stride and zero padding)."""
    ho = (hi + 2 - 3) // stride + 1
    wo = (wi + 2 - 3) // stride + 1
    m_in = n * hi * wi
    m_out = n * ho * wo
    s = np.zeros((9 * m_out, m_in), dtype=np.float32)
    for dy in range(3):
        for dx in range(3):
            t = dy * 3 + dx
            for b in range(n):
                for oy in range(ho):
                    iy = stride * oy + dy - 1
                    if iy < 0 or iy >= hi:
                        continue
                    for ox in range(wo):
                        ix = stride * ox + dx - 1
                        if ix < 0 or ix >= wi:
                            continue
                        s[t * m_out + (b * ho + oy) * wo + ox,
                          (b * hi + iy) * wi + ix] = 1.0
    return s, ho, wo


def build_convnet(key, in_channels, k, n, h, w):
    """PyTorch Conv2d-style init + shape-specialized gather matrices."""
    layer_defs = [(in_channels, 64, 2)]
    layer_defs += [(64, 64, 1)] * (k - 1)
    layer_defs += [(64, 128, 2)]
    layer_defs += [(128, 128, 1)] * (k - 1)
    layer_defs += [(128, 256, 2)]

    layers = []
    hi, wi = h, w
    for cin, cout, stride in layer_defs:
        key, wk, bk = jax.random.split(key, 3)
        bound = 1.0 / math.sqrt(cin * 9)
        w_f32 = jax.random.uniform(wk, (9, cin, cout), jnp.float32, -bound, bound)
        b_f32 = jax.random.uniform(bk, (cout,), jnp.float32, -bound, bound)
        s_np, ho, wo = _build_patch_gather(n, hi, wi, stride)
        layers.append(dict(
            S=jnp.asarray(s_np, jnp.bfloat16),       # 0/1: exact in bf16
            w=w_f32.astype(jnp.bfloat16),            # MXU operands in bf16
            b=b_f32.reshape(1, cout),                # epilogue stays f32
            w_f32=w_f32,                             # for the pure-JAX reference
            stride=stride,
        ))
        hi, wi = ho, wo
    return layers, (hi, wi, layer_defs[-1][1])


# -----------------------------------------------------------------------------
# Forward pass (equivalent of ConvNet.forward, af = ReLU, final flatten(1)).
# -----------------------------------------------------------------------------
def convnet_forward(x_nchw, layers, out_hwc):
    n, _, h, w = x_nchw.shape
    ho, wo, cout = out_hwc
    m_out = n * ho * wo

    # Boundary layout glue only: NCHW -> NHWC -> (N*H*W, C), cast to bf16.
    x_flat = jnp.transpose(x_nchw, (0, 2, 3, 1)).reshape(n * h * w, x_nchw.shape[1])
    x_flat = x_flat.astype(jnp.bfloat16)

    inputs = [x_flat]
    in_specs = [pl.BlockSpec(x_flat.shape, lambda: (0, 0))]
    for layer in layers:
        inputs += [layer["S"], layer["w"], layer["b"]]
        in_specs += [
            pl.BlockSpec(layer["S"].shape, lambda: (0, 0)),
            pl.BlockSpec(layer["w"].shape, lambda: (0, 0, 0)),
            pl.BlockSpec(layer["b"].shape, lambda: (0, 0)),
        ]

    out_flat = pl.pallas_call(
        _fused_convnet_kernel,
        out_shape=jax.ShapeDtypeStruct((m_out, cout), jnp.float32),
        in_specs=in_specs,
        out_specs=pl.BlockSpec((m_out, cout), lambda: (0, 0)),
        compiler_params=pltpu.CompilerParams(vmem_limit_bytes=32 * 1024 * 1024),
    )(*inputs)

    # Match PyTorch .flatten(1) on an NCHW tensor (channel-major flattening).
    out_nchw = jnp.transpose(out_flat.reshape(n, ho, wo, cout), (0, 3, 1, 2))
    return out_nchw.reshape(n, -1)


def convnet_reference(x_nchw, layers):
    """Pure-JAX (XLA conv) f32 reference of ConvNet.forward for validation."""
    x = jnp.transpose(x_nchw, (0, 2, 3, 1))
    for i, layer in enumerate(layers):
        cin, cout = layer["w_f32"].shape[1], layer["w_f32"].shape[2]
        w_hwio = layer["w_f32"].reshape(3, 3, cin, cout)
        x = jax.lax.conv_general_dilated(
            x, w_hwio, (layer["stride"], layer["stride"]), ((1, 1), (1, 1)),
            dimension_numbers=("NHWC", "HWIO", "NHWC"),
            precision=jax.lax.Precision.HIGHEST)
        x = x + layer["b"].reshape(1, 1, 1, cout)
        if i < len(layers) - 1:
            x = jnp.maximum(x, 0.0)
    x = jnp.transpose(x, (0, 3, 1, 2))
    return x.reshape(x.shape[0], -1)


if __name__ == "__main__":
    key = jax.random.PRNGKey(0)
    kx, kp = jax.random.split(key)

    in_channels, k = 4, 2
    n, h, w = 2, 16, 16
    x = jax.random.normal(kx, (n, in_channels, h, w), jnp.float32)   # NCHW input

    layers, out_hwc = build_convnet(kp, in_channels, k, n, h, w)

    @jax.jit
    def run(inp):
        return convnet_forward(inp, layers, out_hwc)

    out = jax.block_until_ready(run(x))

    # 16 -> 8 -> 8 -> 4 -> 4 -> 2 spatially, 256 channels => flatten to 1024.
    assert out.shape == (n, 256 * 2 * 2), out.shape
    assert out.dtype == jnp.float32

    ref = jax.block_until_ready(convnet_reference(x, layers))
    max_err = float(jnp.max(jnp.abs(out - ref)))
    assert max_err < 0.08, f"max abs err vs f32 reference: {max_err}"

    print("KERNEL_OK")
</pallas_src>

<mosaic_0001>
module attributes {stable_mosaic.version = 11 : i64} {
  func.func @_fused_convnet_kernel(%arg0: memref<512x4xbf16, #tpu.memory_space<vmem>>, %arg1: memref<1152x512xbf16, #tpu.memory_space<vmem>>, %arg2: memref<9x4x64xbf16, #tpu.memory_space<vmem>>, %arg3: memref<1x64xf32, #tpu.memory_space<vmem>>, %arg4: memref<1152x128xbf16, #tpu.memory_space<vmem>>, %arg5: memref<9x64x64xbf16, #tpu.memory_space<vmem>>, %arg6: memref<1x64xf32, #tpu.memory_space<vmem>>, %arg7: memref<288x128xbf16, #tpu.memory_space<vmem>>, %arg8: memref<9x64x128xbf16, #tpu.memory_space<vmem>>, %arg9: memref<1x128xf32, #tpu.memory_space<vmem>>, %arg10: memref<288x32xbf16, #tpu.memory_space<vmem>>, %arg11: memref<9x128x128xbf16, #tpu.memory_space<vmem>>, %arg12: memref<1x128xf32, #tpu.memory_space<vmem>>, %arg13: memref<72x32xbf16, #tpu.memory_space<vmem>>, %arg14: memref<9x128x256xbf16, #tpu.memory_space<vmem>>, %arg15: memref<1x256xf32, #tpu.memory_space<vmem>>, %arg16: memref<8x256xf32, #tpu.memory_space<vmem>>) attributes {dimension_semantics = [], scalar_prefetch = 0 : i64, scratch_operands = 0 : i64, tpu.core_type = #tpu.core_type<tc>} {
    %c0 = arith.constant 0 : index
    %c0_0 = arith.constant 0 : index
    %0 = vector.load %arg0[%c0, %c0_0] : memref<512x4xbf16, #tpu.memory_space<vmem>>, vector<512x4xbf16>
    %c0_1 = arith.constant 0 : index
    %c0_2 = arith.constant 0 : index
    %1 = vector.load %arg1[%c0_1, %c0_2] : memref<1152x512xbf16, #tpu.memory_space<vmem>>, vector<1152x512xbf16>
    %cst = arith.constant dense<0.000000e+00> : vector<1152x4xf32>
    %2 = tpu.matmul %1, %0, %cst {dimension_numbers = #tpu.dot_dimension_numbers<[1], [0], [0], [1], [0, 0, 1, 1], [], []>} : vector<1152x512xbf16>, vector<512x4xbf16>, vector<1152x4xf32> -> vector<1152x4xf32>
    %3 = arith.truncf %2 : vector<1152x4xf32> to vector<1152x4xbf16>
    %4 = vector.extract_strided_slice %3 {offsets = [0, 0], sizes = [128, 4], strides = [1, 1]} : vector<1152x4xbf16> to vector<128x4xbf16>
    %c0_3 = arith.constant 0 : index
    %c0_4 = arith.constant 0 : index
    %c0_5 = arith.constant 0 : index
    %5 = vector.load %arg2[%c0_3, %c0_4, %c0_5] : memref<9x4x64xbf16, #tpu.memory_space<vmem>>, vector<1x4x64xbf16>
    %6 = vector.shape_cast %5 : vector<1x4x64xbf16> to vector<4x64xbf16>
    %cst_6 = arith.constant dense<0.000000e+00> : vector<128x64xf32>
    %7 = tpu.matmul %4, %6, %cst_6 {dimension_numbers = #tpu.dot_dimension_numbers<[1], [0], [0], [1], [0, 0, 1, 1], [], []>} : vector<128x4xbf16>, vector<4x64xbf16>, vector<128x64xf32> -> vector<128x64xf32>
    %8 = vector.extract_strided_slice %3 {offsets = [128, 0], sizes = [128, 4], strides = [1, 1]} : vector<1152x4xbf16> to vector<128x4xbf16>
    %c1 = arith.constant 1 : index
    %c0_7 = arith.constant 0 : index
    %c0_8 = arith.constant 0 : index
    %9 = vector.load %arg2[%c1, %c0_7, %c0_8] : memref<9x4x64xbf16, #tpu.memory_space<vmem>>, vector<1x4x64xbf16>
    %10 = vector.shape_cast %9 : vector<1x4x64xbf16> to vector<4x64xbf16>
    %cst_9 = arith.constant dense<0.000000e+00> : vector<128x64xf32>
    %11 = tpu.matmul %8, %10, %cst_9 {dimension_numbers = #tpu.dot_dimension_numbers<[1], [0], [0], [1], [0, 0, 1, 1], [], []>} : vector<128x4xbf16>, vector<4x64xbf16>, vector<128x64xf32> -> vector<128x64xf32>
    %12 = arith.addf %7, %11 : vector<128x64xf32>
    %13 = vector.extract_strided_slice %3 {offsets = [256, 0], sizes = [128, 4], strides = [1, 1]} : vector<1152x4xbf16> to vector<128x4xbf16>
    %c2 = arith.constant 2 : index
    %c0_10 = arith.constant 0 : index
    %c0_11 = arith.constant 0 : index
    %14 = vector.load %arg2[%c2, %c0_10, %c0_11] : memref<9x4x64xbf16, #tpu.memory_space<vmem>>, vector<1x4x64xbf16>
    %15 = vector.shape_cast %14 : vector<1x4x64xbf16> to vector<4x64xbf16>
    %cst_12 = arith.constant dense<0.000000e+00> : vector<128x64xf32>
    %16 = tpu.matmul %13, %15, %cst_12 {dimension_numbers = #tpu.dot_dimension_numbers<[1], [0], [0], [1], [0, 0, 1, 1], [], []>} : vector<128x4xbf16>, vector<4x64xbf16>, vector<128x64xf32> -> vector<128x64xf32>
    %17 = arith.addf %12, %16 : vector<128x64xf32>
    %18 = vector.extract_strided_slice %3 {offsets = [384, 0], sizes = [128, 4], strides = [1, 1]} : vector<1152x4xbf16> to vector<128x4xbf16>
    %c3 = arith.constant 3 : index
    %c0_13 = arith.constant 0 : index
    %c0_14 = arith.constant 0 : index
    %19 = vector.load %arg2[%c3, %c0_13, %c0_14] : memref<9x4x64xbf16, #tpu.memory_space<vmem>>, vector<1x4x64xbf16>
    %20 = vector.shape_cast %19 : vector<1x4x64xbf16> to vector<4x64xbf16>
    %cst_15 = arith.constant dense<0.000000e+00> : vector<128x64xf32>
    %21 = tpu.matmul %18, %20, %cst_15 {dimension_numbers = #tpu.dot_dimension_numbers<[1], [0], [0], [1], [0, 0, 1, 1], [], []>} : vector<128x4xbf16>, vector<4x64xbf16>, vector<128x64xf32> -> vector<128x64xf32>
    %22 = arith.addf %17, %21 : vector<128x64xf32>
    %23 = vector.extract_strided_slice %3 {offsets = [512, 0], sizes = [128, 4], strides = [1, 1]} : vector<1152x4xbf16> to vector<128x4xbf16>
    %c4 = arith.constant 4 : index
    %c0_16 = arith.constant 0 : index
    %c0_17 = arith.constant 0 : index
    %24 = vector.load %arg2[%c4, %c0_16, %c0_17] : memref<9x4x64xbf16, #tpu.memory_space<vmem>>, vector<1x4x64xbf16>
    %25 = vector.shape_cast %24 : vector<1x4x64xbf16> to vector<4x64xbf16>
    %cst_18 = arith.constant dense<0.000000e+00> : vector<128x64xf32>
    %26 = tpu.matmul %23, %25, %cst_18 {dimension_numbers = #tpu.dot_dimension_numbers<[1], [0], [0], [1], [0, 0, 1, 1], [], []>} : vector<128x4xbf16>, vector<4x64xbf16>, vector<128x64xf32> -> vector<128x64xf32>
    %27 = arith.addf %22, %26 : vector<128x64xf32>
    %28 = vector.extract_strided_slice %3 {offsets = [640, 0], sizes = [128, 4], strides = [1, 1]} : vector<1152x4xbf16> to vector<128x4xbf16>
    %c5 = arith.constant 5 : index
    %c0_19 = arith.constant 0 : index
    %c0_20 = arith.constant 0 : index
    %29 = vector.load %arg2[%c5, %c0_19, %c0_20] : memref<9x4x64xbf16, #tpu.memory_space<vmem>>, vector<1x4x64xbf16>
    %30 = vector.shape_cast %29 : vector<1x4x64xbf16> to vector<4x64xbf16>
    %cst_21 = arith.constant dense<0.000000e+00> : vector<128x64xf32>
    %31 = tpu.matmul %28, %30, %cst_21 {dimension_numbers = #tpu.dot_dimension_numbers<[1], [0], [0], [1], [0, 0, 1, 1], [], []>} : vector<128x4xbf16>, vector<4x64xbf16>, vector<128x64xf32> -> vector<128x64xf32>
    %32 = arith.addf %27, %31 : vector<128x64xf32>
    %33 = vector.extract_strided_slice %3 {offsets = [768, 0], sizes = [128, 4], strides = [1, 1]} : vector<1152x4xbf16> to vector<128x4xbf16>
    %c6 = arith.constant 6 : index
    %c0_22 = arith.constant 0 : index
    %c0_23 = arith.constant 0 : index
    %34 = vector.load %arg2[%c6, %c0_22, %c0_23] : memref<9x4x64xbf16, #tpu.memory_space<vmem>>, vector<1x4x64xbf16>
    %35 = vector.shape_cast %34 : vector<1x4x64xbf16> to vector<4x64xbf16>
    %cst_24 = arith.constant dense<0.000000e+00> : vector<128x64xf32>
    %36 = tpu.matmul %33, %35, %cst_24 {dimension_numbers = #tpu.dot_dimension_numbers<[1], [0], [0], [1], [0, 0, 1, 1], [], []>} : vector<128x4xbf16>, vector<4x64xbf16>, vector<128x64xf32> -> vector<128x64xf32>
    %37 = arith.addf %32, %36 : vector<128x64xf32>
    %38 = vector.extract_strided_slice %3 {offsets = [896, 0], sizes = [128, 4], strides = [1, 1]} : vector<1152x4xbf16> to vector<128x4xbf16>
    %c7 = arith.constant 7 : index
    %c0_25 = arith.constant 0 : index
    %c0_26 = arith.constant 0 : index
    %39 = vector.load %arg2[%c7, %c0_25, %c0_26] : memref<9x4x64xbf16, #tpu.memory_space<vmem>>, vector<1x4x64xbf16>
    %40 = vector.shape_cast %39 : vector<1x4x64xbf16> to vector<4x64xbf16>
    %cst_27 = arith.constant dense<0.000000e+00> : vector<128x64xf32>
    %41 = tpu.matmul %38, %40, %cst_27 {dimension_numbers = #tpu.dot_dimension_numbers<[1], [0], [0], [1], [0, 0, 1, 1], [], []>} : vector<128x4xbf16>, vector<4x64xbf16>, vector<128x64xf32> -> vector<128x64xf32>
    %42 = arith.addf %37, %41 : vector<128x64xf32>
    %43 = vector.extract_strided_slice %3 {offsets = [1024, 0], sizes = [128, 4], strides = [1, 1]} : vector<1152x4xbf16> to vector<128x4xbf16>
    %c8 = arith.constant 8 : index
    %c0_28 = arith.constant 0 : index
    %c0_29 = arith.constant 0 : index
    %44 = vector.load %arg2[%c8, %c0_28, %c0_29] : memref<9x4x64xbf16, #tpu.memory_space<vmem>>, vector<1x4x64xbf16>
    %45 = vector.shape_cast %44 : vector<1x4x64xbf16> to vector<4x64xbf16>
    %cst_30 = arith.constant dense<0.000000e+00> : vector<128x64xf32>
    %46 = tpu.matmul %43, %45, %cst_30 {dimension_numbers = #tpu.dot_dimension_numbers<[1], [0], [0], [1], [0, 0, 1, 1], [], []>} : vector<128x4xbf16>, vector<4x64xbf16>, vector<128x64xf32> -> vector<128x64xf32>
    %47 = arith.addf %42, %46 : vector<128x64xf32>
    %c0_31 = arith.constant 0 : index
    %c0_32 = arith.constant 0 : index
    %48 = vector.load %arg3[%c0_31, %c0_32] : memref<1x64xf32, #tpu.memory_space<vmem>>, vector<1x64xf32>
    %49 = vector.broadcast %48 : vector<1x64xf32> to vector<128x64xf32>
    %50 = arith.addf %47, %49 : vector<128x64xf32>
    %cst_33 = arith.constant 0.000000e+00 : f32
    %51 = vector.broadcast %cst_33 : f32 to vector<128x64xf32>
    %52 = arith.maximumf %50, %51 : vector<128x64xf32>
    %53 = arith.truncf %52 : vector<128x64xf32> to vector<128x64xbf16>
    %c0_34 = arith.constant 0 : index
    %c0_35 = arith.constant 0 : index
    %54 = vector.load %arg4[%c0_34, %c0_35] : memref<1152x128xbf16, #tpu.memory_space<vmem>>, vector<1152x128xbf16>
    %cst_36 = arith.constant dense<0.000000e+00> : vector<1152x64xf32>
    %55 = tpu.matmul %54, %53, %cst_36 {dimension_numbers = #tpu.dot_dimension_numbers<[1], [0], [0], [1], [0, 0, 1, 1], [], []>} : vector<1152x128xbf16>, vector<128x64xbf16>, vector<1152x64xf32> -> vector<1152x64xf32>
    %56 = arith.truncf %55 : vector<1152x64xf32> to vector<1152x64xbf16>
    %57 = vector.extract_strided_slice %56 {offsets = [0, 0], sizes = [128, 64], strides = [1, 1]} : vector<1152x64xbf16> to vector<128x64xbf16>
    %c0_37 = arith.constant 0 : index
    %c0_38 = arith.constant 0 : index
    %c0_39 = arith.constant 0 : index
    %58 = vector.load %arg5[%c0_37, %c0_38, %c0_39] : memref<9x64x64xbf16, #tpu.memory_space<vmem>>, vector<1x64x64xbf16>
    %59 = vector.shape_cast %58 : vector<1x64x64xbf16> to vector<64x64xbf16>
    %cst_40 = arith.constant dense<0.000000e+00> : vector<128x64xf32>
    %60 = tpu.matmul %57, %59, %cst_40 {dimension_numbers = #tpu.dot_dimension_numbers<[1], [0], [0], [1], [0, 0, 1, 1], [], []>} : vector<128x64xbf16>, vector<64x64xbf16>, vector<128x64xf32> -> vector<128x64xf32>
    %61 = vector.extract_strided_slice %56 {offsets = [128, 0], sizes = [128, 64], strides = [1, 1]} : vector<1152x64xbf16> to vector<128x64xbf16>
    %c1_41 = arith.constant 1 : index
    %c0_42 = arith.constant 0 : index
    %c0_43 = arith.constant 0 : index
    %62 = vector.load %arg5[%c1_41, %c0_42, %c0_43] : memref<9x64x64xbf16, #tpu.memory_space<vmem>>, vector<1x64x64xbf16>
    %63 = vector.shape_cast %62 : vector<1x64x64xbf16> to vector<64x64xbf16>
    %cst_44 = arith.constant dense<0.000000e+00> : vector<128x64xf32>
    %64 = tpu.matmul %61, %63, %cst_44 {dimension_numbers = #tpu.dot_dimension_numbers<[1], [0], [0], [1], [0, 0, 1, 1], [], []>} : vector<128x64xbf16>, vector<64x64xbf16>, vector<128x64xf32> -> vector<128x64xf32>
    %65 = arith.addf %60, %64 : vector<128x64xf32>
    %66 = vector.extract_strided_slice %56 {offsets = [256, 0], sizes = [128, 64], strides = [1, 1]} : vector<1152x64xbf16> to vector<128x64xbf16>
    %c2_45 = arith.constant 2 : index
    %c0_46 = arith.constant 0 : index
    %c0_47 = arith.constant 0 : index
    %67 = vector.load %arg5[%c2_45, %c0_46, %c0_47] : memref<9x64x64xbf16, #tpu.memory_space<vmem>>, vector<1x64x64xbf16>
    %68 = vector.shape_cast %67 : vector<1x64x64xbf16> to vector<64x64xbf16>
    %cst_48 = arith.constant dense<0.000000e+00> : vector<128x64xf32>
    %69 = tpu.matmul %66, %68, %cst_48 {dimension_numbers = #tpu.dot_dimension_numbers<[1], [0], [0], [1], [0, 0, 1, 1], [], []>} : vector<128x64xbf16>, vector<64x64xbf16>, vector<128x64xf32> -> vector<128x64xf32>
    %70 = arith.addf %65, %69 : vector<128x64xf32>
    %71 = vector.extract_strided_slice %56 {offsets = [384, 0], sizes = [128, 64], strides = [1, 1]} : vector<1152x64xbf16> to vector<128x64xbf16>
    %c3_49 = arith.constant 3 : index
    %c0_50 = arith.constant 0 : index
    %c0_51 = arith.constant 0 : index
    %72 = vector.load %arg5[%c3_49, %c0_50, %c0_51] : memref<9x64x64xbf16, #tpu.memory_space<vmem>>, vector<1x64x64xbf16>
    %73 = vector.shape_cast %72 : vector<1x64x64xbf16> to vector<64x64xbf16>
    %cst_52 = arith.constant dense<0.000000e+00> : vector<128x64xf32>
    %74 = tpu.matmul %71, %73, %cst_52 {dimension_numbers = #tpu.dot_dimension_numbers<[1], [0], [0], [1], [0, 0, 1, 1], [], []>} : vector<128x64xbf16>, vector<64x64xbf16>, vector<128x64xf32> -> vector<128x64xf32>
    %75 = arith.addf %70, %74 : vector<128x64xf32>
    %76 = vector.extract_strided_slice %56 {offsets = [512, 0], sizes = [128, 64], strides = [1, 1]} : vector<1152x64xbf16> to vector<128x64xbf16>
    %c4_53 = arith.constant 4 : index
    %c0_54 = arith.constant 0 : index
    %c0_55 = arith.constant 0 : index
    %77 = vector.load %arg5[%c4_53, %c0_54, %c0_55] : memref<9x64x64xbf16, #tpu.memory_space<vmem>>, vector<1x64x64xbf16>
    %78 = vector.shape_cast %77 : vector<1x64x64xbf16> to vector<64x64xbf16>
    %cst_56 = arith.constant dense<0.000000e+00> : vector<128x64xf32>
    %79 = tpu.matmul %76, %78, %cst_56 {dimension_numbers = #tpu.dot_dimension_numbers<[1], [0], [0], [1], [0, 0, 1, 1], [], []>} : vector<128x64xbf16>, vector<64x64xbf16>, vector<128x64xf32> -> vector<128x64xf32>
    %80 = arith.addf %75, %79 : vector<128x64xf32>
    %81 = vector.extract_strided_slice %56 {offsets = [640, 0], sizes = [128, 64], strides = [1, 1]} : vector<1152x64xbf16> to vector<128x64xbf16>
    %c5_57 = arith.constant 5 : index
    %c0_58 = arith.constant 0 : index
    %c0_59 = arith.constant 0 : index
    %82 = vector.load %arg5[%c5_57, %c0_58, %c0_59] : memref<9x64x64xbf16, #tpu.memory_space<vmem>>, vector<1x64x64xbf16>
    %83 = vector.shape_cast %82 : vector<1x64x64xbf16> to vector<64x64xbf16>
    %cst_60 = arith.constant dense<0.000000e+00> : vector<128x64xf32>
    %84 = tpu.matmul %81, %83, %cst_60 {dimension_numbers = #tpu.dot_dimension_numbers<[1], [0], [0], [1], [0, 0, 1, 1], [], []>} : vector<128x64xbf16>, vector<64x64xbf16>, vector<128x64xf32> -> vector<128x64xf32>
    %85 = arith.addf %80, %84 : vector<128x64xf32>
    %86 = vector.extract_strided_slice %56 {offsets = [768, 0], sizes = [128, 64], strides = [1, 1]} : vector<1152x64xbf16> to vector<128x64xbf16>
    %c6_61 = arith.constant 6 : index
    %c0_62 = arith.constant 0 : index
    %c0_63 = arith.constant 0 : index
    %87 = vector.load %arg5[%c6_61, %c0_62, %c0_63] : memref<9x64x64xbf16, #tpu.memory_space<vmem>>, vector<1x64x64xbf16>
    %88 = vector.shape_cast %87 : vector<1x64x64xbf16> to vector<64x64xbf16>
    %cst_64 = arith.constant dense<0.000000e+00> : vector<128x64xf32>
    %89 = tpu.matmul %86, %88, %cst_64 {dimension_numbers = #tpu.dot_dimension_numbers<[1], [0], [0], [1], [0, 0, 1, 1], [], []>} : vector<128x64xbf16>, vector<64x64xbf16>, vector<128x64xf32> -> vector<128x64xf32>
    %90 = arith.addf %85, %89 : vector<128x64xf32>
    %91 = vector.extract_strided_slice %56 {offsets = [896, 0], sizes = [128, 64], strides = [1, 1]} : vector<1152x64xbf16> to vector<128x64xbf16>
    %c7_65 = arith.constant 7 : index
    %c0_66 = arith.constant 0 : index
    %c0_67 = arith.constant 0 : index
    %92 = vector.load %arg5[%c7_65, %c0_66, %c0_67] : memref<9x64x64xbf16, #tpu.memory_space<vmem>>, vector<1x64x64xbf16>
    %93 = vector.shape_cast %92 : vector<1x64x64xbf16> to vector<64x64xbf16>
    %cst_68 = arith.constant dense<0.000000e+00> : vector<128x64xf32>
    %94 = tpu.matmul %91, %93, %cst_68 {dimension_numbers = #tpu.dot_dimension_numbers<[1], [0], [0], [1], [0, 0, 1, 1], [], []>} : vector<128x64xbf16>, vector<64x64xbf16>, vector<128x64xf32> -> vector<128x64xf32>
    %95 = arith.addf %90, %94 : vector<128x64xf32>
    %96 = vector.extract_strided_slice %56 {offsets = [1024, 0], sizes = [128, 64], strides = [1, 1]} : vector<1152x64xbf16> to vector<128x64xbf16>
    %c8_69 = arith.constant 8 : index
    %c0_70 = arith.constant 0 : index
    %c0_71 = arith.constant 0 : index
    %97 = vector.load %arg5[%c8_69, %c0_70, %c0_71] : memref<9x64x64xbf16, #tpu.memory_space<vmem>>, vector<1x64x64xbf16>
    %98 = vector.shape_cast %97 : vector<1x64x64xbf16> to vector<64x64xbf16>
    %cst_72 = arith.constant dense<0.000000e+00> : vector<128x64xf32>
    %99 = tpu.matmul %96, %98, %cst_72 {dimension_numbers = #tpu.dot_dimension_numbers<[1], [0], [0], [1], [0, 0, 1, 1], [], []>} : vector<128x64xbf16>, vector<64x64xbf16>, vector<128x64xf32> -> vector<128x64xf32>
    %100 = arith.addf %95, %99 : vector<128x64xf32>
    %c0_73 = arith.constant 0 : index
    %c0_74 = arith.constant 0 : index
    %101 = vector.load %arg6[%c0_73, %c0_74] : memref<1x64xf32, #tpu.memory_space<vmem>>, vector<1x64xf32>
    %102 = vector.broadcast %101 : vector<1x64xf32> to vector<128x64xf32>
    %103 = arith.addf %100, %102 : vector<128x64xf32>
    %cst_75 = arith.constant 0.000000e+00 : f32
    %104 = vector.broadcast %cst_75 : f32 to vector<128x64xf32>
    %105 = arith.maximumf %103, %104 : vector<128x64xf32>
    %106 = arith.truncf %105 : vector<128x64xf32> to vector<128x64xbf16>
    %c0_76 = arith.constant 0 : index
    %c0_77 = arith.constant 0 : index
    %107 = vector.load %arg7[%c0_76, %c0_77] : memref<288x128xbf16, #tpu.memory_space<vmem>>, vector<288x128xbf16>
    %cst_78 = arith.constant dense<0.000000e+00> : vector<288x64xf32>
    %108 = tpu.matmul %107, %106, %cst_78 {dimension_numbers = #tpu.dot_dimension_numbers<[1], [0], [0], [1], [0, 0, 1, 1], [], []>} : vector<288x128xbf16>, vector<128x64xbf16>, vector<288x64xf32> -> vector<288x64xf32>
    %109 = arith.truncf %108 : vector<288x64xf32> to vector<288x64xbf16>
    %110 = vector.extract_strided_slice %109 {offsets = [0, 0], sizes = [32, 64], strides = [1, 1]} : vector<288x64xbf16> to vector<32x64xbf16>
    %c0_79 = arith.constant 0 : index
    %c0_80 = arith.constant 0 : index
    %c0_81 = arith.constant 0 : index
    %111 = vector.load %arg8[%c0_79, %c0_80, %c0_81] : memref<9x64x128xbf16, #tpu.memory_space<vmem>>, vector<1x64x128xbf16>
    %112 = vector.shape_cast %111 : vector<1x64x128xbf16> to vector<64x128xbf16>
    %cst_82 = arith.constant dense<0.000000e+00> : vector<32x128xf32>
    %113 = tpu.matmul %110, %112, %cst_82 {dimension_numbers = #tpu.dot_dimension_numbers<[1], [0], [0], [1], [0, 0, 1, 1], [], []>} : vector<32x64xbf16>, vector<64x128xbf16>, vector<32x128xf32> -> vector<32x128xf32>
    %114 = vector.extract_strided_slice %109 {offsets = [32, 0], sizes = [32, 64], strides = [1, 1]} : vector<288x64xbf16> to vector<32x64xbf16>
    %c1_83 = arith.constant 1 : index
    %c0_84 = arith.constant 0 : index
    %c0_85 = arith.constant 0 : index
    %115 = vector.load %arg8[%c1_83, %c0_84, %c0_85] : memref<9x64x128xbf16, #tpu.memory_space<vmem>>, vector<1x64x128xbf16>
    %116 = vector.shape_cast %115 : vector<1x64x128xbf16> to vector<64x128xbf16>
    %cst_86 = arith.constant dense<0.000000e+00> : vector<32x128xf32>
    %117 = tpu.matmul %114, %116, %cst_86 {dimension_numbers = #tpu.dot_dimension_numbers<[1], [0], [0], [1], [0, 0, 1, 1], [], []>} : vector<32x64xbf16>, vector<64x128xbf16>, vector<32x128xf32> -> vector<32x128xf32>
    %118 = arith.addf %113, %117 : vector<32x128xf32>
    %119 = vector.extract_strided_slice %109 {offsets = [64, 0], sizes = [32, 64], strides = [1, 1]} : vector<288x64xbf16> to vector<32x64xbf16>
    %c2_87 = arith.constant 2 : index
    %c0_88 = arith.constant 0 : index
    %c0_89 = arith.constant 0 : index
    %120 = vector.load %arg8[%c2_87, %c0_88, %c0_89] : memref<9x64x128xbf16, #tpu.memory_space<vmem>>, vector<1x64x128xbf16>
    %121 = vector.shape_cast %120 : vector<1x64x128xbf16> to vector<64x128xbf16>
    %cst_90 = arith.constant dense<0.000000e+00> : vector<32x128xf32>
    %122 = tpu.matmul %119, %121, %cst_90 {dimension_numbers = #tpu.dot_dimension_numbers<[1], [0], [0], [1], [0, 0, 1, 1], [], []>} : vector<32x64xbf16>, vector<64x128xbf16>, vector<32x128xf32> -> vector<32x128xf32>
    %123 = arith.addf %118, %122 : vector<32x128xf32>
    %124 = vector.extract_strided_slice %109 {offsets = [96, 0], sizes = [32, 64], strides = [1, 1]} : vector<288x64xbf16> to vector<32x64xbf16>
    %c3_91 = arith.constant 3 : index
    %c0_92 = arith.constant 0 : index
    %c0_93 = arith.constant 0 : index
    %125 = vector.load %arg8[%c3_91, %c0_92, %c0_93] : memref<9x64x128xbf16, #tpu.memory_space<vmem>>, vector<1x64x128xbf16>
    %126 = vector.shape_cast %125 : vector<1x64x128xbf16> to vector<64x128xbf16>
    %cst_94 = arith.constant dense<0.000000e+00> : vector<32x128xf32>
    %127 = tpu.matmul %124, %126, %cst_94 {dimension_numbers = #tpu.dot_dimension_numbers<[1], [0], [0], [1], [0, 0, 1, 1], [], []>} : vector<32x64xbf16>, vector<64x128xbf16>, vector<32x128xf32> -> vector<32x128xf32>
    %128 = arith.addf %123, %127 : vector<32x128xf32>
    %129 = vector.extract_strided_slice %109 {offsets = [128, 0], sizes = [32, 64], strides = [1, 1]} : vector<288x64xbf16> to vector<32x64xbf16>
    %c4_95 = arith.constant 4 : index
    %c0_96 = arith.constant 0 : index
    %c0_97 = arith.constant 0 : index
    %130 = vector.load %arg8[%c4_95, %c0_96, %c0_97] : memref<9x64x128xbf16, #tpu.memory_space<vmem>>, vector<1x64x128xbf16>
    %131 = vector.shape_cast %130 : vector<1x64x128xbf16> to vector<64x128xbf16>
    %cst_98 = arith.constant dense<0.000000e+00> : vector<32x128xf32>
    %132 = tpu.matmul %129, %131, %cst_98 {dimension_numbers = #tpu.dot_dimension_numbers<[1], [0], [0], [1], [0, 0, 1, 1], [], []>} : vector<32x64xbf16>, vector<64x128xbf16>, vector<32x128xf32> -> vector<32x128xf32>
    %133 = arith.addf %128, %132 : vector<32x128xf32>
    %134 = vector.extract_strided_slice %109 {offsets = [160, 0], sizes = [32, 64], strides = [1, 1]} : vector<288x64xbf16> to vector<32x64xbf16>
    %c5_99 = arith.constant 5 : index
    %c0_100 = arith.constant 0 : index
    %c0_101 = arith.constant 0 : index
    %135 = vector.load %arg8[%c5_99, %c0_100, %c0_101] : memref<9x64x128xbf16, #tpu.memory_space<vmem>>, vector<1x64x128xbf16>
    %136 = vector.shape_cast %135 : vector<1x64x128xbf16> to vector<64x128xbf16>
    %cst_102 = arith.constant dense<0.000000e+00> : vector<32x128xf32>
    %137 = tpu.matmul %134, %136, %cst_102 {dimension_numbers = #tpu.dot_dimension_numbers<[1], [0], [0], [1], [0, 0, 1, 1], [], []>} : vector<32x64xbf16>, vector<64x128xbf16>, vector<32x128xf32> -> vector<32x128xf32>
    %138 = arith.addf %133, %137 : vector<32x128xf32>
    %139 = vector.extract_strided_slice %109 {offsets = [192, 0], sizes = [32, 64], strides = [1, 1]} : vector<288x64xbf16> to vector<32x64xbf16>
    %c6_103 = arith.constant 6 : index
    %c0_104 = arith.constant 0 : index
    %c0_105 = arith.constant 0 : index
    %140 = vector.load %arg8[%c6_103, %c0_104, %c0_105] : memref<9x64x128xbf16, #tpu.memory_space<vmem>>, vector<1x64x128xbf16>
    %141 = vector.shape_cast %140 : vector<1x64x128xbf16> to vector<64x128xbf16>
    %cst_106 = arith.constant dense<0.000000e+00> : vector<32x128xf32>
    %142 = tpu.matmul %139, %141, %cst_106 {dimension_numbers = #tpu.dot_dimension_numbers<[1], [0], [0], [1], [0, 0, 1, 1], [], []>} : vector<32x64xbf16>, vector<64x128xbf16>, vector<32x128xf32> -> vector<32x128xf32>
    %143 = arith.addf %138, %142 : vector<32x128xf32>
    %144 = vector.extract_strided_slice %109 {offsets = [224, 0], sizes = [32, 64], strides = [1, 1]} : vector<288x64xbf16> to vector<32x64xbf16>
    %c7_107 = arith.constant 7 : index
    %c0_108 = arith.constant 0 : index
    %c0_109 = arith.constant 0 : index
    %145 = vector.load %arg8[%c7_107, %c0_108, %c0_109] : memref<9x64x128xbf16, #tpu.memory_space<vmem>>, vector<1x64x128xbf16>
    %146 = vector.shape_cast %145 : vector<1x64x128xbf16> to vector<64x128xbf16>
    %cst_110 = arith.constant dense<0.000000e+00> : vector<32x128xf32>
    %147 = tpu.matmul %144, %146, %cst_110 {dimension_numbers = #tpu.dot_dimension_numbers<[1], [0], [0], [1], [0, 0, 1, 1], [], []>} : vector<32x64xbf16>, vector<64x128xbf16>, vector<32x128xf32> -> vector<32x128xf32>
    %148 = arith.addf %143, %147 : vector<32x128xf32>
    %149 = vector.extract_strided_slice %109 {offsets = [256, 0], sizes = [32, 64], strides = [1, 1]} : vector<288x64xbf16> to vector<32x64xbf16>
    %c8_111 = arith.constant 8 : index
    %c0_112 = arith.constant 0 : index
    %c0_113 = arith.constant 0 : index
    %150 = vector.load %arg8[%c8_111, %c0_112, %c0_113] : memref<9x64x128xbf16, #tpu.memory_space<vmem>>, vector<1x64x128xbf16>
    %151 = vector.shape_cast %150 : vector<1x64x128xbf16> to vector<64x128xbf16>
    %cst_114 = arith.constant dense<0.000000e+00> : vector<32x128xf32>
    %152 = tpu.matmul %149, %151, %cst_114 {dimension_numbers = #tpu.dot_dimension_numbers<[1], [0], [0], [1], [0, 0, 1, 1], [], []>} : vector<32x64xbf16>, vector<64x128xbf16>, vector<32x128xf32> -> vector<32x128xf32>
    %153 = arith.addf %148, %152 : vector<32x128xf32>
    %c0_115 = arith.constant 0 : index
    %c0_116 = arith.constant 0 : index
    %154 = vector.load %arg9[%c0_115, %c0_116] : memref<1x128xf32, #tpu.memory_space<vmem>>, vector<1x128xf32>
    %155 = vector.broadcast %154 : vector<1x128xf32> to vector<32x128xf32>
    %156 = arith.addf %153, %155 : vector<32x128xf32>
    %cst_117 = arith.constant 0.000000e+00 : f32
    %157 = vector.broadcast %cst_117 : f32 to vector<32x128xf32>
    %158 = arith.maximumf %156, %157 : vector<32x128xf32>
    %159 = arith.truncf %158 : vector<32x128xf32> to vector<32x128xbf16>
    %c0_118 = arith.constant 0 : index
    %c0_119 = arith.constant 0 : index
    %160 = vector.load %arg10[%c0_118, %c0_119] : memref<288x32xbf16, #tpu.memory_space<vmem>>, vector<288x32xbf16>
    %cst_120 = arith.constant dense<0.000000e+00> : vector<288x128xf32>
    %161 = tpu.matmul %160, %159, %cst_120 {dimension_numbers = #tpu.dot_dimension_numbers<[1], [0], [0], [1], [0, 0, 1, 1], [], []>} : vector<288x32xbf16>, vector<32x128xbf16>, vector<288x128xf32> -> vector<288x128xf32>
    %162 = arith.truncf %161 : vector<288x128xf32> to vector<288x128xbf16>
    %163 = vector.extract_strided_slice %162 {offsets = [0, 0], sizes = [32, 128], strides = [1, 1]} : vector<288x128xbf16> to vector<32x128xbf16>
    %c0_121 = arith.constant 0 : index
    %c0_122 = arith.constant 0 : index
    %c0_123 = arith.constant 0 : index
    %164 = vector.load %arg11[%c0_121, %c0_122, %c0_123] : memref<9x128x128xbf16, #tpu.memory_space<vmem>>, vector<1x128x128xbf16>
    %165 = vector.shape_cast %164 : vector<1x128x128xbf16> to vector<128x128xbf16>
    %cst_124 = arith.constant dense<0.000000e+00> : vector<32x128xf32>
    %166 = tpu.matmul %163, %165, %cst_124 {dimension_numbers = #tpu.dot_dimension_numbers<[1], [0], [0], [1], [0, 0, 1, 1], [], []>} : vector<32x128xbf16>, vector<128x128xbf16>, vector<32x128xf32> -> vector<32x128xf32>
    %167 = vector.extract_strided_slice %162 {offsets = [32, 0], sizes = [32, 128], strides = [1, 1]} : vector<288x128xbf16> to vector<32x128xbf16>
    %c1_125 = arith.constant 1 : index
    %c0_126 = arith.constant 0 : index
    %c0_127 = arith.constant 0 : index
    %168 = vector.load %arg11[%c1_125, %c0_126, %c0_127] : memref<9x128x128xbf16, #tpu.memory_space<vmem>>, vector<1x128x128xbf16>
    %169 = vector.shape_cast %168 : vector<1x128x128xbf16> to vector<128x128xbf16>
    %cst_128 = arith.constant dense<0.000000e+00> : vector<32x128xf32>
    %170 = tpu.matmul %167, %169, %cst_128 {dimension_numbers = #tpu.dot_dimension_numbers<[1], [0], [0], [1], [0, 0, 1, 1], [], []>} : vector<32x128xbf16>, vector<128x128xbf16>, vector<32x128xf32> -> vector<32x128xf32>
    %171 = arith.addf %166, %170 : vector<32x128xf32>
    %172 = vector.extract_strided_slice %162 {offsets = [64, 0], sizes = [32, 128], strides = [1, 1]} : vector<288x128xbf16> to vector<32x128xbf16>
    %c2_129 = arith.constant 2 : index
    %c0_130 = arith.constant 0 : index
    %c0_131 = arith.constant 0 : index
    %173 = vector.load %arg11[%c2_129, %c0_130, %c0_131] : memref<9x128x128xbf16, #tpu.memory_space<vmem>>, vector<1x128x128xbf16>
    %174 = vector.shape_cast %173 : vector<1x128x128xbf16> to vector<128x128xbf16>
    %cst_132 = arith.constant dense<0.000000e+00> : vector<32x128xf32>
    %175 = tpu.matmul %172, %174, %cst_132 {dimension_numbers = #tpu.dot_dimension_numbers<[1], [0], [0], [1], [0, 0, 1, 1], [], []>} : vector<32x128xbf16>, vector<128x128xbf16>, vector<32x128xf32> -> vector<32x128xf32>
    %176 = arith.addf %171, %175 : vector<32x128xf32>
    %177 = vector.extract_strided_slice %162 {offsets = [96, 0], sizes = [32, 128], strides = [1, 1]} : vector<288x128xbf16> to vector<32x128xbf16>
    %c3_133 = arith.constant 3 : index
    %c0_134 = arith.constant 0 : index
    %c0_135 = arith.constant 0 : index
    %178 = vector.load %arg11[%c3_133, %c0_134, %c0_135] : memref<9x128x128xbf16, #tpu.memory_space<vmem>>, vector<1x128x128xbf16>
    %179 = vector.shape_cast %178 : vector<1x128x128xbf16> to vector<128x128xbf16>
    %cst_136 = arith.constant dense<0.000000e+00> : vector<32x128xf32>
    %180 = tpu.matmul %177, %179, %cst_136 {dimension_numbers = #tpu.dot_dimension_numbers<[1], [0], [0], [1], [0, 0, 1, 1], [], []>} : vector<32x128xbf16>, vector<128x128xbf16>, vector<32x128xf32> -> vector<32x128xf32>
    %181 = arith.addf %176, %180 : vector<32x128xf32>
    %182 = vector.extract_strided_slice %162 {offsets = [128, 0], sizes = [32, 128], strides = [1, 1]} : vector<288x128xbf16> to vector<32x128xbf16>
    %c4_137 = arith.constant 4 : index
    %c0_138 = arith.constant 0 : index
    %c0_139 = arith.constant 0 : index
    %183 = vector.load %arg11[%c4_137, %c0_138, %c0_139] : memref<9x128x128xbf16, #tpu.memory_space<vmem>>, vector<1x128x128xbf16>
    %184 = vector.shape_cast %183 : vector<1x128x128xbf16> to vector<128x128xbf16>
    %cst_140 = arith.constant dense<0.000000e+00> : vector<32x128xf32>
    %185 = tpu.matmul %182, %184, %cst_140 {dimension_numbers = #tpu.dot_dimension_numbers<[1], [0], [0], [1], [0, 0, 1, 1], [], []>} : vector<32x128xbf16>, vector<128x128xbf16>, vector<32x128xf32> -> vector<32x128xf32>
    %186 = arith.addf %181, %185 : vector<32x128xf32>
    %187 = vector.extract_strided_slice %162 {offsets = [160, 0], sizes = [32, 128], strides = [1, 1]} : vector<288x128xbf16> to vector<32x128xbf16>
    %c5_141 = arith.constant 5 : index
    %c0_142 = arith.constant 0 : index
    %c0_143 = arith.constant 0 : index
    %188 = vector.load %arg11[%c5_141, %c0_142, %c0_143] : memref<9x128x128xbf16, #tpu.memory_space<vmem>>, vector<1x128x128xbf16>
    %189 = vector.shape_cast %188 : vector<1x128x128xbf16> to vector<128x128xbf16>
    %cst_144 = arith.constant dense<0.000000e+00> : vector<32x128xf32>
    %190 = tpu.matmul %187, %189, %cst_144 {dimension_numbers = #tpu.dot_dimension_numbers<[1], [0], [0], [1], [0, 0, 1, 1], [], []>} : vector<32x128xbf16>, vector<128x128xbf16>, vector<32x128xf32> -> vector<32x128xf32>
    %191 = arith.addf %186, %190 : vector<32x128xf32>
    %192 = vector.extract_strided_slice %162 {offsets = [192, 0], sizes = [32, 128], strides = [1, 1]} : vector<288x128xbf16> to vector<32x128xbf16>
    %c6_145 = arith.constant 6 : index
    %c0_146 = arith.constant 0 : index
    %c0_147 = arith.constant 0 : index
    %193 = vector.load %arg11[%c6_145, %c0_146, %c0_147] : memref<9x128x128xbf16, #tpu.memory_space<vmem>>, vector<1x128x128xbf16>
    %194 = vector.shape_cast %193 : vector<1x128x128xbf16> to vector<128x128xbf16>
    %cst_148 = arith.constant dense<0.000000e+00> : vector<32x128xf32>
    %195 = tpu.matmul %192, %194, %cst_148 {dimension_numbers = #tpu.dot_dimension_numbers<[1], [0], [0], [1], [0, 0, 1, 1], [], []>} : vector<32x128xbf16>, vector<128x128xbf16>, vector<32x128xf32> -> vector<32x128xf32>
    %196 = arith.addf %191, %195 : vector<32x128xf32>
    %197 = vector.extract_strided_slice %162 {offsets = [224, 0], sizes = [32, 128], strides = [1, 1]} : vector<288x128xbf16> to vector<32x128xbf16>
    %c7_149 = arith.constant 7 : index
    %c0_150 = arith.constant 0 : index
    %c0_151 = arith.constant 0 : index
    %198 = vector.load %arg11[%c7_149, %c0_150, %c0_151] : memref<9x128x128xbf16, #tpu.memory_space<vmem>>, vector<1x128x128xbf16>
    %199 = vector.shape_cast %198 : vector<1x128x128xbf16> to vector<128x128xbf16>
    %cst_152 = arith.constant dense<0.000000e+00> : vector<32x128xf32>
    %200 = tpu.matmul %197, %199, %cst_152 {dimension_numbers = #tpu.dot_dimension_numbers<[1], [0], [0], [1], [0, 0, 1, 1], [], []>} : vector<32x128xbf16>, vector<128x128xbf16>, vector<32x128xf32> -> vector<32x128xf32>
    %201 = arith.addf %196, %200 : vector<32x128xf32>
    %202 = vector.extract_strided_slice %162 {offsets = [256, 0], sizes = [32, 128], strides = [1, 1]} : vector<288x128xbf16> to vector<32x128xbf16>
    %c8_153 = arith.constant 8 : index
    %c0_154 = arith.constant 0 : index
    %c0_155 = arith.constant 0 : index
    %203 = vector.load %arg11[%c8_153, %c0_154, %c0_155] : memref<9x128x128xbf16, #tpu.memory_space<vmem>>, vector<1x128x128xbf16>
    %204 = vector.shape_cast %203 : vector<1x128x128xbf16> to vector<128x128xbf16>
    %cst_156 = arith.constant dense<0.000000e+00> : vector<32x128xf32>
    %205 = tpu.matmul %202, %204, %cst_156 {dimension_numbers = #tpu.dot_dimension_numbers<[1], [0], [0], [1], [0, 0, 1, 1], [], []>} : vector<32x128xbf16>, vector<128x128xbf16>, vector<32x128xf32> -> vector<32x128xf32>
    %206 = arith.addf %201, %205 : vector<32x128xf32>
    %c0_157 = arith.constant 0 : index
    %c0_158 = arith.constant 0 : index
    %207 = vector.load %arg12[%c0_157, %c0_158] : memref<1x128xf32, #tpu.memory_space<vmem>>, vector<1x128xf32>
    %208 = vector.broadcast %207 : vector<1x128xf32> to vector<32x128xf32>
    %209 = arith.addf %206, %208 : vector<32x128xf32>
    %cst_159 = arith.constant 0.000000e+00 : f32
    %210 = vector.broadcast %cst_159 : f32 to vector<32x128xf32>
    %211 = arith.maximumf %209, %210 : vector<32x128xf32>
    %212 = arith.truncf %211 : vector<32x128xf32> to vector<32x128xbf16>
    %c0_160 = arith.constant 0 : index
    %c0_161 = arith.constant 0 : index
    %213 = vector.load %arg13[%c0_160, %c0_161] : memref<72x32xbf16, #tpu.memory_space<vmem>>, vector<72x32xbf16>
    %cst_162 = arith.constant dense<0.000000e+00> : vector<72x128xf32>
    %214 = tpu.matmul %213, %212, %cst_162 {dimension_numbers = #tpu.dot_dimension_numbers<[1], [0], [0], [1], [0, 0, 1, 1], [], []>} : vector<72x32xbf16>, vector<32x128xbf16>, vector<72x128xf32> -> vector<72x128xf32>
    %215 = arith.truncf %214 : vector<72x128xf32> to vector<72x128xbf16>
    %216 = vector.extract_strided_slice %215 {offsets = [0, 0], sizes = [8, 128], strides = [1, 1]} : vector<72x128xbf16> to vector<8x128xbf16>
    %c0_163 = arith.constant 0 : index
    %c0_164 = arith.constant 0 : index
    %c0_165 = arith.constant 0 : index
    %217 = vector.load %arg14[%c0_163, %c0_164, %c0_165] : memref<9x128x256xbf16, #tpu.memory_space<vmem>>, vector<1x128x256xbf16>
    %218 = vector.shape_cast %217 : vector<1x128x256xbf16> to vector<128x256xbf16>
    %cst_166 = arith.constant dense<0.000000e+00> : vector<8x256xf32>
    %219 = tpu.matmul %216, %218, %cst_166 {dimension_numbers = #tpu.dot_dimension_numbers<[1], [0], [0], [1], [0, 0, 1, 1], [], []>} : vector<8x128xbf16>, vector<128x256xbf16>, vector<8x256xf32> -> vector<8x256xf32>
    %220 = vector.extract_strided_slice %215 {offsets = [8, 0], sizes = [8, 128], strides = [1, 1]} : vector<72x128xbf16> to vector<8x128xbf16>
    %c1_167 = arith.constant 1 : index
    %c0_168 = arith.constant 0 : index
    %c0_169 = arith.constant 0 : index
    %221 = vector.load %arg14[%c1_167, %c0_168, %c0_169] : memref<9x128x256xbf16, #tpu.memory_space<vmem>>, vector<1x128x256xbf16>
    %222 = vector.shape_cast %221 : vector<1x128x256xbf16> to vector<128x256xbf16>
    %cst_170 = arith.constant dense<0.000000e+00> : vector<8x256xf32>
    %223 = tpu.matmul %220, %222, %cst_170 {dimension_numbers = #tpu.dot_dimension_numbers<[1], [0], [0], [1], [0, 0, 1, 1], [], []>} : vector<8x128xbf16>, vector<128x256xbf16>, vector<8x256xf32> -> vector<8x256xf32>
    %224 = arith.addf %219, %223 : vector<8x256xf32>
    %225 = vector.extract_strided_slice %215 {offsets = [16, 0], sizes = [8, 128], strides = [1, 1]} : vector<72x128xbf16> to vector<8x128xbf16>
    %c2_171 = arith.constant 2 : index
    %c0_172 = arith.constant 0 : index
    %c0_173 = arith.constant 0 : index
    %226 = vector.load %arg14[%c2_171, %c0_172, %c0_173] : memref<9x128x256xbf16, #tpu.memory_space<vmem>>, vector<1x128x256xbf16>
    %227 = vector.shape_cast %226 : vector<1x128x256xbf16> to vector<128x256xbf16>
    %cst_174 = arith.constant dense<0.000000e+00> : vector<8x256xf32>
    %228 = tpu.matmul %225, %227, %cst_174 {dimension_numbers = #tpu.dot_dimension_numbers<[1], [0], [0], [1], [0, 0, 1, 1], [], []>} : vector<8x128xbf16>, vector<128x256xbf16>, vector<8x256xf32> -> vector<8x256xf32>
    %229 = arith.addf %224, %228 : vector<8x256xf32>
    %230 = vector.extract_strided_slice %215 {offsets = [24, 0], sizes = [8, 128], strides = [1, 1]} : vector<72x128xbf16> to vector<8x128xbf16>
    %c3_175 = arith.constant 3 : index
    %c0_176 = arith.constant 0 : index
    %c0_177 = arith.constant 0 : index
    %231 = vector.load %arg14[%c3_175, %c0_176, %c0_177] : memref<9x128x256xbf16, #tpu.memory_space<vmem>>, vector<1x128x256xbf16>
    %232 = vector.shape_cast %231 : vector<1x128x256xbf16> to vector<128x256xbf16>
    %cst_178 = arith.constant dense<0.000000e+00> : vector<8x256xf32>
    %233 = tpu.matmul %230, %232, %cst_178 {dimension_numbers = #tpu.dot_dimension_numbers<[1], [0], [0], [1], [0, 0, 1, 1], [], []>} : vector<8x128xbf16>, vector<128x256xbf16>, vector<8x256xf32> -> vector<8x256xf32>
    %234 = arith.addf %229, %233 : vector<8x256xf32>
    %235 = vector.extract_strided_slice %215 {offsets = [32, 0], sizes = [8, 128], strides = [1, 1]} : vector<72x128xbf16> to vector<8x128xbf16>
    %c4_179 = arith.constant 4 : index
    %c0_180 = arith.constant 0 : index
    %c0_181 = arith.constant 0 : index
    %236 = vector.load %arg14[%c4_179, %c0_180, %c0_181] : memref<9x128x256xbf16, #tpu.memory_space<vmem>>, vector<1x128x256xbf16>
    %237 = vector.shape_cast %236 : vector<1x128x256xbf16> to vector<128x256xbf16>
    %cst_182 = arith.constant dense<0.000000e+00> : vector<8x256xf32>
    %238 = tpu.matmul %235, %237, %cst_182 {dimension_numbers = #tpu.dot_dimension_numbers<[1], [0], [0], [1], [0, 0, 1, 1], [], []>} : vector<8x128xbf16>, vector<128x256xbf16>, vector<8x256xf32> -> vector<8x256xf32>
    %239 = arith.addf %234, %238 : vector<8x256xf32>
    %240 = vector.extract_strided_slice %215 {offsets = [40, 0], sizes = [8, 128], strides = [1, 1]} : vector<72x128xbf16> to vector<8x128xbf16>
    %c5_183 = arith.constant 5 : index
    %c0_184 = arith.constant 0 : index
    %c0_185 = arith.constant 0 : index
    %241 = vector.load %arg14[%c5_183, %c0_184, %c0_185] : memref<9x128x256xbf16, #tpu.memory_space<vmem>>, vector<1x128x256xbf16>
    %242 = vector.shape_cast %241 : vector<1x128x256xbf16> to vector<128x256xbf16>
    %cst_186 = arith.constant dense<0.000000e+00> : vector<8x256xf32>
    %243 = tpu.matmul %240, %242, %cst_186 {dimension_numbers = #tpu.dot_dimension_numbers<[1], [0], [0], [1], [0, 0, 1, 1], [], []>} : vector<8x128xbf16>, vector<128x256xbf16>, vector<8x256xf32> -> vector<8x256xf32>
    %244 = arith.addf %239, %243 : vector<8x256xf32>
    %245 = vector.extract_strided_slice %215 {offsets = [48, 0], sizes = [8, 128], strides = [1, 1]} : vector<72x128xbf16> to vector<8x128xbf16>
    %c6_187 = arith.constant 6 : index
    %c0_188 = arith.constant 0 : index
    %c0_189 = arith.constant 0 : index
    %246 = vector.load %arg14[%c6_187, %c0_188, %c0_189] : memref<9x128x256xbf16, #tpu.memory_space<vmem>>, vector<1x128x256xbf16>
    %247 = vector.shape_cast %246 : vector<1x128x256xbf16> to vector<128x256xbf16>
    %cst_190 = arith.constant dense<0.000000e+00> : vector<8x256xf32>
    %248 = tpu.matmul %245, %247, %cst_190 {dimension_numbers = #tpu.dot_dimension_numbers<[1], [0], [0], [1], [0, 0, 1, 1], [], []>} : vector<8x128xbf16>, vector<128x256xbf16>, vector<8x256xf32> -> vector<8x256xf32>
    %249 = arith.addf %244, %248 : vector<8x256xf32>
    %250 = vector.extract_strided_slice %215 {offsets = [56, 0], sizes = [8, 128], strides = [1, 1]} : vector<72x128xbf16> to vector<8x128xbf16>
    %c7_191 = arith.constant 7 : index
    %c0_192 = arith.constant 0 : index
    %c0_193 = arith.constant 0 : index
    %251 = vector.load %arg14[%c7_191, %c0_192, %c0_193] : memref<9x128x256xbf16, #tpu.memory_space<vmem>>, vector<1x128x256xbf16>
    %252 = vector.shape_cast %251 : vector<1x128x256xbf16> to vector<128x256xbf16>
    %cst_194 = arith.constant dense<0.000000e+00> : vector<8x256xf32>
    %253 = tpu.matmul %250, %252, %cst_194 {dimension_numbers = #tpu.dot_dimension_numbers<[1], [0], [0], [1], [0, 0, 1, 1], [], []>} : vector<8x128xbf16>, vector<128x256xbf16>, vector<8x256xf32> -> vector<8x256xf32>
    %254 = arith.addf %249, %253 : vector<8x256xf32>
    %255 = vector.extract_strided_slice %215 {offsets = [64, 0], sizes = [8, 128], strides = [1, 1]} : vector<72x128xbf16> to vector<8x128xbf16>
    %c8_195 = arith.constant 8 : index
    %c0_196 = arith.constant 0 : index
    %c0_197 = arith.constant 0 : index
    %256 = vector.load %arg14[%c8_195, %c0_196, %c0_197] : memref<9x128x256xbf16, #tpu.memory_space<vmem>>, vector<1x128x256xbf16>
    %257 = vector.shape_cast %256 : vector<1x128x256xbf16> to vector<128x256xbf16>
    %cst_198 = arith.constant dense<0.000000e+00> : vector<8x256xf32>
    %258 = tpu.matmul %255, %257, %cst_198 {dimension_numbers = #tpu.dot_dimension_numbers<[1], [0], [0], [1], [0, 0, 1, 1], [], []>} : vector<8x128xbf16>, vector<128x256xbf16>, vector<8x256xf32> -> vector<8x256xf32>
    %259 = arith.addf %254, %258 : vector<8x256xf32>
    %c0_199 = arith.constant 0 : index
    %c0_200 = arith.constant 0 : index
    %260 = vector.load %arg15[%c0_199, %c0_200] : memref<1x256xf32, #tpu.memory_space<vmem>>, vector<1x256xf32>
    %261 = vector.broadcast %260 : vector<1x256xf32> to vector<8x256xf32>
    %262 = arith.addf %259, %261 : vector<8x256xf32>
    %c0_201 = arith.constant 0 : index
    %c0_202 = arith.constant 0 : index
    %263 = vector.load %arg16[%c0_201, %c0_202] : memref<8x256xf32, #tpu.memory_space<vmem>>, vector<8x256xf32>
    tpu.vector_store %arg16[%c0_201, %c0_202], %262 {strides = array<i32>} : memref<8x256xf32, #tpu.memory_space<vmem>>, vector<8x256xf32>,
    return
  }
}

</mosaic_0001>

<bundles_post_ra>
// kernel: run.1
= control target key start
LH: loop header
LB: loop body
LE: loop exit
PB: predicated region body
PF: predicated region fallthrough
CT: control target
= control target key end

     0   :  { %v19076_v0 = vmov 0   ;;  %vm3356_vm0 = vcmask 1041408   ;;  %vm3331_vm1 = vcmask 31744   ;;  %vm5920_vm2 = vcmask 523264   ;;  %s19058_s0 = inlined_call_operand.vmem [shape: bf16[512,4], index: 0, kind: input, shape index: {}]   ;;  %s19059_s1 = inlined_call_operand.vmem [shape: bf16[1152,512], index: 1, kind: input, shape index: {}]   ;;  %s19060_s2 = inlined_call_operand.vmem [shape: bf16[9,4,64], index: 2, kind: input, shape index: {}]   ;;  %s19061_s4 = inlined_call_operand.vmem [shape: bf16[1152,128], index: 4, kind: input, shape index: {}]   ;;  %s19062_s5 = inlined_call_operand.vmem [shape: bf16[9,64,64], index: 5, kind: input, shape index: {}]   ;;  %s19063_s3 = inlined_call_operand.vmem [shape: f32[1,64], index: 3, kind: input, shape index: {}]   ;;  %s19064_s8 = inlined_call_operand.vmem [shape: bf16[9,64,128], index: 8, kind: input, shape index: {}]   ;;  %s19065_s7 = inlined_call_operand.vmem [shape: bf16[288,128], index: 7, kind: input, shape index: {}]   ;;  %s19066_s6 = inlined_call_operand.vmem [shape: f32[1,64], index: 6, kind: input, shape index: {}]   ;;  %s19067_s10 = inlined_call_operand.vmem [shape: bf16[288,32], index: 10, kind: input, shape index: {}]   ;;  %s19068_s11 = inlined_call_operand.vmem [shape: bf16[9,128,128], index: 11, kind: input, shape index: {}]   ;;  %s19069_s9 = inlined_call_operand.vmem [shape: f32[1,128], index: 9, kind: input, shape index: {}]   ;;  %s19070_s13 = inlined_call_operand.vmem [shape: bf16[72,32], index: 13, kind: input, shape index: {}]   ;;  %s19071_s14 = inlined_call_operand.vmem [shape: bf16[9,128,256], index: 14, kind: input, shape index: {}]   ;;  %s19072_s12 = inlined_call_operand.vmem [shape: f32[1,128], index: 12, kind: input, shape index: {}]   ;;  %s19073_s15 = inlined_call_operand.vmem [shape: f32[1,256], index: 15, kind: input, shape index: {}]   ;;  %s19074_s16 = inlined_call_operand.vmem [shape: f32[8,256], index: 16, kind: output, shape index: {}]  }
   0x1   :  { %19078 = sst [smem:[#allocation2_spill]] %s19058_s0  ;;  %2038 = vmatprep.subr.bf16.mxu0 %v19076_v0  ;;  %v14788_v6 = vld [vmem:[%s19059_s1 + $0x4] ss:$16 sps:$4 sm:$0xff]   ;;  %v14786_v18 = vld [vmem:[%s19059_s1] ss:$16 sps:$4 sm:$0xff]   ;;  %vm8725_vm3 = vcmask 261120  }
   0x2   :  { %s19079_s23 = sld [smem:[#allocation2_spill]]  ;;  %2070 = vmatprep.mubr.bf16.mxu0 %v14788_v6  ;;  %v14790_v20 = vld [vmem:[%s19059_s1 + $0x24] ss:$16 sps:$4 sm:$0xff]   ;;  %v14792_v22 = vld [vmem:[%s19059_s1 + $0x20] ss:$16 sps:$4 sm:$0xff]   ;;  %vm15709_vm4 = vmmov 0  }
   0x3   :  { %v14793_v23 = vld [vmem:[%s19059_s1 + $0x44] ss:$16 sps:$4 sm:$0xff]   ;;  %v14795_v26 = vld [vmem:[%s19059_s1 + $0x40] ss:$16 sps:$4 sm:$0xff]  }
   0x4   :  { %v14796_v27 = vld [vmem:[%s19059_s1 + $0x64] ss:$16 sps:$4 sm:$0xff]   ;;  %v14798_v29 = vld [vmem:[%s19059_s1 + $0x60] ss:$16 sps:$4 sm:$0xff]  }
   0x5   :  { %v14799_v30 = vld [vmem:[%s19059_s1 + $0x84] ss:$16 sps:$4 sm:$0xff]   ;;  %v14801_v31 = vld [vmem:[%s19059_s1 + $0x80] ss:$16 sps:$4 sm:$0xff]  }
   0x6   :  { %v14803_v32 = vld [vmem:[%s19059_s1 + $0xa4] ss:$16 sps:$4 sm:$0xff]   ;;  %v14805_v33 = vld [vmem:[%s19059_s1 + $0xa0] ss:$16 sps:$4 sm:$0xff]  }
   0x7   :  { %v14806_v34 = vld [vmem:[%s19059_s1 + $0xc4] ss:$16 sps:$4 sm:$0xff]   ;;  %v14808_v35 = vld [vmem:[%s19059_s1 + $0xc0] ss:$16 sps:$4 sm:$0xff]  }
   0x8   :  { %v14770_v1 = vld [vmem:[%s19079_s23] sm:$0xff]   ;;  %v14771_v2 = vld [vmem:[%s19079_s23 + $0x8] sm:$0xff]   ;;  %v14772_v3 = vld [vmem:[%s19079_s23 + $0x10] sm:$0xff]  }
   0x9   :  { %2039 = vmatpush1.bf16.msra.mxu0 %v14770_v1  ;;  %v14773_v4 = vld [vmem:[%s19079_s23 + $0x18] sm:$0xff]   ;;  %v14774_v5 = vld [vmem:[%s19079_s23 + $0x20] sm:$0xff]   ;;  %v14775_v7 = vld [vmem:[%s19079_s23 + $0x28] sm:$0xff]  }
   0xa   :  { %2040 = vmatprep.subr.bf16.mxu0 %v19076_v0  ;;  %v14776_v8 = vld [vmem:[%s19079_s23 + $0x30] sm:$0xff]   ;;  %v14777_v9 = vld [vmem:[%s19079_s23 + $0x38] sm:$0xff]   ;;  %v14778_v10 = vld [vmem:[%s19079_s23 + $0x40] sm:$0xff]  }
   0xb   :  { %v14779_v11 = vld [vmem:[%s19079_s23 + $0x48] sm:$0xff]   ;;  %v14780_v12 = vld [vmem:[%s19079_s23 + $0x50] sm:$0xff]   ;;  %v14781_v13 = vld [vmem:[%s19079_s23 + $0x58] sm:$0xff]  }
   0xc   :  { %v14782_v14 = vld [vmem:[%s19079_s23 + $0x60] sm:$0xff]   ;;  %v14783_v15 = vld [vmem:[%s19079_s23 + $0x68] sm:$0xff]   ;;  %v14784_v16 = vld [vmem:[%s19079_s23 + $0x70] sm:$0xff]  }
   0xd   :  { %2041 = vmatpush1.bf16.msra.mxu0 %v14771_v2  ;;  %v14785_v17 = vld [vmem:[%s19079_s23 + $0x78] sm:$0xff]   ;;  %v14789_v19 = vld [vmem:[%s19079_s23 + $0x80] sm:$0xff]   ;;  %v14802_v21 = vld [vmem:[%s19079_s23 + $0x88] sm:$0xff]  }
   0xe   :  { %2042 = vmatprep.subr.bf16.mxu0 %v19076_v0  ;;  %v14818_v24 = vld [vmem:[%s19079_s23 + $0x90] sm:$0xff]   ;;  %v14831_v25 = vld [vmem:[%s19079_s23 + $0x98] sm:$0xff]   ;;  %v14847_v28 = vld [vmem:[%s19079_s23 + $0xa0] sm:$0xff]  }
   0xf   :  { %v14809_v36 = vld [vmem:[%s19059_s1 + $0xe4] ss:$16 sps:$4 sm:$0xff]   ;;  %v14860_v37 = vld [vmem:[%s19079_s23 + $0xa8] sm:$0xff]   ;;  %v14811_v38 = vld [vmem:[%s19059_s1 + $0xe0] ss:$16 sps:$4 sm:$0xff]  }
  0x10   :  { %v14812_v39 = vld [vmem:[%s19059_s1 + $0x104] ss:$16 sps:$4 sm:$0xff]   ;;  %v14814_v40 = vld [vmem:[%s19059_s1 + $0x100] ss:$16 sps:$4 sm:$0xff]   ;;  %v14889_v57 = vld [vmem:[%s19079_s23 + $0xb8] sm:$0xff]  }
  0x11   :  { %2043 = vmatpush1.bf16.msra.mxu0 %v14772_v3  ;;  %v14815_v41 = vld [vmem:[%s19059_s1 + $0x124] ss:$16 sps:$4 sm:$0xff]   ;;  %v14817_v42 = vld [vmem:[%s19059_s1 + $0x120] ss:$16 sps:$4 sm:$0xff]  }
  0x12   :  { %2044 = vmatprep.subr.bf16.mxu0 %v19076_v0  ;;  %v14819_v43 = vld [vmem:[%s19059_s1 + $0x144] ss:$16 sps:$4 sm:$0xff]   ;;  %v14821_v44 = vld [vmem:[%s19059_s1 + $0x140] ss:$16 sps:$4 sm:$0xff]  }
  0x13   :  { %v14822_v45 = vld [vmem:[%s19059_s1 + $0x164] ss:$16 sps:$4 sm:$0xff]   ;;  %v14824_v46 = vld [vmem:[%s19059_s1 + $0x160] ss:$16 sps:$4 sm:$0xff]  }
  0x14   :  { %v14825_v47 = vld [vmem:[%s19059_s1 + $0x184] ss:$16 sps:$4 sm:$0xff]   ;;  %v14827_v49 = vld [vmem:[%s19059_s1 + $0x180] ss:$16 sps:$4 sm:$0xff]  }
  0x15   :  { %2045 = vmatpush1.bf16.msra.mxu0 %v14773_v4  ;;  %v14876_v48 = vld [vmem:[%s19079_s23 + $0xb0] sm:$0xff]  }
  0x16   :  { %2046 = vmatprep.subr.bf16.mxu0 %v19076_v0  ;;  %v14828_v50 = vld [vmem:[%s19059_s1 + $0x1a4] ss:$16 sps:$4 sm:$0xff]   ;;  %v14830_v51 = vld [vmem:[%s19059_s1 + $0x1a0] ss:$16 sps:$4 sm:$0xff]  }
  0x17   :  { %v14832_v52 = vld [vmem:[%s19059_s1 + $0x1c4] ss:$16 sps:$4 sm:$0xff]   ;;  %v14834_v53 = vld [vmem:[%s19059_s1 + $0x1c0] ss:$16 sps:$4 sm:$0xff]  }
  0x18   :  { %v14835_v54 = vld [vmem:[%s19059_s1 + $0x1e4] ss:$16 sps:$4 sm:$0xff]   ;;  %v14837_v55 = vld [vmem:[%s19059_s1 + $0x1e0] ss:$16 sps:$4 sm:$0xff]  }
  0x19   :  { %2047 = vmatpush1.bf16.msra.mxu0 %v14774_v5  ;;  %v14838_v56 = vld [vmem:[%s19059_s1 + $0x204] ss:$16 sps:$4 sm:$0xff]   ;;  %v14840_v58 = vld [vmem:[%s19059_s1 + $0x200] ss:$16 sps:$4 sm:$0xff]  }
  0x1a   :  { %2048 = vmatprep.subr.bf16.mxu0 %v19076_v0  ;;  %v14841_v59 = vld [vmem:[%s19059_s1 + $0x224] ss:$16 sps:$4 sm:$0xff]   ;;  %v14843_v60 = vld [vmem:[%s19059_s1 + $0x220] ss:$16 sps:$4 sm:$0xff]  }
  0x1b   :  { %v14844_v61 = vld [vmem:[%s19059_s1 + $0x244] ss:$16 sps:$4 sm:$0xff]   ;;  %v14846_v62 = vld [vmem:[%s19059_s1 + $0x240] ss:$16 sps:$4 sm:$0xff]  }
  0x1c   :  { %v14848_v63 = vld [vmem:[%s19059_s1 + $0x264] ss:$16 sps:$4 sm:$0xff]   ;;  %v14850_v1 = vld [vmem:[%s19059_s1 + $0x260] ss:$16 sps:$4 sm:$0xff]  }
  0x1d   :  { %2049 = vmatpush1.bf16.msra.mxu0 %v14775_v7  ;;  %v14851_v2 = vld [vmem:[%s19059_s1 + $0x284] ss:$16 sps:$4 sm:$0xff]   ;;  %v14853_v3 = vld [vmem:[%s19059_s1 + $0x280] ss:$16 sps:$4 sm:$0xff]  }
  0x1e   :  { %2050 = vmatprep.subr.bf16.mxu0 %v19076_v0  ;;  %v14854_v4 = vld [vmem:[%s19059_s1 + $0x2a4] ss:$16 sps:$4 sm:$0xff]   ;;  %v14856_v6 = vld [vmem:[%s19059_s1 + $0x2a0] ss:$16 sps:$4 sm:$0xff]  }
  0x1f   :  { %v14905_v5 = vld [vmem:[%s19079_s23 + $0xc0] sm:$0xff]  }
  0x20   :  { %v14857_v7 = vld [vmem:[%s19059_s1 + $0x2c4] ss:$16 sps:$4 sm:$0xff]  }
  0x21   :  { %2051 = vmatpush1.bf16.msra.mxu0 %v14776_v8  ;;  %v14859_v8 = vld [vmem:[%s19059_s1 + $0x2c0] ss:$16 sps:$4 sm:$0xff]  }
  0x22   :  { %2052 = vmatprep.subr.bf16.mxu0 %v19076_v0 }
  0x25   :  { %2053 = vmatpush1.bf16.msra.mxu0 %v14777_v9  ;;  %v14861_v9 = vld [vmem:[%s19059_s1 + $0x2e4] ss:$16 sps:$4 sm:$0xff]  }
  0x26   :  { %2054 = vmatprep.subr.bf16.mxu0 %v19076_v0 }
  0x29   :  { %2055 = vmatpush1.bf16.msra.mxu0 %v14778_v10  ;;  %v14863_v10 = vld [vmem:[%s19059_s1 + $0x2e0] ss:$16 sps:$4 sm:$0xff]  }
  0x2a   :  { %2056 = vmatprep.subr.bf16.mxu0 %v19076_v0 }
  0x2d   :  { %2057 = vmatpush1.bf16.msra.mxu0 %v14779_v11  ;;  %v14864_v11 = vld [vmem:[%s19059_s1 + $0x304] ss:$16 sps:$4 sm:$0xff]  }
  0x2e   :  { %2058 = vmatprep.subr.bf16.mxu0 %v19076_v0 }
  0x31   :  { %2059 = vmatpush1.bf16.msra.mxu0 %v14780_v12  ;;  %v14866_v12 = vld [vmem:[%s19059_s1 + $0x300] ss:$16 sps:$4 sm:$0xff]  }
  0x32   :  { %2060 = vmatprep.subr.bf16.mxu0 %v19076_v0 }
  0x35   :  { %2061 = vmatpush1.bf16.msra.mxu0 %v14781_v13  ;;  %v14867_v13 = vld [vmem:[%s19059_s1 + $0x324] ss:$16 sps:$4 sm:$0xff]  }
  0x36   :  { %2062 = vmatprep.subr.bf16.mxu0 %v19076_v0 }
  0x39   :  { %2063 = vmatpush1.bf16.msra.mxu0 %v14782_v14  ;;  %v14918_v14 = vld [vmem:[%s19079_s23 + $0xc8] sm:$0xff]  }
  0x3a   :  { %2064 = vmatprep.subr.bf16.mxu0 %v19076_v0 }
  0x3d   :  { %2065 = vmatpush1.bf16.msra.mxu0 %v14783_v15  ;;  %v14869_v15 = vld [vmem:[%s19059_s1 + $0x320] ss:$16 sps:$4 sm:$0xff]  }
  0x3e   :  { %2066 = vmatprep.subr.bf16.mxu0 %v19076_v0 }
  0x41   :  { %2067 = vmatpush1.bf16.msra.mxu0 %v14784_v16  ;;  %v14870_v16 = vld [vmem:[%s19059_s1 + $0x344] ss:$16 sps:$4 sm:$0xff]  }
  0x42   :  { %2068 = vmatprep.subr.bf16.mxu0 %v19076_v0 }
  0x45   :  { %2069 = vmatpush1.bf16.msra.mxu0 %v14785_v17  ;;  %v14872_v17 = vld [vmem:[%s19059_s1 + $0x340] ss:$16 sps:$4 sm:$0xff]  }
  0x46   :  { %2647 = vmatprep.subr.bf16.mxu0 %v19076_v0 }
  0x48   :  { %2071 = vmatmul.mubr.bf16.vlgmr.msra.gmra.mrb[0].mxu0 %v14786_v18  ;;  %v14873_v18 = vld [vmem:[%s19059_s1 + $0x364] ss:$16 sps:$4 sm:$0xff]  }
  0x49   :  { %2648 = vmatpush1.bf16.msra.mxu0 %v14789_v19  ;;  %2078 = vmatprep.mubr.bf16.mxu0 %v14790_v20  ;;  %v14875_v19 = vld [vmem:[%s19059_s1 + $0x360] ss:$16 sps:$4 sm:$0xff]   ;;  %v14877_v20 = vld [vmem:[%s19059_s1 + $0x384] ss:$16 sps:$4 sm:$0xff]  }
  0x4a   :  { %2649 = vmatprep.subr.bf16.mxu0 %v19076_v0 }
  0x4d   :  { %2650 = vmatpush1.bf16.msra.mxu0 %v14802_v21  ;;  %v14879_v21 = vld [vmem:[%s19059_s1 + $0x380] ss:$16 sps:$4 sm:$0xff]  }
  0x4e   :  { %2651 = vmatprep.subr.bf16.mxu0 %v19076_v0 }
  0x50   :  { %2079 = vmatmul.mubr.bf16.gmra.mrb[4].mxu0 %v14792_v22  ;;  %v14880_v22 = vld [vmem:[%s19059_s1 + $0x3a4] ss:$16 sps:$4 sm:$0xff]  }
  0x51   :  { %2086 = vmatprep.mubr.bf16.mxu0 %v14793_v23  ;;  %2652 = vmatpush1.bf16.msra.mxu0 %v14818_v24  ;;  %v14882_v23 = vld [vmem:[%s19059_s1 + $0x3a0] ss:$16 sps:$4 sm:$0xff]   ;;  %v14883_v24 = vld [vmem:[%s19059_s1 + $0x3c4] ss:$16 sps:$4 sm:$0xff]  }
  0x52   :  { %2653 = vmatprep.subr.bf16.mxu0 %v19076_v0 }
  0x55   :  { %2654 = vmatpush1.bf16.msra.mxu0 %v14831_v25  ;;  %v14934_v25 = vld [vmem:[%s19079_s23 + $0xd0] sm:$0xff]  }
  0x56   :  { %2655 = vmatprep.subr.bf16.mxu0 %v19076_v0 }
  0x58   :  { %2087 = vmatmul.mubr.bf16.gmra.mrb[8].mxu0 %v14795_v26  ;;  %v14885_v26 = vld [vmem:[%s19059_s1 + $0x3c0] ss:$16 sps:$4 sm:$0xff]  }
  0x59   :  { %2094 = vmatprep.mubr.bf16.mxu0 %v14796_v27  ;;  %2656 = vmatpush1.bf16.msra.mxu0 %v14847_v28  ;;  %v14886_v27 = vld [vmem:[%s19059_s1 + $0x3e4] ss:$16 sps:$4 sm:$0xff]   ;;  %v14888_v28 = vld [vmem:[%s19059_s1 + $0x3e0] ss:$16 sps:$4 sm:$0xff]  }
  0x5a   :  { %2657 = vmatprep.subr.bf16.mxu0 %v19076_v0 }
  0x5d   :  { %2658 = vmatpush1.bf16.msra.mxu0 %v14860_v37  ;;  %v14901_v37 = vld [vmem:[%s19059_s1 + $0x460] ss:$16 sps:$4 sm:$0xff]  }
  0x5e   :  { %2659 = vmatprep.subr.bf16.mxu0 %v19076_v0 }
  0x60   :  { %2095 = vmatmul.mubr.bf16.gmra.mrb[12].mxu0 %v14798_v29  ;;  %v14890_v29 = vld [vmem:[%s19059_s1 + $0x404] ss:$16 sps:$4 sm:$0xff]  }
  0x61   :  { %2102 = vmatprep.mubr.bf16.mxu0 %v14799_v30  ;;  %2660 = vmatpush1.bf16.msra.mxu0 %v14876_v48  ;;  %v14892_v30 = vld [vmem:[%s19059_s1 + $0x400] ss:$16 sps:$4 sm:$0xff]  }
  0x62   :  { %2661 = vmatprep.subr.bf16.mxu0 %v19076_v0  ;;  %v14917_v48 = vld [vmem:[%s19059_s1 + $0x500] ss:$16 sps:$4 sm:$0xff]  }
  0x65   :  { %2662 = vmatpush1.bf16.msra.mxu0 %v14889_v57  ;;  %v14930_v57 = vld [vmem:[%s19059_s1 + $0x580] ss:$16 sps:$4 sm:$0xff]  }
  0x66   :  { %2663 = vmatprep.subr.bf16.mxu0 %v19076_v0 }
  0x68   :  { %2103 = vmatmul.mubr.bf16.gmra.mrb[16].mxu0 %v14801_v31  ;;  %v14893_v31 = vld [vmem:[%s19059_s1 + $0x424] ss:$16 sps:$4 sm:$0xff]  }
  0x69   :  { %2110 = vmatprep.mubr.bf16.mxu0 %v14803_v32  ;;  %2664 = vmatpush1.bf16.msra.mxu0 %v14905_v5  ;;  %v14895_v32 = vld [vmem:[%s19059_s1 + $0x420] ss:$16 sps:$4 sm:$0xff]  }
  0x6a   :  { %2665 = vmatprep.subr.bf16.mxu0 %v19076_v0  ;;  %v14946_v5 = vld [vmem:[%s19059_s1 + $0x620] ss:$16 sps:$4 sm:$0xff]  }
  0x6d   :  { %2666 = vmatpush1.bf16.msra.mxu0 %v14918_v14  ;;  %v14959_v14 = vld [vmem:[%s19059_s1 + $0x6a0] ss:$16 sps:$4 sm:$0xff]  }
  0x6e   :  { %2667 = vmatprep.subr.bf16.mxu0 %v19076_v0 }
  0x70   :  { %2111 = vmatmul.mubr.bf16.gmra.mrb[20].mxu0 %v14805_v33  ;;  %v14896_v33 = vld [vmem:[%s19059_s1 + $0x444] ss:$16 sps:$4 sm:$0xff]  }
  0x71   :  { %2118 = vmatprep.mubr.bf16.mxu0 %v14806_v34  ;;  %2668 = vmatpush1.bf16.msra.mxu0 %v14934_v25  ;;  %v14947_v34 = vld [vmem:[%s19079_s23 + $0xd8] sm:$0xff]   ;;  %v14977_v25 = vld [vmem:[%s19059_s1 + $0x764] ss:$16 sps:$4 sm:$0xff]  }
  0x72   :  { %2669 = vmatprep.subr.bf16.mxu0 %v19076_v0 }
  0x75   :  { %2670 = vmatpush1.bf16.msra.mxu0 %v14947_v34  ;;  %v14991_v34 = vld [vmem:[%s19059_s1 + $0x7e0] ss:$16 sps:$4 sm:$0xff]  }
  0x76   :  { %2671 = vmatprep.subr.bf16.mxu0 %v19076_v0 }
  0x78   :  { %2119 = vmatmul.mubr.bf16.gmra.mrb[24].mxu0 %v14808_v35  ;;  %v14898_v35 = vld [vmem:[%s19059_s1 + $0x440] ss:$16 sps:$4 sm:$0xff]  }
  0x79   :  { %2126 = vmatprep.mubr.bf16.mxu0 %v14809_v36  ;;  %v14899_v36 = vld [vmem:[%s19059_s1 + $0x464] ss:$16 sps:$4 sm:$0xff]  }
  0x80   :  { %2127 = vmatmul.mubr.bf16.gmra.mrb[28].mxu0 %v14811_v38  ;;  %v14902_v38 = vld [vmem:[%s19059_s1 + $0x484] ss:$16 sps:$4 sm:$0xff]  }
  0x81   :  { %2134 = vmatprep.mubr.bf16.mxu0 %v14812_v39  ;;  %v14904_v39 = vld [vmem:[%s19059_s1 + $0x480] ss:$16 sps:$4 sm:$0xff]  }
  0x88   :  { %2135 = vmatmul.mubr.bf16.gmra.mrb[32].mxu0 %v14814_v40  ;;  %v14906_v40 = vld [vmem:[%s19059_s1 + $0x4a4] ss:$16 sps:$4 sm:$0xff]  }
  0x89   :  { %2142 = vmatprep.mubr.bf16.mxu0 %v14815_v41  ;;  %v14908_v41 = vld [vmem:[%s19059_s1 + $0x4a0] ss:$16 sps:$4 sm:$0xff]  }
  0x90   :  { %2143 = vmatmul.mubr.bf16.gmra.mrb[36].mxu0 %v14817_v42  ;;  %v14909_v42 = vld [vmem:[%s19059_s1 + $0x4c4] ss:$16 sps:$4 sm:$0xff]  }
  0x91   :  { %2150 = vmatprep.mubr.bf16.mxu0 %v14819_v43  ;;  %v14911_v43 = vld [vmem:[%s19059_s1 + $0x4c0] ss:$16 sps:$4 sm:$0xff]  }
  0x98   :  { %2151 = vmatmul.mubr.bf16.gmra.mrb[40].mxu0 %v14821_v44  ;;  %v14912_v44 = vld [vmem:[%s19059_s1 + $0x4e4] ss:$16 sps:$4 sm:$0xff]  }
  0x99   :  { %2158 = vmatprep.mubr.bf16.mxu0 %v14822_v45  ;;  %v14963_v45 = vld [vmem:[%s19079_s23 + $0xe0] sm:$0xff]  }
  0x9a   :  { %2672 = vmatpush1.bf16.msra.mxu0 %v14963_v45 }
  0x9b   :  { %2673 = vmatprep.subr.bf16.mxu0 %v19076_v0 }
  0xa0   :  { %2159 = vmatmul.mubr.bf16.gmra.mrb[44].mxu0 %v14824_v46  ;;  %v14914_v46 = vld [vmem:[%s19059_s1 + $0x4e0] ss:$16 sps:$4 sm:$0xff]  }
  0xa1   :  { %2166 = vmatprep.mubr.bf16.mxu0 %v14825_v47  ;;  %v14915_v47 = vld [vmem:[%s19059_s1 + $0x504] ss:$16 sps:$4 sm:$0xff]  }
  0xa8   :  { %2167 = vmatmul.mubr.bf16.gmra.mrb[48].mxu0 %v14827_v49  ;;  %v14919_v49 = vld [vmem:[%s19059_s1 + $0x524] ss:$16 sps:$4 sm:$0xff]  }
  0xa9   :  { %2174 = vmatprep.mubr.bf16.mxu0 %v14828_v50  ;;  %v14921_v50 = vld [vmem:[%s19059_s1 + $0x520] ss:$16 sps:$4 sm:$0xff]  }
  0xb0   :  { %2175 = vmatmul.mubr.bf16.gmra.mrb[52].mxu0 %v14830_v51  ;;  %v14922_v51 = vld [vmem:[%s19059_s1 + $0x544] ss:$16 sps:$4 sm:$0xff]  }
  0xb1   :  { %2182 = vmatprep.mubr.bf16.mxu0 %v14832_v52  ;;  %v14924_v52 = vld [vmem:[%s19059_s1 + $0x540] ss:$16 sps:$4 sm:$0xff]  }
  0xb8   :  { %2183 = vmatmul.mubr.bf16.gmra.mrb[56].mxu0 %v14834_v53  ;;  %v14925_v53 = vld [vmem:[%s19059_s1 + $0x564] ss:$16 sps:$4 sm:$0xff]  }
  0xb9   :  { %2190 = vmatprep.mubr.bf16.mxu0 %v14835_v54  ;;  %v14976_v54 = vld [vmem:[%s19079_s23 + $0xe8] sm:$0xff]  }
  0xba   :  { %2674 = vmatpush1.bf16.msra.mxu0 %v14976_v54 }
  0xbb   :  { %2675 = vmatprep.subr.bf16.mxu0 %v19076_v0 }
  0xc0   :  { %2191 = vmatmul.mubr.bf16.gmra.mrb[60].mxu0 %v14837_v55  ;;  %v14927_v55 = vld [vmem:[%s19059_s1 + $0x560] ss:$16 sps:$4 sm:$0xff]  }
  0xc1   :  { %2198 = vmatprep.mubr.bf16.mxu0 %v14838_v56  ;;  %v14928_v56 = vld [vmem:[%s19059_s1 + $0x584] ss:$16 sps:$4 sm:$0xff]  }
  0xc8   :  { %2199 = vmatmul.mubr.bf16.gmra.mrb[64].mxu0 %v14840_v58  ;;  %v14931_v58 = vld [vmem:[%s19059_s1 + $0x5a4] ss:$16 sps:$4 sm:$0xff]  }
  0xc9   :  { %2206 = vmatprep.mubr.bf16.mxu0 %v14841_v59  ;;  %v14933_v59 = vld [vmem:[%s19059_s1 + $0x5a0] ss:$16 sps:$4 sm:$0xff]  }
  0xd0   :  { %2207 = vmatmul.mubr.bf16.gmra.mrb[68].mxu0 %v14843_v60  ;;  %v14935_v60 = vld [vmem:[%s19059_s1 + $0x5c4] ss:$16 sps:$4 sm:$0xff]  }
  0xd1   :  { %2214 = vmatprep.mubr.bf16.mxu0 %v14844_v61  ;;  %v14937_v61 = vld [vmem:[%s19059_s1 + $0x5c0] ss:$16 sps:$4 sm:$0xff]  }
  0xd8   :  { %2215 = vmatmul.mubr.bf16.gmra.mrb[72].mxu0 %v14846_v62  ;;  %v14938_v62 = vld [vmem:[%s19059_s1 + $0x5e4] ss:$16 sps:$4 sm:$0xff]  }
  0xd9   :  { %2222 = vmatprep.mubr.bf16.mxu0 %v14848_v63  ;;  %v14940_v63 = vld [vmem:[%s19059_s1 + $0x5e0] ss:$16 sps:$4 sm:$0xff]  }
  0xe0   :  { %2223 = vmatmul.mubr.bf16.gmra.mrb[76].mxu0 %v14850_v1  ;;  %v14941_v1 = vld [vmem:[%s19059_s1 + $0x604] ss:$16 sps:$4 sm:$0xff]  }
  0xe1   :  { %2230 = vmatprep.mubr.bf16.mxu0 %v14851_v2  ;;  %v14992_v2 = vld [vmem:[%s19079_s23 + $0xf0] sm:$0xff]  }
  0xe2   :  { %2676 = vmatpush1.bf16.msra.mxu0 %v14992_v2 }
  0xe3   :  { %2677 = vmatprep.subr.bf16.mxu0 %v19076_v0 }
  0xe8   :  { %2231 = vmatmul.mubr.bf16.gmra.mrb[80].mxu0 %v14853_v3  ;;  %v14943_v3 = vld [vmem:[%s19059_s1 + $0x600] ss:$16 sps:$4 sm:$0xff]  }
  0xe9   :  { %2238 = vmatprep.mubr.bf16.mxu0 %v14854_v4  ;;  %v14944_v4 = vld [vmem:[%s19059_s1 + $0x624] ss:$16 sps:$4 sm:$0xff]  }
  0xf0   :  { %2239 = vmatmul.mubr.bf16.gmra.mrb[84].mxu0 %v14856_v6  ;;  %v14948_v6 = vld [vmem:[%s19059_s1 + $0x644] ss:$16 sps:$4 sm:$0xff]  }
  0xf1   :  { %2246 = vmatprep.mubr.bf16.mxu0 %v14857_v7  ;;  %v14950_v7 = vld [vmem:[%s19059_s1 + $0x640] ss:$16 sps:$4 sm:$0xff]  }
  0xf8   :  { %2247 = vmatmul.mubr.bf16.gmra.mrb[88].mxu0 %v14859_v8  ;;  %v14951_v8 = vld [vmem:[%s19059_s1 + $0x664] ss:$16 sps:$4 sm:$0xff]  }
  0xf9   :  { %2254 = vmatprep.mubr.bf16.mxu0 %v14861_v9  ;;  %v14953_v9 = vld [vmem:[%s19059_s1 + $0x660] ss:$16 sps:$4 sm:$0xff]  }
 0x100   :  { %2255 = vmatmul.mubr.bf16.gmra.mrb[92].mxu0 %v14863_v10  ;;  %v14954_v10 = vld [vmem:[%s19059_s1 + $0x684] ss:$16 sps:$4 sm:$0xff]  }
 0x101   :  { %2262 = vmatprep.mubr.bf16.mxu0 %v14864_v11  ;;  %v14956_v11 = vld [vmem:[%s19059_s1 + $0x680] ss:$16 sps:$4 sm:$0xff]  }
 0x108   :  { %2263 = vmatmul.mubr.bf16.gmra.mrb[96].mxu0 %v14866_v12  ;;  %v14957_v12 = vld [vmem:[%s19059_s1 + $0x6a4] ss:$16 sps:$4 sm:$0xff]  }
 0x109   :  { %2270 = vmatprep.mubr.bf16.mxu0 %v14867_v13  ;;  %v15005_v13 = vld [vmem:[%s19079_s23 + $0xf8] sm:$0xff]  }
 0x10a   :  { %2678 = vmatpush1.bf16.msra.mxu0 %v15005_v13  ;;  %v15017_v13 = vld [vmem:[%s19059_s1 + $0x8e4] ss:$16 sps:$4 sm:$0xff]  }
 0x110   :  { %2271 = vmatmul.mubr.bf16.gmra.mrb[100].mxu0 %v14869_v15  ;;  %v14960_v15 = vld [vmem:[%s19059_s1 + $0x6c4] ss:$16 sps:$4 sm:$0xff]  }
 0x111   :  { %2278 = vmatprep.mubr.bf16.mxu0 %v14870_v16  ;;  %v14962_v16 = vld [vmem:[%s19059_s1 + $0x6c0] ss:$16 sps:$4 sm:$0xff]  }
 0x118   :  { %2279 = vmatmul.mubr.bf16.gmra.mrb[104].mxu0 %v14872_v17  ;;  %v14964_v17 = vld [vmem:[%s19059_s1 + $0x6e4] ss:$16 sps:$4 sm:$0xff]  }
 0x119   :  { %2286 = vmatprep.mubr.bf16.mxu0 %v14873_v18  ;;  %v14966_v18 = vld [vmem:[%s19059_s1 + $0x6e0] ss:$16 sps:$4 sm:$0xff]  }
 0x120   :  { %2287 = vmatmul.mubr.bf16.gmra.mrb[108].mxu0 %v14875_v19  ;;  %v14967_v19 = vld [vmem:[%s19059_s1 + $0x704] ss:$16 sps:$4 sm:$0xff]  }
 0x121   :  { %2294 = vmatprep.mubr.bf16.mxu0 %v14877_v20  ;;  %v14969_v20 = vld [vmem:[%s19059_s1 + $0x700] ss:$16 sps:$4 sm:$0xff]  }
 0x128   :  { %2295 = vmatmul.mubr.bf16.gmra.mrb[112].mxu0 %v14879_v21  ;;  %v14970_v21 = vld [vmem:[%s19059_s1 + $0x724] ss:$16 sps:$4 sm:$0xff]  }
 0x129   :  { %2302 = vmatprep.mubr.bf16.mxu0 %v14880_v22  ;;  %v14972_v22 = vld [vmem:[%s19059_s1 + $0x720] ss:$16 sps:$4 sm:$0xff]  }
 0x130   :  { %2303 = vmatmul.mubr.bf16.gmra.mrb[116].mxu0 %v14882_v23  ;;  %v14973_v23 = vld [vmem:[%s19059_s1 + $0x744] ss:$16 sps:$4 sm:$0xff]  }
 0x131   :  { %2310 = vmatprep.mubr.bf16.mxu0 %v14883_v24  ;;  %v14975_v24 = vld [vmem:[%s19059_s1 + $0x740] ss:$16 sps:$4 sm:$0xff]  }
 0x138   :  { %2311 = vmatmul.mubr.bf16.gmra.mrb[120].mxu0 %v14885_v26  ;;  %v14979_v26 = vld [vmem:[%s19059_s1 + $0x760] ss:$16 sps:$4 sm:$0xff]  }
 0x139   :  { %2318 = vmatprep.mubr.bf16.mxu0 %v14886_v27  ;;  %v14980_v27 = vld [vmem:[%s19059_s1 + $0x784] ss:$16 sps:$4 sm:$0xff]  }
 0x140   :  { %2319 = vmatmul.mubr.bf16.gmra.mrb[124].mxu0 %v14888_v28  ;;  %v14982_v28 = vld [vmem:[%s19059_s1 + $0x780] ss:$16 sps:$4 sm:$0xff]  }
 0x141   :  { %2326 = vmatprep.mubr.bf16.mxu0 %v14890_v29  ;;  %v14983_v29 = vld [vmem:[%s19059_s1 + $0x7a4] ss:$16 sps:$4 sm:$0xff]  }
 0x148   :  { %2327 = vmatmul.mubr.bf16.gmra.mrb[128].mxu0 %v14892_v30  ;;  %v14985_v30 = vld [vmem:[%s19059_s1 + $0x7a0] ss:$16 sps:$4 sm:$0xff]  }
 0x149   :  { %2334 = vmatprep.mubr.bf16.mxu0 %v14893_v31  ;;  %v14986_v31 = vld [vmem:[%s19059_s1 + $0x7c4] ss:$16 sps:$4 sm:$0xff]  }
 0x150   :  { %2335 = vmatmul.mubr.bf16.gmra.mrb[132].mxu0 %v14895_v32  ;;  %v14988_v32 = vld [vmem:[%s19059_s1 + $0x7c0] ss:$16 sps:$4 sm:$0xff]  }
 0x151   :  { %2342 = vmatprep.mubr.bf16.mxu0 %v14896_v33  ;;  %v14989_v33 = vld [vmem:[%s19059_s1 + $0x7e4] ss:$16 sps:$4 sm:$0xff]  }
 0x158   :  { %2343 = vmatmul.mubr.bf16.gmra.mrb[136].mxu0 %v14898_v35  ;;  %v14995_v35 = vld [vmem:[%s19059_s1 + $0x804] ss:$16 sps:$4 sm:$0xff]  }
 0x159   :  { %2350 = vmatprep.mubr.bf16.mxu0 %v14899_v36 }
 0x160   :  { %2351 = vmatmul.mubr.bf16.gmra.mrb[140].mxu0 %v14901_v37 }
 0x161   :  { %2358 = vmatprep.mubr.bf16.mxu0 %v14902_v38  ;;  %v14993_v38 = vld [vmem:[%s19059_s1 + $0x800] ss:$16 sps:$4 sm:$0xff]  }
 0x168   :  { %2359 = vmatmul.mubr.bf16.gmra.mrb[144].mxu0 %v14904_v39 }
 0x169   :  { %2366 = vmatprep.mubr.bf16.mxu0 %v14906_v40  ;;  %v14998_v40 = vld [vmem:[%s19059_s1 + $0x824] ss:$16 sps:$4 sm:$0xff]  }
 0x170   :  { %2367 = vmatmul.mubr.bf16.gmra.mrb[148].mxu0 %v14908_v41 }
 0x171   :  { %2374 = vmatprep.mubr.bf16.mxu0 %v14909_v42 }
 0x178   :  { %2375 = vmatmul.mubr.bf16.gmra.mrb[152].mxu0 %v14911_v43 }
 0x179   :  { %2382 = vmatprep.mubr.bf16.mxu0 %v14912_v44  ;;  %v14996_v44 = vld [vmem:[%s19059_s1 + $0x820] ss:$16 sps:$4 sm:$0xff]  }
 0x180   :  { %2383 = vmatmul.mubr.bf16.gmra.mrb[156].mxu0 %v14914_v46  ;;  %v15001_v46 = vld [vmem:[%s19059_s1 + $0x844] ss:$16 sps:$4 sm:$0xff]  }
 0x181   :  { %2390 = vmatprep.mubr.bf16.mxu0 %v14915_v47 }
 0x188   :  { %2391 = vmatmul.mubr.bf16.gmra.mrb[160].mxu0 %v14917_v48 }
 0x189   :  { %2398 = vmatprep.mubr.bf16.mxu0 %v14919_v49 }
 0x190   :  { %2399 = vmatmul.mubr.bf16.gmra.mrb[164].mxu0 %v14921_v50  ;;  %v14999_v50 = vld [vmem:[%s19059_s1 + $0x840] ss:$16 sps:$4 sm:$0xff]  }
 0x191   :  { %2406 = vmatprep.mubr.bf16.mxu0 %v14922_v51 }
 0x198   :  { %2407 = vmatmul.mubr.bf16.gmra.mrb[168].mxu0 %v14924_v52  ;;  %v15004_v52 = vld [vmem:[%s19059_s1 + $0x864] ss:$16 sps:$4 sm:$0xff]  }
 0x199   :  { %2414 = vmatprep.mubr.bf16.mxu0 %v14925_v53 }
 0x1a0   :  { %2415 = vmatmul.mubr.bf16.gmra.mrb[172].mxu0 %v14927_v55 }
 0x1a1   :  { %2422 = vmatprep.mubr.bf16.mxu0 %v14928_v56  ;;  %v15002_v56 = vld [vmem:[%s19059_s1 + $0x860] ss:$16 sps:$4 sm:$0xff]  }
 0x1a8   :  { %2423 = vmatmul.mubr.bf16.gmra.mrb[176].mxu0 %v14930_v57 }
 0x1a9   :  { %2430 = vmatprep.mubr.bf16.mxu0 %v14931_v58  ;;  %v15008_v58 = vld [vmem:[%s19059_s1 + $0x884] ss:$16 sps:$4 sm:$0xff]  }
 0x1b0   :  { %2431 = vmatmul.mubr.bf16.gmra.mrb[180].mxu0 %v14933_v59 }
 0x1b1   :  { %2438 = vmatprep.mubr.bf16.mxu0 %v14935_v60 }
 0x1b8   :  { %2439 = vmatmul.mubr.bf16.gmra.mrb[184].mxu0 %v14937_v61 }
 0x1b9   :  { %2446 = vmatprep.mubr.bf16.mxu0 %v14938_v62  ;;  %v15006_v62 = vld [vmem:[%s19059_s1 + $0x880] ss:$16 sps:$4 sm:$0xff]  }
 0x1c0   :  { %2447 = vmatmul.mubr.bf16.gmra.mrb[188].mxu0 %v14940_v63 }
 0x1c1   :  { %2454 = vmatprep.mubr.bf16.mxu0 %v14941_v1  ;;  %v15011_v1 = vld [vmem:[%s19059_s1 + $0x8a4] ss:$16 sps:$4 sm:$0xff]  }
 0x1c8   :  { %2455 = vmatmul.mubr.bf16.gmra.mrb[192].mxu0 %v14943_v3 }
 0x1c9   :  { %2462 = vmatprep.mubr.bf16.mxu0 %v14944_v4 }
 0x1d0   :  { %2463 = vmatmul.mubr.bf16.gmra.mrb[196].mxu0 %v14946_v5  ;;  %v15009_v5 = vld [vmem:[%s19059_s1 + $0x8a0] ss:$16 sps:$4 sm:$0xff]  }
 0x1d1   :  { %2470 = vmatprep.mubr.bf16.mxu0 %v14948_v6 }
 0x1d8   :  { %2471 = vmatmul.mubr.bf16.gmra.mrb[200].mxu0 %v14950_v7  ;;  %v15014_v7 = vld [vmem:[%s19059_s1 + $0x8c4] ss:$16 sps:$4 sm:$0xff]  }
 0x1d9   :  { %2478 = vmatprep.mubr.bf16.mxu0 %v14951_v8 }
 0x1e0   :  { %2479 = vmatmul.mubr.bf16.gmra.mrb[204].mxu0 %v14953_v9 }
 0x1e1   :  { %2486 = vmatprep.mubr.bf16.mxu0 %v14954_v10 }
 0x1e8   :  { %2487 = vmatmul.mubr.bf16.gmra.mrb[208].mxu0 %v14956_v11  ;;  %v15012_v11 = vld [vmem:[%s19059_s1 + $0x8c0] ss:$16 sps:$4 sm:$0xff]  }
 0x1e9   :  { %2494 = vmatprep.mubr.bf16.mxu0 %v14957_v12 }
 0x1f0   :  { %2495 = vmatmul.mubr.bf16.gmra.mrb[212].mxu0 %v14959_v14 }
 0x1f1   :  { %2502 = vmatprep.mubr.bf16.mxu0 %v14960_v15 }
 0x1f8   :  { %2503 = vmatmul.mubr.bf16.gmra.mrb[216].mxu0 %v14962_v16 }
 0x1f9   :  { %2510 = vmatprep.mubr.bf16.mxu0 %v14964_v17  ;;  %v15015_v17 = vld [vmem:[%s19059_s1 + $0x8e0] ss:$16 sps:$4 sm:$0xff]  }
 0x200   :  { %2511 = vmatmul.mubr.bf16.gmra.mrb[220].mxu0 %v14966_v18 }
 0x201   :  { %2518 = vmatprep.mubr.bf16.mxu0 %v14967_v19  ;;  %v15020_v19 = vld [vmem:[%s19059_s1 + $0xc] ss:$16 sps:$4 sm:$0xff]  }
 0x208   :  { %2519 = vmatmul.mubr.bf16.gmra.mrb[224].mxu0 %v14969_v20 }
 0x209   :  { %2526 = vmatprep.mubr.bf16.mxu0 %v14970_v21  ;;  %v15018_v21 = vld [vmem:[%s19059_s1 + $0x8] ss:$16 sps:$4 sm:$0xff]  }
 0x210   :  { %2527 = vmatmul.mubr.bf16.gmra.mrb[228].mxu0 %v14972_v22  ;;  %v15021_v22 = vld [vmem:[%s19059_s1 + $0x2c] ss:$16 sps:$4 sm:$0xff]  }
 0x211   :  { %2534 = vmatprep.mubr.bf16.mxu0 %v14973_v23  ;;  %v15023_v23 = vld [vmem:[%s19059_s1 + $0x28] ss:$16 sps:$4 sm:$0xff]  }
 0x218   :  { %2535 = vmatmul.mubr.bf16.gmra.mrb[232].mxu0 %v14975_v24  ;;  %v15024_v24 = vld [vmem:[%s19059_s1 + $0x4c] ss:$16 sps:$4 sm:$0xff]  }
 0x219   :  { %2542 = vmatprep.mubr.bf16.mxu0 %v14977_v25  ;;  %v15026_v25 = vld [vmem:[%s19059_s1 + $0x48] ss:$16 sps:$4 sm:$0xff]  }
 0x220   :  { %2543 = vmatmul.mubr.bf16.gmra.mrb[236].mxu0 %v14979_v26  ;;  %v15027_v26 = vld [vmem:[%s19059_s1 + $0x6c] ss:$16 sps:$4 sm:$0xff]  }
 0x221   :  { %2550 = vmatprep.mubr.bf16.mxu0 %v14980_v27  ;;  %v15029_v27 = vld [vmem:[%s19059_s1 + $0x68] ss:$16 sps:$4 sm:$0xff]  }
 0x228   :  { %2551 = vmatmul.mubr.bf16.gmra.mrb[240].mxu0 %v14982_v28  ;;  %v15030_v28 = vld [vmem:[%s19059_s1 + $0x8c] ss:$16 sps:$4 sm:$0xff]  }
 0x229   :  { %2558 = vmatprep.mubr.bf16.mxu0 %v14983_v29  ;;  %v15032_v29 = vld [vmem:[%s19059_s1 + $0x88] ss:$16 sps:$4 sm:$0xff]  }
 0x230   :  { %2559 = vmatmul.mubr.bf16.gmra.mrb[244].mxu0 %v14985_v30  ;;  %v15033_v30 = vld [vmem:[%s19059_s1 + $0xac] ss:$16 sps:$4 sm:$0xff]  }
 0x231   :  { %2566 = vmatprep.mubr.bf16.mxu0 %v14986_v31  ;;  %v15035_v31 = vld [vmem:[%s19059_s1 + $0xa8] ss:$16 sps:$4 sm:$0xff]  }
 0x238   :  { %2567 = vmatmul.mubr.bf16.gmra.mrb[248].mxu0 %v14988_v32  ;;  %v15036_v32 = vld [vmem:[%s19059_s1 + $0xcc] ss:$16 sps:$4 sm:$0xff]  }
 0x239   :  { %2574 = vmatprep.mubr.bf16.mxu0 %v14989_v33  ;;  %v15038_v33 = vld [vmem:[%s19059_s1 + $0xc8] ss:$16 sps:$4 sm:$0xff]  }
 0x240   :  { %2575 = vmatmul.mubr.bf16.gmra.mrb[252].mxu0 %v14991_v34  ;;  %v15039_v34 = vld [vmem:[%s19059_s1 + $0xec] ss:$16 sps:$4 sm:$0xff]  }
 0x241   :  { %2582 = vmatprep.mubr.bf16.mxu0 %v14995_v35  ;;  %v15041_v35 = vld [vmem:[%s19059_s1 + $0xe8] ss:$16 sps:$4 sm:$0xff]  }
 0x243   :  { %v16310_v36 = vpop.f32.mrb[148].mxu0 }
 0x244   :  { %v2370_v37 = vpop.f32.mrb[149].mxu0 }
 0x245   :  { %v16315_v39 = vpop.f32.mrb[150].mxu0  ;;  %v15042_v37 = vld [vmem:[%s19059_s1 + $0x10c] ss:$16 sps:$4 sm:$0xff]  }
 0x246   :  { %v2373_v41 = vpop.f32.mrb[151].mxu0 }
 0x247   :  { %v15047_v41 = vld [vmem:[%s19059_s1 + $0x128] ss:$16 sps:$4 sm:$0xff]  }
 0x248   :  { %2583 = vmatmul.mubr.bf16.gmra.mrb[148].mxu0 %v14993_v38  ;;  %v15044_v38 = vld [vmem:[%s19059_s1 + $0x108] ss:$16 sps:$4 sm:$0xff]  }
 0x249   :  { %2590 = vmatprep.mubr.bf16.mxu0 %v14998_v40  ;;  %v15045_v40 = vld [vmem:[%s19059_s1 + $0x12c] ss:$16 sps:$4 sm:$0xff]  }
 0x24b   :  { %v16320_v42 = vpop.f32.mrb[152].mxu0 }
 0x24c   :  { %v2378_v43 = vpop.f32.mrb[153].mxu0 }
 0x24d   :  { %v16325_v45 = vpop.f32.mrb[154].mxu0  ;;  %v15048_v43 = vld [vmem:[%s19059_s1 + $0x14c] ss:$16 sps:$4 sm:$0xff]  }
 0x24e   :  { %v2381_v47 = vpop.f32.mrb[155].mxu0 }
 0x24f   :  { %v15053_v47 = vld [vmem:[%s19059_s1 + $0x168] ss:$16 sps:$4 sm:$0xff]  }
 0x250   :  { %2591 = vmatmul.mubr.bf16.gmra.mrb[152].mxu0 %v14996_v44  ;;  %v15050_v44 = vld [vmem:[%s19059_s1 + $0x148] ss:$16 sps:$4 sm:$0xff]  }
 0x251   :  { %2598 = vmatprep.mubr.bf16.mxu0 %v15001_v46  ;;  %v15051_v46 = vld [vmem:[%s19059_s1 + $0x16c] ss:$16 sps:$4 sm:$0xff]  }
 0x253   :  { %v16330_v48 = vpop.f32.mrb[156].mxu0 }
 0x254   :  { %v2386_v49 = vpop.f32.mrb[157].mxu0 }
 0x255   :  { %v16335_v51 = vpop.f32.mrb[158].mxu0  ;;  %v15054_v49 = vld [vmem:[%s19059_s1 + $0x18c] ss:$16 sps:$4 sm:$0xff]  }
 0x256   :  { %v2389_v53 = vpop.f32.mrb[159].mxu0 }
 0x257   :  { %v15059_v53 = vld [vmem:[%s19059_s1 + $0x1a8] ss:$16 sps:$4 sm:$0xff]  }
 0x258   :  { %2599 = vmatmul.mubr.bf16.gmra.mrb[156].mxu0 %v14999_v50  ;;  %v15056_v50 = vld [vmem:[%s19059_s1 + $0x188] ss:$16 sps:$4 sm:$0xff]  }
 0x259   :  { %2606 = vmatprep.mubr.bf16.mxu0 %v15004_v52  ;;  %v15057_v52 = vld [vmem:[%s19059_s1 + $0x1ac] ss:$16 sps:$4 sm:$0xff]  }
 0x25b   :  { %v16340_v54 = vpop.f32.mrb[160].mxu0 }
 0x25c   :  { %v2394_v55 = vpop.f32.mrb[161].mxu0 }
 0x25d   :  { %v16345_v57 = vpop.f32.mrb[162].mxu0  ;;  %v15060_v55 = vld [vmem:[%s19059_s1 + $0x1cc] ss:$16 sps:$4 sm:$0xff]  }
 0x25e   :  { %v2397_v59 = vpop.f32.mrb[163].mxu0 }
 0x25f   :  { %v15065_v59 = vld [vmem:[%s19059_s1 + $0x1e8] ss:$16 sps:$4 sm:$0xff]  }
 0x260   :  { %2607 = vmatmul.mubr.bf16.gmra.mrb[160].mxu0 %v15002_v56  ;;  %v15062_v56 = vld [vmem:[%s19059_s1 + $0x1c8] ss:$16 sps:$4 sm:$0xff]  }
 0x261   :  { %2614 = vmatprep.mubr.bf16.mxu0 %v15008_v58  ;;  %v15063_v58 = vld [vmem:[%s19059_s1 + $0x1ec] ss:$16 sps:$4 sm:$0xff]  }
 0x263   :  { %v16350_v60 = vpop.f32.mrb[164].mxu0 }
 0x264   :  { %v2402_v61 = vpop.f32.mrb[165].mxu0 }
 0x265   :  { %v16355_v63 = vpop.f32.mrb[166].mxu0  ;;  %v15066_v61 = vld [vmem:[%s19059_s1 + $0x20c] ss:$16 sps:$4 sm:$0xff]  }
 0x266   :  { %v2405_v2 = vpop.f32.mrb[167].mxu0 }
 0x267   :  { %v15071_v2 = vld [vmem:[%s19059_s1 + $0x228] ss:$16 sps:$4 sm:$0xff]  }
 0x268   :  { %2615 = vmatmul.mubr.bf16.gmra.mrb[164].mxu0 %v15006_v62  ;;  %v15068_v62 = vld [vmem:[%s19059_s1 + $0x208] ss:$16 sps:$4 sm:$0xff]  }
 0x269   :  { %2622 = vmatprep.mubr.bf16.mxu0 %v15011_v1  ;;  %v15069_v1 = vld [vmem:[%s19059_s1 + $0x22c] ss:$16 sps:$4 sm:$0xff]  }
 0x26b   :  { %v16360_v3 = vpop.f32.mrb[168].mxu0 }
 0x26c   :  { %v2410_v4 = vpop.f32.mrb[169].mxu0 }
 0x26d   :  { %v16365_v6 = vpop.f32.mrb[170].mxu0  ;;  %v15072_v4 = vld [vmem:[%s19059_s1 + $0x24c] ss:$16 sps:$4 sm:$0xff]  }
 0x26e   :  { %v2413_v8 = vpop.f32.mrb[171].mxu0 }
 0x26f   :  { %v15077_v8 = vld [vmem:[%s19059_s1 + $0x268] ss:$16 sps:$4 sm:$0xff]  }
 0x270   :  { %2623 = vmatmul.mubr.bf16.gmra.mrb[168].mxu0 %v15009_v5  ;;  %v15074_v5 = vld [vmem:[%s19059_s1 + $0x248] ss:$16 sps:$4 sm:$0xff]  }
 0x271   :  { %2630 = vmatprep.mubr.bf16.mxu0 %v15014_v7  ;;  %v15075_v7 = vld [vmem:[%s19059_s1 + $0x26c] ss:$16 sps:$4 sm:$0xff]  }
 0x273   :  { %v16370_v9 = vpop.f32.mrb[172].mxu0 }
 0x274   :  { %v2418_v10 = vpop.f32.mrb[173].mxu0 }
 0x275   :  { %v16375_v12 = vpop.f32.mrb[174].mxu0  ;;  %v15078_v10 = vld [vmem:[%s19059_s1 + $0x28c] ss:$16 sps:$4 sm:$0xff]  }
 0x276   :  { %v2421_v14 = vpop.f32.mrb[175].mxu0 }
 0x278   :  { %2631 = vmatmul.mubr.bf16.gmra.mrb[172].mxu0 %v15012_v11  ;;  %v11776_v11 = vld [vmem:[%s19060_s2 + $0x2] sm:$0x3] }
 0x279   :  { %2638 = vmatprep.mubr.bf16.mxu0 %v15017_v13  ;;  %v15080_v13 = vld [vmem:[%s19059_s1 + $0x288] ss:$16 sps:$4 sm:$0xff]   ;;  %14758 = vmatprep.subr.msk.bf16.mxu1 %vm3356_vm0, %v11776_v11  ;;  %v3358_v14 = vsel %vm3356_vm0, %v11776_v11, 0 }
 0x27a   :  { %13225 = vmatpush3.bf16.msra.mxu1 %v3358_v14  ;;  %v15113_v11 = vld [vmem:[%s19059_s1 + $0x3e8] ss:$16 sps:$4 sm:$0xff]   ;;  %v15114_v14 = vld [vmem:[%s19059_s1 + $0x40c] ss:$16 sps:$4 sm:$0xff]  }
 0x27b   :  { %v16380_v15 = vpop.f32.mrb[176].mxu0 }
 0x27c   :  { %v2426_v16 = vpop.f32.mrb[177].mxu0 }
 0x27d   :  { %v16385_v18 = vpop.f32.mrb[178].mxu0  ;;  %v15081_v16 = vld [vmem:[%s19059_s1 + $0x2ac] ss:$16 sps:$4 sm:$0xff]  }
 0x27e   :  { %v2429_v20 = vpop.f32.mrb[179].mxu0 }
 0x27f   :  { %v15086_v20 = vld [vmem:[%s19059_s1 + $0x2c8] ss:$16 sps:$4 sm:$0xff]  }
 0x280   :  { %2639 = vmatmul.mubr.bf16.gmra.mrb[176].mxu0 %v15015_v17  ;;  %v15083_v17 = vld [vmem:[%s19059_s1 + $0x2a8] ss:$16 sps:$4 sm:$0xff]  }
 0x281   :  { %2679 = vmatprep.mubr.bf16.mxu0 %v15020_v19  ;;  %v15084_v19 = vld [vmem:[%s19059_s1 + $0x2cc] ss:$16 sps:$4 sm:$0xff]  }
 0x288   :  { %2680 = vmatmul.mubr.bf16.vlgmr.msra.gmra.mrb[0].mxu0 %v15018_v21  ;;  %v15087_v21 = vld [vmem:[%s19059_s1 + $0x2ec] ss:$16 sps:$4 sm:$0xff]  }
 0x289   :  { %2687 = vmatprep.mubr.bf16.mxu0 %v15021_v22  ;;  %v15089_v22 = vld [vmem:[%s19059_s1 + $0x2e8] ss:$16 sps:$4 sm:$0xff]  }
 0x290   :  { %2688 = vmatmul.mubr.bf16.gmra.mrb[4].mxu0 %v15023_v23  ;;  %v15090_v23 = vld [vmem:[%s19059_s1 + $0x30c] ss:$16 sps:$4 sm:$0xff]  }
 0x291   :  { %2695 = vmatprep.mubr.bf16.mxu0 %v15024_v24  ;;  %v15092_v24 = vld [vmem:[%s19059_s1 + $0x308] ss:$16 sps:$4 sm:$0xff]  }
 0x298   :  { %2696 = vmatmul.mubr.bf16.gmra.mrb[8].mxu0 %v15026_v25  ;;  %v15093_v25 = vld [vmem:[%s19059_s1 + $0x32c] ss:$16 sps:$4 sm:$0xff]  }
 0x299   :  { %2703 = vmatprep.mubr.bf16.mxu0 %v15027_v26  ;;  %v15095_v26 = vld [vmem:[%s19059_s1 + $0x328] ss:$16 sps:$4 sm:$0xff]  }
 0x2a0   :  { %2704 = vmatmul.mubr.bf16.gmra.mrb[12].mxu0 %v15029_v27  ;;  %v15096_v27 = vld [vmem:[%s19059_s1 + $0x34c] ss:$16 sps:$4 sm:$0xff]  }
 0x2a1   :  { %2711 = vmatprep.mubr.bf16.mxu0 %v15030_v28  ;;  %v15098_v28 = vld [vmem:[%s19059_s1 + $0x348] ss:$16 sps:$4 sm:$0xff]  }
 0x2a8   :  { %2712 = vmatmul.mubr.bf16.gmra.mrb[16].mxu0 %v15032_v29  ;;  %v15099_v29 = vld [vmem:[%s19059_s1 + $0x36c] ss:$16 sps:$4 sm:$0xff]  }
 0x2a9   :  { %2719 = vmatprep.mubr.bf16.mxu0 %v15033_v30 }
 0x2b0   :  { %2720 = vmatmul.mubr.bf16.gmra.mrb[20].mxu0 %v15035_v31  ;;  %v16562_v31 = vld [vmem:[%s19060_s2] sm:$0x3] }
 0x2b1   :  { %2727 = vmatprep.mubr.bf16.mxu0 %v15036_v32  ;;  %14759 = vmatprep.subr.msk.bf16.mxu1 %vm3356_vm0, %v16562_v31 }
 0x2b8   :  { %2728 = vmatmul.mubr.bf16.gmra.mrb[24].mxu0 %v15038_v33  ;;  %v15101_v33 = vld [vmem:[%s19059_s1 + $0x368] ss:$16 sps:$4 sm:$0xff]  }
 0x2b9   :  { %2735 = vmatprep.mubr.bf16.mxu0 %v15039_v34 }
 0x2c0   :  { %2736 = vmatmul.mubr.bf16.gmra.mrb[28].mxu0 %v15041_v35  ;;  %v15102_v35 = vld [vmem:[%s19059_s1 + $0x38c] ss:$16 sps:$4 sm:$0xff]  }
 0x2c1   :  { %2743 = vmatprep.mubr.bf16.mxu0 %v15042_v37 }
 0x2c8   :  { %2744 = vmatmul.mubr.bf16.gmra.mrb[32].mxu0 %v15044_v38 }
 0x2c9   :  { %2751 = vmatprep.mubr.bf16.mxu0 %v15045_v40 }
 0x2d0   :  { %2752 = vmatmul.mubr.bf16.gmra.mrb[36].mxu0 %v15047_v41 }
 0x2d1   :  { %2759 = vmatprep.mubr.bf16.mxu0 %v15048_v43  ;;  %v15104_v43 = vld [vmem:[%s19059_s1 + $0x388] ss:$16 sps:$4 sm:$0xff]  }
 0x2d8   :  { %2760 = vmatmul.mubr.bf16.gmra.mrb[40].mxu0 %v15050_v44 }
 0x2d9   :  { %2767 = vmatprep.mubr.bf16.mxu0 %v15051_v46  ;;  %v15105_v46 = vld [vmem:[%s19059_s1 + $0x3ac] ss:$16 sps:$4 sm:$0xff]  }
 0x2e0   :  { %2768 = vmatmul.mubr.bf16.gmra.mrb[44].mxu0 %v15053_v47 }
 0x2e1   :  { %2775 = vmatprep.mubr.bf16.mxu0 %v15054_v49 }
 0x2e8   :  { %2776 = vmatmul.mubr.bf16.gmra.mrb[48].mxu0 %v15056_v50 }
 0x2e9   :  { %2783 = vmatprep.mubr.bf16.mxu0 %v15057_v52 }
 0x2f0   :  { %2784 = vmatmul.mubr.bf16.gmra.mrb[52].mxu0 %v15059_v53  ;;  %v15107_v53 = vld [vmem:[%s19059_s1 + $0x3a8] ss:$16 sps:$4 sm:$0xff]  }
 0x2f1   :  { %2791 = vmatprep.mubr.bf16.mxu0 %v15060_v55 }
 0x2f8   :  { %2792 = vmatmul.mubr.bf16.gmra.mrb[56].mxu0 %v15062_v56  ;;  %v15108_v56 = vld [vmem:[%s19059_s1 + $0x3cc] ss:$16 sps:$4 sm:$0xff]  }
 0x2f9   :  { %2799 = vmatprep.mubr.bf16.mxu0 %v15063_v58 }
 0x300   :  { %2800 = vmatmul.mubr.bf16.gmra.mrb[60].mxu0 %v15065_v59 }
 0x301   :  { %2807 = vmatprep.mubr.bf16.mxu0 %v15066_v61 }
 0x308   :  { %2808 = vmatmul.mubr.bf16.gmra.mrb[64].mxu0 %v15068_v62 }
 0x309   :  { %2815 = vmatprep.mubr.bf16.mxu0 %v15069_v1  ;;  %v15110_v1 = vld [vmem:[%s19059_s1 + $0x3c8] ss:$16 sps:$4 sm:$0xff]  }
 0x310   :  { %2816 = vmatmul.mubr.bf16.gmra.mrb[68].mxu0 %v15071_v2 }
 0x311   :  { %2823 = vmatprep.mubr.bf16.mxu0 %v15072_v4  ;;  %v15111_v4 = vld [vmem:[%s19059_s1 + $0x3ec] ss:$16 sps:$4 sm:$0xff]  }
 0x318   :  { %2824 = vmatmul.mubr.bf16.gmra.mrb[72].mxu0 %v15074_v5 }
 0x319   :  { %2831 = vmatprep.mubr.bf16.mxu0 %v15075_v7 }
 0x320   :  { %2832 = vmatmul.mubr.bf16.gmra.mrb[76].mxu0 %v15077_v8 }
 0x321   :  { %2839 = vmatprep.mubr.bf16.mxu0 %v15078_v10 }
 0x328   :  { %2840 = vmatmul.mubr.bf16.gmra.mrb[80].mxu0 %v15080_v13 }
 0x329   :  { %2847 = vmatprep.mubr.bf16.mxu0 %v15081_v16 }
 0x330   :  { %2848 = vmatmul.mubr.bf16.gmra.mrb[84].mxu0 %v15083_v17 }
 0x331   :  { %2855 = vmatprep.mubr.bf16.mxu0 %v15084_v19 }
 0x338   :  { %2856 = vmatmul.mubr.bf16.gmra.mrb[88].mxu0 %v15086_v20 }
 0x339   :  { %2863 = vmatprep.mubr.bf16.mxu0 %v15087_v21  ;;  %v15116_v21 = vld [vmem:[%s19059_s1 + $0x408] ss:$16 sps:$4 sm:$0xff]  }
 0x340   :  { %2864 = vmatmul.mubr.bf16.gmra.mrb[92].mxu0 %v15089_v22 }
 0x341   :  { %2871 = vmatprep.mubr.bf16.mxu0 %v15090_v23  ;;  %v15117_v23 = vld [vmem:[%s19059_s1 + $0x42c] ss:$16 sps:$4 sm:$0xff]  }
 0x348   :  { %2872 = vmatmul.mubr.bf16.gmra.mrb[96].mxu0 %v15092_v24 }
 0x349   :  { %2879 = vmatprep.mubr.bf16.mxu0 %v15093_v25 }
 0x350   :  { %2880 = vmatmul.mubr.bf16.gmra.mrb[100].mxu0 %v15095_v26 }
 0x351   :  { %2887 = vmatprep.mubr.bf16.mxu0 %v15096_v27 }
 0x358   :  { %2888 = vmatmul.mubr.bf16.gmra.mrb[104].mxu0 %v15098_v28  ;;  %v15119_v28 = vld [vmem:[%s19059_s1 + $0x428] ss:$16 sps:$4 sm:$0xff]  }
 0x359   :  { %2895 = vmatprep.mubr.bf16.mxu0 %v15099_v29 }
 0x35b   :  { %v16557_v30 = vpop.f32.mrb[0].mxu0 }
 0x35c   :  { %v2683_v32 = vpop.f32.mrb[1].mxu0 }
 0x35d   :  { %v16569_v34 = vpop.f32.mrb[2].mxu0  ;;  %v15120_v32 = vld [vmem:[%s19059_s1 + $0x44c] ss:$16 sps:$4 sm:$0xff]  }
 0x35e   :  { %v3256_v37 = vpack.c.bf16 %v16569_v34, %v16557_v30  ;;  %v2686_v38 = vpop.f32.mrb[3].mxu0  ;;  %v11802_v30 = vld [vmem:[%s19060_s2 + $0x6] sm:$0x3] }
 0x360   :  { %2896 = vmatmul.mubr.bf16.gmra.mrb[108].mxu0 %v15101_v33 }
 0x361   :  { %2903 = vmatprep.mubr.bf16.mxu0 %v15102_v35 }
 0x363   :  { %v16576_v40 = vpop.f32.mrb[4].mxu0 }
 0x364   :  { %v2691_v41 = vpop.f32.mrb[5].mxu0 }
 0x365   :  { %v16581_v44 = vpop.f32.mrb[6].mxu0 }
 0x366   :  { %v3257_v47 = vpack.c.bf16 %v16581_v44, %v16576_v40  ;;  %v2694_v49 = vpop.f32.mrb[7].mxu0  ;;  %v15150_v40 = vld [vmem:[%s19059_s1 + $0x588] ss:$16 sps:$4 sm:$0xff]  }
 0x367   :  { %v15123_v49 = vld [vmem:[%s19059_s1 + $0x46c] ss:$16 sps:$4 sm:$0xff]  }
 0x368   :  { %2904 = vmatmul.mubr.bf16.gmra.mrb[112].mxu0 %v15104_v43  ;;  %v15122_v43 = vld [vmem:[%s19059_s1 + $0x448] ss:$16 sps:$4 sm:$0xff]  }
 0x369   :  { %2911 = vmatprep.mubr.bf16.mxu0 %v15105_v46 }
 0x36b   :  { %v16588_v50 = vpop.f32.mrb[8].mxu0 }
 0x36c   :  { %v2699_v52 = vpop.f32.mrb[9].mxu0 }
 0x36d   :  { %v16593_v55 = vpop.f32.mrb[10].mxu0 }
 0x36e   :  { %v3258_v58 = vpack.c.bf16 %v16593_v55, %v16588_v50  ;;  %v2702_v59 = vpop.f32.mrb[11].mxu0 }
 0x370   :  { %2912 = vmatmul.mubr.bf16.gmra.mrb[116].mxu0 %v15107_v53 }
 0x371   :  { %2919 = vmatprep.mubr.bf16.mxu0 %v15108_v56 }
 0x373   :  { %v16600_v61 = vpop.f32.mrb[12].mxu0 }
 0x374   :  { %v2707_v62 = vpop.f32.mrb[13].mxu0 }
 0x375   :  { %v16605_v2 = vpop.f32.mrb[14].mxu0  ;;  %v15125_v62 = vld [vmem:[%s19059_s1 + $0x468] ss:$16 sps:$4 sm:$0xff]  }
 0x376   :  { %v3259_v5 = vpack.c.bf16 %v16605_v2, %v16600_v61  ;;  %v2710_v7 = vpop.f32.mrb[15].mxu0 }
 0x378   :  { %2920 = vmatmul.mubr.bf16.gmra.mrb[120].mxu0 %v15110_v1 }
 0x379   :  { %2927 = vmatprep.mubr.bf16.mxu0 %v15111_v4  ;;  %v15126_v4 = vld [vmem:[%s19059_s1 + $0x48c] ss:$16 sps:$4 sm:$0xff]  }
 0x37b   :  { %v16612_v8 = vpop.f32.mrb[16].mxu0 }
 0x37c   :  { %v2715_v10 = vpop.f32.mrb[17].mxu0 }
 0x37d   :  { %v16617_v13 = vpop.f32.mrb[18].mxu0 }
 0x37e   :  { %v3260_v16 = vpack.c.bf16 %v16617_v13, %v16612_v8  ;;  %v2718_v17 = vpop.f32.mrb[19].mxu0  ;;  %v15158_v13 = vld [vmem:[%s19059_s1 + $0x5c8] ss:$16 sps:$4 sm:$0xff]  }
 0x37f   :  { %v15128_v17 = vld [vmem:[%s19059_s1 + $0x488] ss:$16 sps:$4 sm:$0xff]  }
 0x380   :  { %2928 = vmatmul.mubr.bf16.gmra.mrb[124].mxu0 %v15113_v11 }
 0x381   :  { %2935 = vmatprep.mubr.bf16.mxu0 %v15114_v14 }
 0x383   :  { %v16624_v19 = vpop.f32.mrb[20].mxu0 }
 0x384   :  { %v2723_v20 = vpop.f32.mrb[21].mxu0 }
 0x385   :  { %v16629_v22 = vpop.f32.mrb[22].mxu0 }
 0x386   :  { %v3261_v24 = vpack.c.bf16 %v16629_v22, %v16624_v19  ;;  %v2726_v25 = vpop.f32.mrb[23].mxu0 }
 0x388   :  { %2936 = vmatmul.mubr.bf16.gmra.mrb[128].mxu0 %v15116_v21  ;;  %v15131_v21 = vld [vmem:[%s19059_s1 + $0x4ac] ss:$16 sps:$4 sm:$0xff]  }
 0x389   :  { %2943 = vmatprep.mubr.bf16.mxu0 %v15117_v23 }
 0x38b   :  { %v16636_v26 = vpop.f32.mrb[24].mxu0 }
 0x38c   :  { %v2731_v27 = vpop.f32.mrb[25].mxu0 }
 0x38d   :  { %v16641_v29 = vpop.f32.mrb[26].mxu0  ;;  %v3482_v27 = vsel %vm3356_vm0, %v16562_v31, 0 }
 0x38e   :  { %v3262_v33 = vpack.c.bf16 %v16641_v29, %v16636_v26  ;;  %v2734_v35 = vpop.f32.mrb[27].mxu0  ;;  %v15161_v29 = vld [vmem:[%s19059_s1 + $0x5e8] ss:$16 sps:$4 sm:$0xff]  }
 0x390   :  { %2944 = vmatmul.mubr.bf16.gmra.mrb[132].mxu0 %v15119_v28  ;;  %v16678_v28 = vld [vmem:[%s19060_s2 + $0x4] sm:$0x3] }
 0x391   :  { %2951 = vmatprep.mubr.bf16.mxu0 %v15120_v32 }
 0x393   :  { %v16648_v38 = vpop.f32.mrb[28].mxu0 }
 0x394   :  { %v2739_v41 = vpop.f32.mrb[29].mxu0 }
 0x395   :  { %v16653_v46 = vpop.f32.mrb[30].mxu0  ;;  %v15129_v41 = vld [vmem:[%s19059_s1 + $0x4a8] ss:$16 sps:$4 sm:$0xff]  }
 0x396   :  { %v3263_v52 = vpack.c.bf16 %v16653_v46, %v16648_v38  ;;  %v2742_v53 = vpop.f32.mrb[31].mxu0  ;;  %v3750_v38 = vsel %vm3356_vm0, %v11802_v30, 0  ;;  %v11811_v46 = vld [vmem:[%s19060_s2 + $0x8] sm:$0x3] }
 0x398   :  { %2952 = vmatmul.mubr.bf16.gmra.mrb[136].mxu0 %v15122_v43  ;;  %v15134_v43 = vld [vmem:[%s19059_s1 + $0x4cc] ss:$16 sps:$4 sm:$0xff]  }
 0x399   :  { %2959 = vmatprep.mubr.bf16.mxu0 %v15123_v49 }
 0x39b   :  { %v2745_v56 = vpop.f32.mrb[32].mxu0 }
 0x39c   :  { %v2747_v59 = vpop.f32.mrb[33].mxu0 }
 0x39d   :  { %v2748_v1 = vpop.f32.mrb[34].mxu0 }
 0x39e   :  { %v2750_v7 = vpop.f32.mrb[35].mxu0  ;;  %v3264_v10 = vpack.c.bf16 %v2748_v1, %v2745_v56 }
 0x3a0   :  { %2960 = vmatmul.mubr.bf16.gmra.mrb[140].mxu0 %v15125_v62  ;;  %13226 = vmatprep.mubr.msk.bf16.mxu1 %vm3331_vm1, %v3264_v10  ;;  %v15132_v62 = vld [vmem:[%s19059_s1 + $0x4c8] ss:$16 sps:$4 sm:$0xff]  }
 0x3a1   :  { %2967 = vmatprep.mubr.bf16.mxu0 %v15126_v4  ;;  %v15137_v4 = vld [vmem:[%s19059_s1 + $0x4ec] ss:$16 sps:$4 sm:$0xff]  }
 0x3a3   :  { %v2753_v11 = vpop.f32.mrb[36].mxu0 }
 0x3a4   :  { %v2755_v14 = vpop.f32.mrb[37].mxu0 }
 0x3a5   :  { %v2756_v20 = vpop.f32.mrb[38].mxu0 }
 0x3a6   :  { %v3265_v23 = vpack.c.bf16 %v2756_v20, %v2753_v11  ;;  %v2758_v25 = vpop.f32.mrb[39].mxu0 }
 0x3a8   :  { %2968 = vmatmul.mubr.bf16.gmra.mrb[144].mxu0 %v15128_v17  ;;  %13227 = vmatmul.mubr.msk.bf16.vlgmr.msra.gmra.mrb[0].mxu1 %vm3331_vm1, %v3265_v23  ;;  %v15135_v17 = vld [vmem:[%s19059_s1 + $0x4e8] ss:$16 sps:$4 sm:$0xff]  }
 0x3a9   :  { %2975 = vmatprep.mubr.bf16.mxu0 %v15131_v21  ;;  %13243 = vmatpush3.bf16.msra.mxu1 %v3482_v27  ;;  %v15140_v21 = vld [vmem:[%s19059_s1 + $0x50c] ss:$16 sps:$4 sm:$0xff]  }
 0x3aa   :  { %14760 = vmatprep.subr.msk.bf16.mxu1 %vm3356_vm0, %v16678_v28 }
 0x3ab   :  { %v2761_v32 = vpop.f32.mrb[40].mxu0 }
 0x3ac   :  { %v2763_v35 = vpop.f32.mrb[41].mxu0 }
 0x3ad   :  { %v2764_v31 = vpop.f32.mrb[42].mxu0  ;;  %v15138_v35 = vld [vmem:[%s19059_s1 + $0x508] ss:$16 sps:$4 sm:$0xff]  }
 0x3ae   :  { %v3266_v49 = vpack.c.bf16 %v2764_v31, %v2761_v32  ;;  %v2766_v53 = vpop.f32.mrb[43].mxu0  ;;  %v15143_v31 = vld [vmem:[%s19059_s1 + $0x52c] ss:$16 sps:$4 sm:$0xff]  }
 0x3b0   :  { %2976 = vmatmul.mubr.bf16.gmra.mrb[0].mxu0 %v15129_v41  ;;  %13230 = vmatprep.mubr.msk.bf16.mxu1 %vm3331_vm1, %v3266_v49 }
 0x3b1   :  { %2983 = vmatprep.mubr.bf16.mxu0 %v15134_v43 }
 0x3b3   :  { %v2769_v56 = vpop.f32.mrb[44].mxu0 }
 0x3b4   :  { %v2771_v59 = vpop.f32.mrb[45].mxu0 }
 0x3b5   :  { %v2772_v1 = vpop.f32.mrb[46].mxu0  ;;  %v15141_v59 = vld [vmem:[%s19059_s1 + $0x528] ss:$16 sps:$4 sm:$0xff]  }
 0x3b6   :  { %v3267_v7 = vpack.c.bf16 %v2772_v1, %v2769_v56  ;;  %v2774_v10 = vpop.f32.mrb[47].mxu0  ;;  %v15146_v1 = vld [vmem:[%s19059_s1 + $0x54c] ss:$16 sps:$4 sm:$0xff]  }
 0x3b8   :  { %2984 = vmatmul.mubr.bf16.gmra.mrb[4].mxu0 %v15132_v62  ;;  %13231 = vmatmul.mubr.msk.bf16.gmra.mrb[4].mxu1 %vm3331_vm1, %v3267_v7 }
 0x3b9   :  { %2991 = vmatprep.mubr.bf16.mxu0 %v15137_v4 }
 0x3bb   :  { %v2777_v11 = vpop.f32.mrb[48].mxu0 }
 0x3bc   :  { %v2779_v14 = vpop.f32.mrb[49].mxu0 }
 0x3bd   :  { %v2780_v20 = vpop.f32.mrb[50].mxu0  ;;  %v15144_v14 = vld [vmem:[%s19059_s1 + $0x548] ss:$16 sps:$4 sm:$0xff]  }
 0x3be   :  { %v3268_v23 = vpack.c.bf16 %v2780_v20, %v2777_v11  ;;  %v2782_v25 = vpop.f32.mrb[51].mxu0  ;;  %v15149_v20 = vld [vmem:[%s19059_s1 + $0x56c] ss:$16 sps:$4 sm:$0xff]  }
 0x3c0   :  { %2992 = vmatmul.mubr.bf16.gmra.mrb[8].mxu0 %v15135_v17  ;;  %13234 = vmatprep.mubr.msk.bf16.mxu1 %vm3331_vm1, %v3268_v23 }
 0x3c1   :  { %2999 = vmatprep.mubr.bf16.mxu0 %v15140_v21 }
 0x3c3   :  { %v2785_v27 = vpop.f32.mrb[52].mxu0 }
 0x3c4   :  { %v2787_v32 = vpop.f32.mrb[53].mxu0 }
 0x3c5   :  { %v2788_v41 = vpop.f32.mrb[54].mxu0  ;;  %v15147_v32 = vld [vmem:[%s19059_s1 + $0x568] ss:$16 sps:$4 sm:$0xff]  }
 0x3c6   :  { %v3269_v43 = vpack.c.bf16 %v2788_v41, %v2785_v27  ;;  %v2790_v49 = vpop.f32.mrb[55].mxu0  ;;  %v15152_v41 = vld [vmem:[%s19059_s1 + $0x58c] ss:$16 sps:$4 sm:$0xff]  }
 0x3c7   :  { %v3608_v49 = vsel %vm3356_vm0, %v16678_v28, 0 }
 0x3c8   :  { %3000 = vmatmul.mubr.bf16.gmra.mrb[12].mxu0 %v15138_v35  ;;  %13235 = vmatmul.mubr.msk.bf16.gmra.mrb[8].mxu1 %vm3331_vm1, %v3269_v43 }
 0x3c9   :  { %3007 = vmatprep.mubr.bf16.mxu0 %v15143_v31 }
 0x3cb   :  { %v2793_v53 = vpop.f32.mrb[56].mxu0 }
 0x3cc   :  { %v2795_v56 = vpop.f32.mrb[57].mxu0 }
 0x3cd   :  { %v2796_v62 = vpop.f32.mrb[58].mxu0 }
 0x3ce   :  { %v3270_v4 = vpack.c.bf16 %v2796_v62, %v2793_v53  ;;  %v2798_v7 = vpop.f32.mrb[59].mxu0  ;;  %v15159_v62 = vld [vmem:[%s19059_s1 + $0x5ec] ss:$16 sps:$4 sm:$0xff]  }
 0x3d0   :  { %3008 = vmatmul.mubr.bf16.gmra.mrb[16].mxu0 %v15141_v59  ;;  %13238 = vmatprep.mubr.msk.bf16.mxu1 %vm3331_vm1, %v3270_v4  ;;  %v15156_v59 = vld [vmem:[%s19059_s1 + $0x5cc] ss:$16 sps:$4 sm:$0xff]  }
 0x3d1   :  { %3015 = vmatprep.mubr.bf16.mxu0 %v15146_v1  ;;  %v15162_v1 = vld [vmem:[%s19059_s1 + $0x60c] ss:$16 sps:$4 sm:$0xff]  }
 0x3d3   :  { %v2801_v10 = vpop.f32.mrb[60].mxu0 }
 0x3d4   :  { %v2803_v11 = vpop.f32.mrb[61].mxu0 }
 0x3d5   :  { %v2804_v17 = vpop.f32.mrb[62].mxu0  ;;  %v15164_v11 = vld [vmem:[%s19059_s1 + $0x608] ss:$16 sps:$4 sm:$0xff]  }
 0x3d6   :  { %v3271_v21 = vpack.c.bf16 %v2804_v17, %v2801_v10  ;;  %v2806_v23 = vpop.f32.mrb[63].mxu0  ;;  %v15165_v17 = vld [vmem:[%s19059_s1 + $0x62c] ss:$16 sps:$4 sm:$0xff]  }
 0x3d8   :  { %3016 = vmatmul.mubr.bf16.gmra.mrb[20].mxu0 %v15144_v14  ;;  %13239 = vmatmul.mubr.msk.bf16.gmra.mrb[12].mxu1 %vm3331_vm1, %v3271_v21 }
 0x3d9   :  { %13244 = vmatprep.mubr.msk.bf16.mxu1 %vm3331_vm1, %v3256_v37  ;;  %3023 = vmatprep.mubr.bf16.mxu0 %v15149_v20 }
 0x3db   :  { %v2809_v25 = vpop.f32.mrb[64].mxu0 }
 0x3dc   :  { %v2811_v27 = vpop.f32.mrb[65].mxu0 }
 0x3dd   :  { %v2812_v35 = vpop.f32.mrb[66].mxu0  ;;  %v15167_v27 = vld [vmem:[%s19059_s1 + $0x628] ss:$16 sps:$4 sm:$0xff]  }
 0x3de   :  { %v3272_v31 = vpack.c.bf16 %v2812_v35, %v2809_v25  ;;  %v2814_v43 = vpop.f32.mrb[67].mxu0  ;;  %v15168_v35 = vld [vmem:[%s19059_s1 + $0x64c] ss:$16 sps:$4 sm:$0xff]  }
 0x3e0   :  { %3024 = vmatmul.mubr.bf16.gmra.mrb[24].mxu0 %v15147_v32  ;;  %13245 = vmatmul.mubr.msk.bf16.vlgmr.msra.gmra.mrb[0].mxu1 %vm3331_vm1, %v3257_v47  ;;  %v15153_v47 = vld [vmem:[%s19059_s1 + $0x5ac] ss:$16 sps:$4 sm:$0xff]  }
 0x3e1   :  { %13248 = vmatprep.mubr.msk.bf16.mxu1 %vm3331_vm1, %v3258_v58  ;;  %3031 = vmatprep.mubr.bf16.mxu0 %v15152_v41  ;;  %v15155_v58 = vld [vmem:[%s19059_s1 + $0x5a8] ss:$16 sps:$4 sm:$0xff]  }
 0x3e2   :  { %13261 = vmatpush3.bf16.msra.mxu1 %v3608_v49 }
 0x3e3   :  { %v2817_v34 = vpop.f32.mrb[68].mxu0  ;;  %14761 = vmatprep.subr.msk.bf16.mxu1 %vm3356_vm0, %v11802_v30  ;;  %v15170_v30 = vld [vmem:[%s19059_s1 + $0x648] ss:$16 sps:$4 sm:$0xff]  }
 0x3e4   :  { %v2819_v37 = vpop.f32.mrb[69].mxu0 }
 0x3e5   :  { %v2820_v44 = vpop.f32.mrb[70].mxu0  ;;  %v15171_v37 = vld [vmem:[%s19059_s1 + $0x66c] ss:$16 sps:$4 sm:$0xff]  }
 0x3e6   :  { %v3273_v28 = vpack.c.bf16 %v2820_v44, %v2817_v34  ;;  %v2822_v53 = vpop.f32.mrb[71].mxu0 }
 0x3e7   :  { %v15173_v53 = vld [vmem:[%s19059_s1 + $0x668] ss:$16 sps:$4 sm:$0xff]  }
 0x3e8   :  { %3032 = vmatmul.mubr.bf16.gmra.mrb[28].mxu0 %v15150_v40  ;;  %13249 = vmatmul.mubr.msk.bf16.gmra.mrb[4].mxu1 %vm3331_vm1, %v3259_v5 }
 0x3e9   :  { %13252 = vmatprep.mubr.msk.bf16.mxu1 %vm3331_vm1, %v3260_v16  ;;  %3039 = vmatprep.mubr.bf16.mxu0 %v15153_v47 }
 0x3eb   :  { %v2825_v50 = vpop.f32.mrb[72].mxu0 }
 0x3ec   :  { %v2827_v55 = vpop.f32.mrb[73].mxu0 }
 0x3ed   :  { %v2828_v56 = vpop.f32.mrb[74].mxu0  ;;  %v15174_v55 = vld [vmem:[%s19059_s1 + $0x68c] ss:$16 sps:$4 sm:$0xff]  }
 0x3ee   :  { %v3274_v61 = vpack.c.bf16 %v2828_v56, %v2825_v50  ;;  %v2830_v2 = vpop.f32.mrb[75].mxu0 }
 0x3ef   :  { %v15176_v2 = vld [vmem:[%s19059_s1 + $0x688] ss:$16 sps:$4 sm:$0xff]  }
 0x3f0   :  { %3040 = vmatmul.mubr.bf16.gmra.mrb[180].mxu0 %v15155_v58  ;;  %13253 = vmatmul.mubr.msk.bf16.gmra.mrb[8].mxu1 %vm3331_vm1, %v3261_v24 }
 0x3f1   :  { %13256 = vmatprep.mubr.msk.bf16.mxu1 %vm3331_vm1, %v3262_v33  ;;  %3047 = vmatprep.mubr.bf16.mxu0 %v15156_v59 }
 0x3f3   :  { %v2833_v5 = vpop.f32.mrb[76].mxu0 }
 0x3f4   :  { %v2835_v8 = vpop.f32.mrb[77].mxu0 }
 0x3f5   :  { %v2836_v16 = vpop.f32.mrb[78].mxu0  ;;  %v15177_v8 = vld [vmem:[%s19059_s1 + $0x6ac] ss:$16 sps:$4 sm:$0xff]  }
 0x3f6   :  { %v3275_v19 = vpack.c.bf16 %v2836_v16, %v2833_v5  ;;  %v2838_v22 = vpop.f32.mrb[79].mxu0 }
 0x3f8   :  { %3048 = vmatmul.mubr.bf16.gmra.mrb[184].mxu0 %v15158_v13  ;;  %13257 = vmatmul.mubr.msk.bf16.gmra.mrb[12].mxu1 %vm3331_vm1, %v3263_v52 }
 0x3f9   :  { %13262 = vmatprep.mubr.msk.bf16.mxu1 %vm3331_vm1, %v3272_v31  ;;  %3055 = vmatprep.mubr.bf16.mxu0 %v15159_v62  ;;  %v3892_v62 = vsel %vm3356_vm0, %v11811_v46, 0 }
 0x3fb   :  { %v2841_v24 = vpop.f32.mrb[80].mxu0 }
 0x3fc   :  { %v2843_v26 = vpop.f32.mrb[81].mxu0 }
 0x3fd   :  { %v2844_v33 = vpop.f32.mrb[82].mxu0  ;;  %v15179_v26 = vld [vmem:[%s19059_s1 + $0x6a8] ss:$16 sps:$4 sm:$0xff]  }
 0x3fe   :  { %v3276_v4 = vpack.c.bf16 %v2844_v33, %v2841_v24  ;;  %v2846_v7 = vpop.f32.mrb[83].mxu0  ;;  %v15180_v33 = vld [vmem:[%s19059_s1 + $0x6cc] ss:$16 sps:$4 sm:$0xff]  }
 0x400   :  { %3056 = vmatmul.mubr.bf16.gmra.mrb[188].mxu0 %v15161_v29  ;;  %13263 = vmatmul.mubr.msk.bf16.vlgmr.msra.gmra.mrb[0].mxu1 %vm3331_vm1, %v3273_v28 }
 0x401   :  { %13266 = vmatprep.mubr.msk.bf16.mxu1 %vm3331_vm1, %v3274_v61  ;;  %3063 = vmatprep.mubr.bf16.mxu0 %v15162_v1 }
 0x402   :  { %13279 = vmatpush3.bf16.msra.mxu1 %v3750_v38 }
 0x403   :  { %v2849_v52 = vpop.f32.mrb[84].mxu0  ;;  %14762 = vmatprep.subr.msk.bf16.mxu1 %vm3356_vm0, %v11811_v46  ;;  %v15182_v46 = vld [vmem:[%s19059_s1 + $0x6c8] ss:$16 sps:$4 sm:$0xff]  }
 0x404   :  { %v2851_v10 = vpop.f32.mrb[85].mxu0 }
 0x405   :  { %v2852_v14 = vpop.f32.mrb[86].mxu0  ;;  %v15183_v10 = vld [vmem:[%s19059_s1 + $0x6ec] ss:$16 sps:$4 sm:$0xff]  }
 0x406   :  { %v3277_v20 = vpack.c.bf16 %v2852_v14, %v2849_v52  ;;  %v2854_v21 = vpop.f32.mrb[87].mxu0 }
 0x407   :  { %v15185_v21 = vld [vmem:[%s19059_s1 + $0x6e8] ss:$16 sps:$4 sm:$0xff]  }
 0x408   :  { %3064 = vmatmul.mubr.bf16.gmra.mrb[192].mxu0 %v15164_v11  ;;  %13267 = vmatmul.mubr.msk.bf16.gmra.mrb[4].mxu1 %vm3331_vm1, %v3275_v19  ;;  %v16841_v19 = vld [vmem:[%s19060_s2 + $0xa] sm:$0x3] }
 0x409   :  { %13270 = vmatprep.mubr.msk.bf16.mxu1 %vm3331_vm1, %v3276_v4  ;;  %3071 = vmatprep.mubr.bf16.mxu0 %v15165_v17 }
 0x40b   :  { %v2857_v23 = vpop.f32.mrb[88].mxu0 }
 0x40c   :  { %v2859_v25 = vpop.f32.mrb[89].mxu0 }
 0x40d   :  { %v2860_v32 = vpop.f32.mrb[90].mxu0  ;;  %v15186_v25 = vld [vmem:[%s19059_s1 + $0x70c] ss:$16 sps:$4 sm:$0xff]  }
 0x40e   :  { %v3278_v41 = vpack.c.bf16 %v2860_v32, %v2857_v23  ;;  %v2862_v31 = vpop.f32.mrb[91].mxu0 }
 0x40f   :  { %v15188_v31 = vld [vmem:[%s19059_s1 + $0x708] ss:$16 sps:$4 sm:$0xff]  }
 0x410   :  { %3072 = vmatmul.mubr.bf16.gmra.mrb[196].mxu0 %v15167_v27  ;;  %13271 = vmatmul.mubr.msk.bf16.gmra.mrb[8].mxu1 %vm3331_vm1, %v3277_v20 }
 0x411   :  { %13274 = vmatprep.mubr.msk.bf16.mxu1 %vm3331_vm1, %v3278_v41  ;;  %3079 = vmatprep.mubr.bf16.mxu0 %v15168_v35 }
 0x413   :  { %v2865_v43 = vpop.f32.mrb[92].mxu0 }
 0x414   :  { %v2867_v49 = vpop.f32.mrb[93].mxu0 }
 0x415   :  { %v2868_v34 = vpop.f32.mrb[94].mxu0  ;;  %v15189_v49 = vld [vmem:[%s19059_s1 + $0x72c] ss:$16 sps:$4 sm:$0xff]  }
 0x416   :  { %v3279_v40 = vpack.c.bf16 %v2868_v34, %v2865_v43  ;;  %v2870_v44 = vpop.f32.mrb[95].mxu0 }
 0x417   :  { %v15191_v44 = vld [vmem:[%s19059_s1 + $0x728] ss:$16 sps:$4 sm:$0xff]  }
 0x418   :  { %3080 = vmatmul.mubr.bf16.gmra.mrb[200].mxu0 %v15170_v30  ;;  %13275 = vmatmul.mubr.msk.bf16.gmra.mrb[12].mxu1 %vm3331_vm1, %v3279_v40 }
 0x419   :  { %3087 = vmatprep.mubr.bf16.mxu0 %v15171_v37 }
 0x41b   :  { %v2873_v47 = vpop.f32.mrb[96].mxu0 }
 0x41c   :  { %v2875_v28 = vpop.f32.mrb[97].mxu0 }
 0x41d   :  { %v2876_v50 = vpop.f32.mrb[98].mxu0  ;;  %v15192_v28 = vld [vmem:[%s19059_s1 + $0x74c] ss:$16 sps:$4 sm:$0xff]  }
 0x41e   :  { %v3280_v58 = vpack.c.bf16 %v2876_v50, %v2873_v47  ;;  %v2878_v56 = vpop.f32.mrb[99].mxu0 }
 0x41f   :  { %v15194_v56 = vld [vmem:[%s19059_s1 + $0x748] ss:$16 sps:$4 sm:$0xff]  }
 0x420   :  { %3088 = vmatmul.mubr.bf16.gmra.mrb[204].mxu0 %v15173_v53  ;;  %13280 = vmatprep.mubr.msk.bf16.mxu1 %vm3331_vm1, %v3280_v58 }
 0x421   :  { %3095 = vmatprep.mubr.bf16.mxu0 %v15174_v55 }
 0x423   :  { %v2881_v59 = vpop.f32.mrb[100].mxu0 }
 0x424   :  { %v2883_v61 = vpop.f32.mrb[101].mxu0 }
 0x425   :  { %v2884_v5 = vpop.f32.mrb[102].mxu0  ;;  %v15195_v61 = vld [vmem:[%s19059_s1 + $0x76c] ss:$16 sps:$4 sm:$0xff]  }
 0x426   :  { %v3281_v13 = vpack.c.bf16 %v2884_v5, %v2881_v59  ;;  %v2886_v16 = vpop.f32.mrb[103].mxu0 }
 0x427   :  { %v15197_v16 = vld [vmem:[%s19059_s1 + $0x768] ss:$16 sps:$4 sm:$0xff]  }
 0x428   :  { %3096 = vmatmul.mubr.bf16.gmra.mrb[208].mxu0 %v15176_v2  ;;  %13281 = vmatmul.mubr.msk.bf16.vlgmr.msra.gmra.mrb[0].mxu1 %vm3331_vm1, %v3281_v13 }
 0x429   :  { %3103 = vmatprep.mubr.bf16.mxu0 %v15177_v8  ;;  %13297 = vmatpush3.bf16.msra.mxu1 %v3892_v62 }
 0x42a   :  { %14763 = vmatprep.subr.msk.bf16.mxu1 %vm3356_vm0, %v16841_v19 }
 0x42b   :  { %v2889_v22 = vpop.f32.mrb[104].mxu0 }
 0x42c   :  { %v2891_v24 = vpop.f32.mrb[105].mxu0 }
 0x42d   :  { %v2892_v29 = vpop.f32.mrb[106].mxu0 }
 0x42e   :  { %v3282_v1 = vpack.c.bf16 %v2892_v29, %v2889_v22  ;;  %v2894_v4 = vpop.f32.mrb[107].mxu0  ;;  %v15198_v22 = vld [vmem:[%s19059_s1 + $0x78c] ss:$16 sps:$4 sm:$0xff]  }
 0x430   :  { %3104 = vmatmul.mubr.bf16.gmra.mrb[212].mxu0 %v15179_v26  ;;  %13284 = vmatprep.mubr.msk.bf16.mxu1 %vm3331_vm1, %v3282_v1  ;;  %v15200_v1 = vld [vmem:[%s19059_s1 + $0x788] ss:$16 sps:$4 sm:$0xff]  }
 0x431   :  { %3111 = vmatprep.mubr.bf16.mxu0 %v15180_v33 }
 0x433   :  { %v2897_v7 = vpop.f32.mrb[108].mxu0 }
 0x434   :  { %v2899_v38 = vpop.f32.mrb[109].mxu0 }
 0x435   :  { %v2900_v52 = vpop.f32.mrb[110].mxu0 }
 0x436   :  { %v3283_v11 = vpack.c.bf16 %v2900_v52, %v2897_v7  ;;  %v2902_v14 = vpop.f32.mrb[111].mxu0  ;;  %v15201_v7 = vld [vmem:[%s19059_s1 + $0x7ac] ss:$16 sps:$4 sm:$0xff]   ;;  %v4034_v52 = vsel %vm3356_vm0, %v16841_v19, 0 }
 0x438   :  { %3112 = vmatmul.mubr.bf16.gmra.mrb[216].mxu0 %v15182_v46  ;;  %13285 = vmatmul.mubr.msk.bf16.gmra.mrb[4].mxu1 %vm3331_vm1, %v3283_v11 }
 0x439   :  { %3119 = vmatprep.mubr.bf16.mxu0 %v15183_v10  ;;  %v16906_v10 = vld [vmem:[%s19060_s2 + $0xc] sm:$0x3] }
 0x43b   :  { %v2905_v17 = vpop.f32.mrb[112].mxu0 }
 0x43c   :  { %v2907_v20 = vpop.f32.mrb[113].mxu0 }
 0x43d   :  { %v2908_v23 = vpop.f32.mrb[114].mxu0  ;;  %v15204_v20 = vld [vmem:[%s19059_s1 + $0x7cc] ss:$16 sps:$4 sm:$0xff]  }
 0x43e   :  { %v3284_v27 = vpack.c.bf16 %v2908_v23, %v2905_v17  ;;  %v2910_v32 = vpop.f32.mrb[115].mxu0  ;;  %v15203_v17 = vld [vmem:[%s19059_s1 + $0x7a8] ss:$16 sps:$4 sm:$0xff]  }
 0x43f   :  { %v15206_v32 = vld [vmem:[%s19059_s1 + $0x7c8] ss:$16 sps:$4 sm:$0xff]  }
 0x440   :  { %3120 = vmatmul.mubr.bf16.gmra.mrb[220].mxu0 %v15185_v21  ;;  %13288 = vmatprep.mubr.msk.bf16.mxu1 %vm3331_vm1, %v3284_v27 }
 0x441   :  { %3127 = vmatprep.mubr.bf16.mxu0 %v15186_v25 }
 0x443   :  { %v2913_v35 = vpop.f32.mrb[116].mxu0 }
 0x444   :  { %v2915_v41 = vpop.f32.mrb[117].mxu0 }
 0x445   :  { %v2916_v43 = vpop.f32.mrb[118].mxu0  ;;  %v15207_v41 = vld [vmem:[%s19059_s1 + $0x7ec] ss:$16 sps:$4 sm:$0xff]  }
 0x446   :  { %v3285_v30 = vpack.c.bf16 %v2916_v43, %v2913_v35  ;;  %v2918_v34 = vpop.f32.mrb[119].mxu0 }
 0x447   :  { %v15209_v34 = vld [vmem:[%s19059_s1 + $0x7e8] ss:$16 sps:$4 sm:$0xff]  }
 0x448   :  { %3128 = vmatmul.mubr.bf16.gmra.mrb[224].mxu0 %v15188_v31  ;;  %13289 = vmatmul.mubr.msk.bf16.gmra.mrb[8].mxu1 %vm3331_vm1, %v3285_v30 }
 0x449   :  { %3135 = vmatprep.mubr.bf16.mxu0 %v15189_v49 }
 0x44b   :  { %v2921_v37 = vpop.f32.mrb[120].mxu0 }
 0x44c   :  { %v2923_v40 = vpop.f32.mrb[121].mxu0 }
 0x44d   :  { %v2924_v47 = vpop.f32.mrb[122].mxu0  ;;  %v15212_v40 = vld [vmem:[%s19059_s1 + $0x80c] ss:$16 sps:$4 sm:$0xff]  }
 0x44e   :  { %v3286_v53 = vpack.c.bf16 %v2924_v47, %v2921_v37  ;;  %v2926_v50 = vpop.f32.mrb[123].mxu0 }
 0x450   :  { %3136 = vmatmul.mubr.bf16.gmra.mrb[228].mxu0 %v15191_v44  ;;  %13292 = vmatprep.mubr.msk.bf16.mxu1 %vm3331_vm1, %v3286_v53 }
 0x451   :  { %3143 = vmatprep.mubr.bf16.mxu0 %v15192_v28 }
 0x453   :  { %v2929_v55 = vpop.f32.mrb[124].mxu0 }
 0x454   :  { %v2931_v58 = vpop.f32.mrb[125].mxu0 }
 0x455   :  { %v2932_v59 = vpop.f32.mrb[126].mxu0 }
 0x456   :  { %v3287_v2 = vpack.c.bf16 %v2932_v59, %v2929_v55  ;;  %v2934_v5 = vpop.f32.mrb[127].mxu0  ;;  %v15210_v55 = vld [vmem:[%s19059_s1 + $0x808] ss:$16 sps:$4 sm:$0xff]  }
 0x458   :  { %3144 = vmatmul.mubr.bf16.gmra.mrb[232].mxu0 %v15194_v56  ;;  %13293 = vmatmul.mubr.msk.bf16.gmra.mrb[12].mxu1 %vm3331_vm1, %v3287_v2  ;;  %v15215_v56 = vld [vmem:[%s19059_s1 + $0x82c] ss:$16 sps:$4 sm:$0xff]  }
 0x459   :  { %3151 = vmatprep.mubr.bf16.mxu0 %v15195_v61 }
 0x45b   :  { %v2937_v8 = vpop.f32.mrb[128].mxu0 }
 0x45c   :  { %v2939_v13 = vpop.f32.mrb[129].mxu0 }
 0x45d   :  { %v2940_v62 = vpop.f32.mrb[130].mxu0  ;;  %v15213_v13 = vld [vmem:[%s19059_s1 + $0x828] ss:$16 sps:$4 sm:$0xff]  }
 0x45e   :  { %v3288_v24 = vpack.c.bf16 %v2940_v62, %v2937_v8  ;;  %v2942_v26 = vpop.f32.mrb[131].mxu0  ;;  %v15218_v62 = vld [vmem:[%s19059_s1 + $0x84c] ss:$16 sps:$4 sm:$0xff]  }
 0x460   :  { %3152 = vmatmul.mubr.bf16.gmra.mrb[236].mxu0 %v15197_v16  ;;  %13298 = vmatprep.mubr.msk.bf16.mxu1 %vm3331_vm1, %v3288_v24 }
 0x461   :  { %3159 = vmatprep.mubr.bf16.mxu0 %v15198_v22 }
 0x463   :  { %v2945_v29 = vpop.f32.mrb[132].mxu0 }
 0x464   :  { %v2947_v33 = vpop.f32.mrb[133].mxu0 }
 0x465   :  { %v2948_v4 = vpop.f32.mrb[134].mxu0  ;;  %v15216_v33 = vld [vmem:[%s19059_s1 + $0x848] ss:$16 sps:$4 sm:$0xff]  }
 0x466   :  { %v3289_v38 = vpack.c.bf16 %v2948_v4, %v2945_v29  ;;  %v2950_v46 = vpop.f32.mrb[135].mxu0  ;;  %v15221_v4 = vld [vmem:[%s19059_s1 + $0x86c] ss:$16 sps:$4 sm:$0xff]  }
 0x468   :  { %3160 = vmatmul.mubr.bf16.gmra.mrb[240].mxu0 %v15200_v1  ;;  %13299 = vmatmul.mubr.msk.bf16.vlgmr.msra.gmra.mrb[0].mxu1 %vm3331_vm1, %v3289_v38 }
 0x469   :  { %3167 = vmatprep.mubr.bf16.mxu0 %v15201_v7  ;;  %13315 = vmatpush3.bf16.msra.mxu1 %v4034_v52 }
 0x46a   :  { %14764 = vmatprep.subr.msk.bf16.mxu1 %vm3356_vm0, %v16906_v10 }
 0x46b   :  { %v2953_v11 = vpop.f32.mrb[136].mxu0 }
 0x46c   :  { %v2955_v14 = vpop.f32.mrb[137].mxu0 }
 0x46d   :  { %v2956_v19 = vpop.f32.mrb[138].mxu0 }
 0x46e   :  { %v3290_v21 = vpack.c.bf16 %v2956_v19, %v2953_v11  ;;  %v2958_v23 = vpop.f32.mrb[139].mxu0  ;;  %v15219_v11 = vld [vmem:[%s19059_s1 + $0x868] ss:$16 sps:$4 sm:$0xff]  }
 0x470   :  { %3168 = vmatmul.mubr.bf16.gmra.mrb[244].mxu0 %v15203_v17  ;;  %13302 = vmatprep.mubr.msk.bf16.mxu1 %vm3331_vm1, %v3290_v21  ;;  %v15224_v17 = vld [vmem:[%s19059_s1 + $0x88c] ss:$16 sps:$4 sm:$0xff]  }
 0x471   :  { %3175 = vmatprep.mubr.bf16.mxu0 %v15204_v20 }
 0x473   :  { %v2961_v25 = vpop.f32.mrb[140].mxu0 }
 0x474   :  { %v2963_v27 = vpop.f32.mrb[141].mxu0 }
 0x475   :  { %v2964_v35 = vpop.f32.mrb[142].mxu0 }
 0x476   :  { %v3291_v31 = vpack.c.bf16 %v2964_v35, %v2961_v25  ;;  %v2966_v43 = vpop.f32.mrb[143].mxu0  ;;  %v15222_v25 = vld [vmem:[%s19059_s1 + $0x888] ss:$16 sps:$4 sm:$0xff]  }
 0x478   :  { %3176 = vmatmul.mubr.bf16.gmra.mrb[248].mxu0 %v15206_v32  ;;  %13303 = vmatmul.mubr.msk.bf16.gmra.mrb[4].mxu1 %vm3331_vm1, %v3291_v31  ;;  %v15227_v32 = vld [vmem:[%s19059_s1 + $0x8ac] ss:$16 sps:$4 sm:$0xff]   ;;  %v4176_v31 = vsel %vm3356_vm0, %v16906_v10, 0 }
 0x479   :  { %3183 = vmatprep.mubr.bf16.mxu0 %v15207_v41 }
 0x47b   :  { %v2969_v49 = vpop.f32.mrb[144].mxu0 }
 0x47c   :  { %v2971_v30 = vpop.f32.mrb[145].mxu0 }
 0x47d   :  { %v2972_v37 = vpop.f32.mrb[146].mxu0 }
 0x47e   :  { %v3292_v44 = vpack.c.bf16 %v2972_v37, %v2969_v49  ;;  %v2974_v47 = vpop.f32.mrb[147].mxu0 }
 0x480   :  { %3184 = vmatmul.mubr.bf16.gmra.mrb[252].mxu0 %v15209_v34  ;;  %13306 = vmatprep.mubr.msk.bf16.mxu1 %vm3331_vm1, %v3292_v44  ;;  %v15230_v34 = vld [vmem:[%s19059_s1 + $0x8cc] ss:$16 sps:$4 sm:$0xff]  }
 0x481   :  { %3191 = vmatprep.mubr.bf16.mxu0 %v15212_v40 }
 0x483   :  { %v2977_v28 = vpop.f32.mrb[0].mxu0 }
 0x484   :  { %v2978_v53 = vadd.f32 %v2977_v28, %v16310_v36  ;;  %v2979_v50 = vpop.f32.mrb[1].mxu0 }
 0x485   :  { %v2980_v58 = vpop.f32.mrb[2].mxu0 }
 0x486   :  { %v2981_v59 = vadd.f32 %v2980_v58, %v16315_v39  ;;  %v2982_v61 = vpop.f32.mrb[3].mxu0 }
 0x488   :  { %v3293_v2 = vpack.c.bf16 %v2981_v59, %v2978_v53  ;;  %3192 = vmatmul.mubr.bf16.gmra.mrb[148].mxu0 %v15210_v55  ;;  %v15228_v53 = vld [vmem:[%s19059_s1 + $0x8c8] ss:$16 sps:$4 sm:$0xff]   ;;  %v15233_v55 = vld [vmem:[%s19059_s1 + $0x8ec] ss:$16 sps:$4 sm:$0xff]  }
 0x489   :  { %3199 = vmatprep.mubr.bf16.mxu0 %v15215_v56 }
 0x48a   :  { %13307 = vmatmul.mubr.msk.bf16.gmra.mrb[8].mxu1 %vm3331_vm1, %v3293_v2  ;;  %v15231_v2 = vld [vmem:[%s19059_s1 + $0x8e8] ss:$16 sps:$4 sm:$0xff]  }
 0x48b   :  { %v2985_v5 = vpop.f32.mrb[4].mxu0 }
 0x48c   :  { %v2986_v36 = vadd.f32 %v2985_v5, %v16320_v42  ;;  %v2987_v8 = vpop.f32.mrb[5].mxu0 }
 0x48d   :  { %v2988_v16 = vpop.f32.mrb[6].mxu0 }
 0x48e   :  { %v2989_v39 = vadd.f32 %v2988_v16, %v16325_v45  ;;  %v2990_v22 = vpop.f32.mrb[7].mxu0 }
 0x490   :  { %v3294_v24 = vpack.c.bf16 %v2989_v39, %v2986_v36  ;;  %3200 = vmatmul.mubr.bf16.gmra.mrb[152].mxu0 %v15213_v13 }
 0x491   :  { %3207 = vmatprep.mubr.bf16.mxu0 %v15218_v62 }
 0x492   :  { %13310 = vmatprep.mubr.msk.bf16.mxu1 %vm3331_vm1, %v3294_v24 }
 0x493   :  { %v2993_v26 = vpop.f32.mrb[8].mxu0 }
 0x494   :  { %v2994_v42 = vadd.f32 %v2993_v26, %v16330_v48  ;;  %v2995_v29 = vpop.f32.mrb[9].mxu0 }
 0x495   :  { %v2996_v1 = vpop.f32.mrb[10].mxu0 }
 0x496   :  { %v2997_v45 = vadd.f32 %v2996_v1, %v16335_v51  ;;  %v2998_v7 = vpop.f32.mrb[11].mxu0 }
 0x498   :  { %v3295_v38 = vpack.c.bf16 %v2997_v45, %v2994_v42  ;;  %3208 = vmatmul.mubr.bf16.gmra.mrb[156].mxu0 %v15216_v33 }
 0x499   :  { %3215 = vmatprep.mubr.bf16.mxu0 %v15221_v4 }
 0x49a   :  { %13311 = vmatmul.mubr.msk.bf16.gmra.mrb[12].mxu1 %vm3331_vm1, %v3295_v38 }
 0x49b   :  { %v3001_v46 = vpop.f32.mrb[12].mxu0 }
 0x49c   :  { %v3002_v48 = vadd.f32 %v3001_v46, %v16340_v54  ;;  %v3003_v52 = vpop.f32.mrb[13].mxu0 }
 0x49d   :  { %v3004_v14 = vpop.f32.mrb[14].mxu0 }
 0x49e   :  { %v3005_v51 = vadd.f32 %v3004_v14, %v16345_v57  ;;  %v3006_v19 = vpop.f32.mrb[15].mxu0 }
 0x4a0   :  { %v3296_v20 = vpack.c.bf16 %v3005_v51, %v3002_v48  ;;  %3216 = vmatmul.mubr.bf16.gmra.mrb[160].mxu0 %v15219_v11 }
 0x4a1   :  { %3223 = vmatprep.mubr.bf16.mxu0 %v15224_v17 }
 0x4a2   :  { %13316 = vmatprep.mubr.msk.bf16.mxu1 %vm3331_vm1, %v3296_v20 }
 0x4a3   :  { %v3009_v21 = vpop.f32.mrb[16].mxu0 }
 0x4a4   :  { %v3010_v54 = vadd.f32 %v3009_v21, %v16350_v60  ;;  %v3011_v23 = vpop.f32.mrb[17].mxu0  ;;  %v16981_v60 = vld [vmem:[%s19060_s2 + $0xe] sm:$0x3]  ;;  %v11847_v21 = vld [vmem:[%s19060_s2 + $0x10] sm:$0x3] }
 0x4a5   :  { %v3012_v27 = vpop.f32.mrb[18].mxu0  ;;  %v4318_v20 = vsel %vm3356_vm0, %v16981_v60, 0 }
 0x4a6   :  { %v3013_v57 = vadd.f32 %v3012_v27, %v16355_v63  ;;  %v3014_v35 = vpop.f32.mrb[19].mxu0  ;;  %v15225_v63 = vld [vmem:[%s19059_s1 + $0x8a8] ss:$16 sps:$4 sm:$0xff]  }
 0x4a8   :  { %v3297_v41 = vpack.c.bf16 %v3013_v57, %v3010_v54  ;;  %3224 = vmatmul.mubr.bf16.gmra.mrb[164].mxu0 %v15222_v25 }
 0x4a9   :  { %3231 = vmatprep.mubr.bf16.mxu0 %v15227_v32 }
 0x4aa   :  { %13317 = vmatmul.mubr.msk.bf16.vlgmr.msra.gmra.mrb[0].mxu1 %vm3331_vm1, %v3297_v41 }
 0x4ab   :  { %v3017_v43 = vpop.f32.mrb[20].mxu0  ;;  %13333 = vmatpush3.bf16.msra.mxu1 %v4176_v31 }
 0x4ac   :  { %v3018_v49 = vadd.f32 %v3017_v43, %v16360_v3  ;;  %v3019_v30 = vpop.f32.mrb[21].mxu0  ;;  %14765 = vmatprep.subr.msk.bf16.mxu1 %vm3356_vm0, %v16981_v60 }
 0x4ad   :  { %v3020_v10 = vpop.f32.mrb[22].mxu0 }
 0x4ae   :  { %v3021_v37 = vadd.f32 %v3020_v10, %v16365_v6  ;;  %v3022_v40 = vpop.f32.mrb[23].mxu0 }
 0x4b0   :  { %v3298_v44 = vpack.c.bf16 %v3021_v37, %v3018_v49  ;;  %3232 = vmatmul.mubr.bf16.gmra.mrb[168].mxu0 %v15225_v63 }
 0x4b1   :  { %3239 = vmatprep.mubr.bf16.mxu0 %v15230_v34 }
 0x4b2   :  { %13320 = vmatprep.mubr.msk.bf16.mxu1 %vm3331_vm1, %v3298_v44 }
 0x4b3   :  { %v3025_v3 = vpop.f32.mrb[24].mxu0 }
 0x4b4   :  { %v3026_v47 = vadd.f32 %v3025_v3, %v16370_v9  ;;  %v3027_v28 = vpop.f32.mrb[25].mxu0 }
 0x4b5   :  { %v3028_v50 = vpop.f32.mrb[26].mxu0 }
 0x4b6   :  { %v3029_v6 = vadd.f32 %v3028_v50, %v16375_v12  ;;  %v3030_v58 = vpop.f32.mrb[27].mxu0 }
 0x4b8   :  { %v3299_v56 = vpack.c.bf16 %v3029_v6, %v3026_v47  ;;  %3240 = vmatmul.mubr.bf16.gmra.mrb[172].mxu0 %v15228_v53 }
 0x4b9   :  { %3247 = vmatprep.mubr.bf16.mxu0 %v15233_v55 }
 0x4ba   :  { %13321 = vmatmul.mubr.msk.bf16.gmra.mrb[4].mxu1 %vm3331_vm1, %v3299_v56 }
 0x4bb   :  { %v3033_v59 = vpop.f32.mrb[28].mxu0 }
 0x4bc   :  { %v3034_v9 = vadd.f32 %v3033_v59, %v16380_v15  ;;  %v3035_v61 = vpop.f32.mrb[29].mxu0 }
 0x4bd   :  { %v3036_v5 = vpop.f32.mrb[30].mxu0 }
 0x4be   :  { %v3037_v36 = vadd.f32 %v3036_v5, %v16385_v18  ;;  %v3038_v8 = vpop.f32.mrb[31].mxu0 }
 0x4c0   :  { %v3300_v13 = vpack.c.bf16 %v3037_v36, %v3034_v9  ;;  %3248 = vmatmul.mubr.bf16.gmra.mrb[176].mxu0 %v15231_v2 }
 0x4c2   :  { %13324 = vmatprep.mubr.msk.bf16.mxu1 %vm3331_vm1, %v3300_v13 }
 0x4c3   :  { %v3041_v12 = vpop.f32.mrb[180].mxu0 }
 0x4c4   :  { %v3043_v16 = vpop.f32.mrb[181].mxu0 }
 0x4c5   :  { %v3044_v62 = vpop.f32.mrb[182].mxu0 }
 0x4c6   :  { %v3301_v39 = vpack.c.bf16 %v3044_v62, %v3041_v12  ;;  %v3046_v22 = vpop.f32.mrb[183].mxu0 }
 0x4c7   :  { %v4460_v22 = vsel %vm3356_vm0, %v11847_v21, 0 }
 0x4c8   :  { %13325 = vmatmul.mubr.msk.bf16.gmra.mrb[8].mxu1 %vm3331_vm1, %v3301_v39 }
 0x4cb   :  { %v3049_v15 = vpop.f32.mrb[184].mxu0 }
 0x4cc   :  { %v3051_v24 = vpop.f32.mrb[185].mxu0 }
 0x4cd   :  { %v3052_v26 = vpop.f32.mrb[186].mxu0 }
 0x4ce   :  { %v3302_v42 = vpack.c.bf16 %v3052_v26, %v3049_v15  ;;  %v3054_v29 = vpop.f32.mrb[187].mxu0 }
 0x4d0   :  { %13328 = vmatprep.mubr.msk.bf16.mxu1 %vm3331_vm1, %v3302_v42 }
 0x4d3   :  { %v3057_v18 = vpop.f32.mrb[188].mxu0 }
 0x4d4   :  { %v3059_v33 = vpop.f32.mrb[189].mxu0 }
 0x4d5   :  { %v3060_v1 = vpop.f32.mrb[190].mxu0 }
 0x4d6   :  { %v3303_v4 = vpack.c.bf16 %v3060_v1, %v3057_v18  ;;  %v3062_v45 = vpop.f32.mrb[191].mxu0 }
 0x4d8   :  { %13329 = vmatmul.mubr.msk.bf16.gmra.mrb[12].mxu1 %vm3331_vm1, %v3303_v4 }
 0x4db   :  { %v3065_v7 = vpop.f32.mrb[192].mxu0 }
 0x4dc   :  { %v3067_v38 = vpop.f32.mrb[193].mxu0 }
 0x4dd   :  { %v3068_v46 = vpop.f32.mrb[194].mxu0 }
 0x4de   :  { %v3304_v48 = vpack.c.bf16 %v3068_v46, %v3065_v7  ;;  %v3070_v52 = vpop.f32.mrb[195].mxu0 }
 0x4e0   :  { %13334 = vmatprep.mubr.msk.bf16.mxu1 %vm3331_vm1, %v3304_v48 }
 0x4e3   :  { %v3073_v11 = vpop.f32.mrb[196].mxu0 }
 0x4e4   :  { %v3075_v14 = vpop.f32.mrb[197].mxu0 }
 0x4e5   :  { %v3076_v17 = vpop.f32.mrb[198].mxu0 }
 0x4e6   :  { %v3305_v51 = vpack.c.bf16 %v3076_v17, %v3073_v11  ;;  %v3078_v19 = vpop.f32.mrb[199].mxu0 }
 0x4e8   :  { %13335 = vmatmul.mubr.msk.bf16.vlgmr.msra.gmra.mrb[0].mxu1 %vm3331_vm1, %v3305_v51 }
 0x4e9   :  { %13351 = vmatpush3.bf16.msra.mxu1 %v4318_v20 }
 0x4ea   :  { %14766 = vmatprep.subr.msk.bf16.mxu1 %vm3356_vm0, %v11847_v21 }
 0x4eb   :  { %v3081_v54 = vpop.f32.mrb[200].mxu0 }
 0x4ec   :  { %v3083_v23 = vpop.f32.mrb[201].mxu0 }
 0x4ed   :  { %v3084_v25 = vpop.f32.mrb[202].mxu0 }
 0x4ee   :  { %v3306_v27 = vpack.c.bf16 %v3084_v25, %v3081_v54  ;;  %v3086_v32 = vpop.f32.mrb[203].mxu0 }
 0x4f0   :  { %13338 = vmatprep.mubr.msk.bf16.mxu1 %vm3331_vm1, %v3306_v27 }
 0x4f3   :  { %v3089_v57 = vpop.f32.mrb[204].mxu0 }
 0x4f4   :  { %v3091_v35 = vpop.f32.mrb[205].mxu0 }
 0x4f5   :  { %v3092_v41 = vpop.f32.mrb[206].mxu0 }
 0x4f6   :  { %v3307_v31 = vpack.c.bf16 %v3092_v41, %v3089_v57  ;;  %v3094_v60 = vpop.f32.mrb[207].mxu0 }
 0x4f8   :  { %13339 = vmatmul.mubr.msk.bf16.gmra.mrb[4].mxu1 %vm3331_vm1, %v3307_v31 }
 0x4fb   :  { %v3097_v43 = vpop.f32.mrb[208].mxu0 }
 0x4fc   :  { %v3099_v49 = vpop.f32.mrb[209].mxu0 }
 0x4fd   :  { %v3100_v30 = vpop.f32.mrb[210].mxu0 }
 0x4fe   :  { %v3308_v63 = vpack.c.bf16 %v3100_v30, %v3097_v43  ;;  %v3102_v10 = vpop.f32.mrb[211].mxu0 }
 0x500   :  { %13342 = vmatprep.mubr.msk.bf16.mxu1 %vm3331_vm1, %v3308_v63 }
 0x503   :  { %v3105_v34 = vpop.f32.mrb[212].mxu0 }
 0x504   :  { %v3107_v37 = vpop.f32.mrb[213].mxu0 }
 0x505   :  { %v3108_v40 = vpop.f32.mrb[214].mxu0 }
 0x506   :  { %v3309_v44 = vpack.c.bf16 %v3108_v40, %v3105_v34  ;;  %v3110_v3 = vpop.f32.mrb[215].mxu0 }
 0x508   :  { %13343 = vmatmul.mubr.msk.bf16.gmra.mrb[8].mxu1 %vm3331_vm1, %v3309_v44 }
 0x50b   :  { %v3113_v47 = vpop.f32.mrb[216].mxu0 }
 0x50c   :  { %v3115_v28 = vpop.f32.mrb[217].mxu0 }
 0x50d   :  { %v3116_v53 = vpop.f32.mrb[218].mxu0 }
 0x50e   :  { %v3310_v50 = vpack.c.bf16 %v3116_v53, %v3113_v47  ;;  %v3118_v55 = vpop.f32.mrb[219].mxu0 }
 0x510   :  { %13346 = vmatprep.mubr.msk.bf16.mxu1 %vm3331_vm1, %v3310_v50 }
 0x513   :  { %v3121_v6 = vpop.f32.mrb[220].mxu0 }
 0x514   :  { %v3123_v58 = vpop.f32.mrb[221].mxu0 }
 0x515   :  { %v3124_v56 = vpop.f32.mrb[222].mxu0 }
 0x516   :  { %v3311_v59 = vpack.c.bf16 %v3124_v56, %v3121_v6  ;;  %v3126_v9 = vpop.f32.mrb[223].mxu0 }
 0x518   :  { %13347 = vmatmul.mubr.msk.bf16.gmra.mrb[12].mxu1 %vm3331_vm1, %v3311_v59 }
 0x51b   :  { %v3129_v61 = vpop.f32.mrb[224].mxu0 }
 0x51c   :  { %v3131_v2 = vpop.f32.mrb[225].mxu0 }
 0x51d   :  { %v3132_v5 = vpop.f32.mrb[226].mxu0 }
 0x51e   :  { %v3312_v36 = vpack.c.bf16 %v3132_v5, %v3129_v61  ;;  %v3134_v8 = vpop.f32.mrb[227].mxu0 }
 0x520   :  { %13352 = vmatprep.mubr.msk.bf16.mxu1 %vm3331_vm1, %v3312_v36 }
 0x523   :  { %v3137_v13 = vpop.f32.mrb[228].mxu0 }
 0x524   :  { %v3139_v12 = vpop.f32.mrb[229].mxu0 }
 0x525   :  { %v3140_v16 = vpop.f32.mrb[230].mxu0 }
 0x526   :  { %v3313_v62 = vpack.c.bf16 %v3140_v16, %v3137_v13  ;;  %v3142_v39 = vpop.f32.mrb[231].mxu0 }
 0x528   :  { %13353 = vmatmul.mubr.msk.bf16.vlgmr.msra.gmra.mrb[0].mxu1 %vm3331_vm1, %v3313_v62 }
 0x529   :  { %13369 = vmatpush3.bf16.msra.mxu1 %v4460_v22 }
 0x52b   :  { %v3145_v15 = vpop.f32.mrb[232].mxu0 }
 0x52c   :  { %v3147_v24 = vpop.f32.mrb[233].mxu0 }
 0x52d   :  { %v3148_v26 = vpop.f32.mrb[234].mxu0 }
 0x52e   :  { %v3314_v42 = vpack.c.bf16 %v3148_v26, %v3145_v15  ;;  %v3150_v29 = vpop.f32.mrb[235].mxu0 }
 0x530   :  { %13356 = vmatprep.mubr.msk.bf16.mxu1 %vm3331_vm1, %v3314_v42 }
 0x533   :  { %v3153_v18 = vpop.f32.mrb[236].mxu0 }
 0x534   :  { %v3155_v33 = vpop.f32.mrb[237].mxu0 }
 0x535   :  { %v3156_v1 = vpop.f32.mrb[238].mxu0 }
 0x536   :  { %v3315_v4 = vpack.c.bf16 %v3156_v1, %v3153_v18  ;;  %v3158_v45 = vpop.f32.mrb[239].mxu0  ;;  %v15234_v1 = vld [vmem:[%s19061_s4] sm:$0xff]  }
 0x538   :  { %13357 = vmatmul.mubr.msk.bf16.gmra.mrb[4].mxu1 %vm3331_vm1, %v3315_v4  ;;  %v11856_v4 = vld [vmem:[%s19063_s3] ss:$0 sm:$0xff] }
 0x53b   :  { %v3161_v7 = vpop.f32.mrb[240].mxu0 }
 0x53c   :  { %v3163_v38 = vpop.f32.mrb[241].mxu0 }
 0x53d   :  { %v3164_v46 = vpop.f32.mrb[242].mxu0 }
 0x53e   :  { %v3316_v48 = vpack.c.bf16 %v3164_v46, %v3161_v7  ;;  %v3166_v52 = vpop.f32.mrb[243].mxu0 }
 0x540   :  { %13360 = vmatprep.mubr.msk.bf16.mxu1 %vm3331_vm1, %v3316_v48 }
 0x543   :  { %v3169_v11 = vpop.f32.mrb[244].mxu0 }
 0x544   :  { %v3171_v14 = vpop.f32.mrb[245].mxu0 }
 0x545   :  { %v3172_v17 = vpop.f32.mrb[246].mxu0 }
 0x546   :  { %v3317_v51 = vpack.c.bf16 %v3172_v17, %v3169_v11  ;;  %v3174_v19 = vpop.f32.mrb[247].mxu0 }
 0x548   :  { %13361 = vmatmul.mubr.msk.bf16.gmra.mrb[8].mxu1 %vm3331_vm1, %v3317_v51 }
 0x54b   :  { %v3177_v20 = vpop.f32.mrb[248].mxu0 }
 0x54c   :  { %v3179_v21 = vpop.f32.mrb[249].mxu0 }
 0x54d   :  { %v3180_v54 = vpop.f32.mrb[250].mxu0 }
 0x54e   :  { %v3318_v23 = vpack.c.bf16 %v3180_v54, %v3177_v20  ;;  %v3182_v25 = vpop.f32.mrb[251].mxu0 }
 0x550   :  { %13364 = vmatprep.mubr.msk.bf16.mxu1 %vm3331_vm1, %v3318_v23 }
 0x553   :  { %v3185_v27 = vpop.f32.mrb[252].mxu0 }
 0x554   :  { %v3187_v32 = vpop.f32.mrb[253].mxu0 }
 0x555   :  { %v3188_v57 = vpop.f32.mrb[254].mxu0 }
 0x556   :  { %v3319_v35 = vpack.c.bf16 %v3188_v57, %v3185_v27  ;;  %v3190_v41 = vpop.f32.mrb[255].mxu0 }
 0x558   :  { %13365 = vmatmul.mubr.msk.bf16.gmra.mrb[12].mxu1 %vm3331_vm1, %v3319_v35 }
 0x55b   :  { %v3193_v31 = vpop.f32.mrb[148].mxu0 }
 0x55c   :  { %v3195_v60 = vpop.f32.mrb[149].mxu0 }
 0x55d   :  { %v3196_v43 = vpop.f32.mrb[150].mxu0 }
 0x55e   :  { %v3320_v49 = vpack.c.bf16 %v3196_v43, %v3193_v31  ;;  %v3198_v30 = vpop.f32.mrb[151].mxu0 }
 0x560   :  { %13370 = vmatprep.mubr.msk.bf16.mxu1 %vm3331_vm1, %v3320_v49 }
 0x563   :  { %v3201_v63 = vpop.f32.mrb[152].mxu0 }
 0x564   :  { %v3203_v10 = vpop.f32.mrb[153].mxu0 }
 0x565   :  { %v3204_v34 = vpop.f32.mrb[154].mxu0 }
 0x566   :  { %v3321_v37 = vpack.c.bf16 %v3204_v34, %v3201_v63  ;;  %v3206_v40 = vpop.f32.mrb[155].mxu0 }
 0x568   :  { %13371 = vmatmul.mubr.msk.bf16.vlgmr.msra.gmra.mrb[0].mxu1 %vm3331_vm1, %v3321_v37 }
 0x56b   :  { %v3209_v44 = vpop.f32.mrb[156].mxu0 }
 0x56c   :  { %v3211_v3 = vpop.f32.mrb[157].mxu0 }
 0x56d   :  { %v3212_v47 = vpop.f32.mrb[158].mxu0 }
 0x56e   :  { %v3322_v28 = vpack.c.bf16 %v3212_v47, %v3209_v44  ;;  %v3214_v53 = vpop.f32.mrb[159].mxu0 }
 0x570   :  { %13374 = vmatprep.mubr.msk.bf16.mxu1 %vm3331_vm1, %v3322_v28 }
 0x573   :  { %v3217_v50 = vpop.f32.mrb[160].mxu0 }
 0x574   :  { %v3219_v55 = vpop.f32.mrb[161].mxu0 }
 0x575   :  { %v3220_v6 = vpop.f32.mrb[162].mxu0 }
 0x576   :  { %v3323_v58 = vpack.c.bf16 %v3220_v6, %v3217_v50  ;;  %v3222_v56 = vpop.f32.mrb[163].mxu0 }
 0x578   :  { %13375 = vmatmul.mubr.msk.bf16.gmra.mrb[4].mxu1 %vm3331_vm1, %v3323_v58 }
 0x57b   :  { %v3225_v59 = vpop.f32.mrb[164].mxu0 }
 0x57c   :  { %v3227_v9 = vpop.f32.mrb[165].mxu0 }
 0x57d   :  { %v3228_v61 = vpop.f32.mrb[166].mxu0 }
 0x57e   :  { %v3324_v2 = vpack.c.bf16 %v3228_v61, %v3225_v59  ;;  %v3230_v5 = vpop.f32.mrb[167].mxu0 }
 0x580   :  { %13378 = vmatprep.mubr.msk.bf16.mxu1 %vm3331_vm1, %v3324_v2 }
 0x583   :  { %v3233_v36 = vpop.f32.mrb[168].mxu0 }
 0x584   :  { %v3235_v8 = vpop.f32.mrb[169].mxu0 }
 0x585   :  { %v3236_v13 = vpop.f32.mrb[170].mxu0 }
 0x586   :  { %v3325_v12 = vpack.c.bf16 %v3236_v13, %v3233_v36  ;;  %v3238_v16 = vpop.f32.mrb[171].mxu0 }
 0x588   :  { %13379 = vmatmul.mubr.msk.bf16.gmra.mrb[8].mxu1 %vm3331_vm1, %v3325_v12 }
 0x58b   :  { %v3241_v62 = vpop.f32.mrb[172].mxu0 }
 0x58c   :  { %v3243_v39 = vpop.f32.mrb[173].mxu0 }
 0x58d   :  { %v3244_v22 = vpop.f32.mrb[174].mxu0 }
 0x58e   :  { %v3326_v15 = vpack.c.bf16 %v3244_v22, %v3241_v62  ;;  %v3246_v24 = vpop.f32.mrb[175].mxu0 }
 0x590   :  { %13382 = vmatprep.mubr.msk.bf16.mxu1 %vm3331_vm1, %v3326_v15 }
 0x593   :  { %v3249_v26 = vpop.f32.mrb[176].mxu0 }
 0x594   :  { %v3251_v42 = vpop.f32.mrb[177].mxu0 }
 0x595   :  { %v3252_v29 = vpop.f32.mrb[178].mxu0  ;;  %v15235_v42 = vld [vmem:[%s19061_s4 + $0x8] sm:$0xff]  }
 0x596   :  { %v3327_v18 = vpack.c.bf16 %v3252_v29, %v3249_v26  ;;  %v3254_v33 = vpop.f32.mrb[179].mxu0  ;;  %v15236_v26 = vld [vmem:[%s19062_s5 + $0x20] sm:$0xff]   ;;  %v15237_v29 = vld [vmem:[%s19061_s4 + $0x10] sm:$0xff]  }
 0x597   :  { %v15238_v33 = vld [vmem:[%s19061_s4 + $0x18] sm:$0xff]  }
 0x598   :  { %13383 = vmatmul.mubr.msk.bf16.gmra.mrb[12].mxu1 %vm3331_vm1, %v3327_v18  ;;  %v15255_v18 = vld [vmem:[%s19062_s5 + $0x28] sm:$0xff]  }
 0x599   :  { %13402 = vmatprep.mubr.bf16.mxu1 %v15234_v1  ;;  %v15239_v1 = vld [vmem:[%s19061_s4 + $0x20] sm:$0xff]  }
 0x63b   :  { %v13372_v45 = vpop.f32.mrb[0].mxu1 }
 0x63c   :  { %v4584_v7 = vadd.f32 %v13372_v45, %v11856_v4  ;;  %v4496_v38 = vpop.f32.mrb[1].mxu1  ;;  %v15241_v45 = vld [vmem:[%s19061_s4 + $0x30] sm:$0xff]  }
 0x63d   :  { %v4582_v46 = vadd.f32 %v11856_v4, %v4496_v38  ;;  %v13373_v48 = vpop.f32.mrb[2].mxu1  ;;  %v15242_v38 = vld [vmem:[%s19061_s4 + $0x38] sm:$0xff]  }
 0x63e   :  { %v4585_v52 = vadd.f32 %v13373_v48, %v11856_v4  ;;  %v4499_v11 = vpop.f32.mrb[3].mxu1  ;;  %v4600_v17 = vmax.f32 %v4584_v7, 0.0  ;;  %v15274_v7 = vld [vmem:[%s19062_s5 + $0x30] sm:$0xff]   ;;  %v15244_v48 = vld [vmem:[%s19061_s4 + $0x48] sm:$0xff]  }
 0x63f   :  { %v4583_v14 = vadd.f32 %v11856_v4, %v4499_v11  ;;  %v4598_v19 = vmax.f32 %v4582_v46, 0.0  ;;  %v15243_v46 = vld [vmem:[%s19061_s4 + $0x40] sm:$0xff]   ;;  %v15246_v11 = vld [vmem:[%s19061_s4 + $0x58] sm:$0xff]  }
 0x640   :  { %v4601_v51 = vmax.f32 %v4585_v52, 0.0  ;;  %v15245_v52 = vld [vmem:[%s19061_s4 + $0x50] sm:$0xff]  }
 0x641   :  { %v4599_v20 = vmax.f32 %v4583_v14, 0.0  ;;  %v15247_v14 = vld [vmem:[%s19061_s4 + $0x60] sm:$0xff]  }
 0x642   :  { %v4615_v21 = vpack.c.bf16 %v4601_v51, %v4600_v17  ;;  %v15248_v17 = vld [vmem:[%s19061_s4 + $0x68] sm:$0xff]   ;;  %v15249_v51 = vld [vmem:[%s19061_s4 + $0x70] sm:$0xff]  }
 0x643   :  { %v4614_v54 = vpack.c.bf16 %v4599_v20, %v4598_v19  ;;  %v15250_v19 = vld [vmem:[%s19061_s4 + $0x78] sm:$0xff]   ;;  %v15251_v20 = vld [vmem:[%s19061_s4 + $0x80] sm:$0xff]  }
 0x645   :  { %13386 = vmatprep.subr.bf16.mxu1 %v4614_v54 }
 0x646   :  { %13387 = vmatpush3.bf16.msra.mxu1 %v4614_v54  ;;  %v15253_v54 = vld [vmem:[%s19061_s4 + $0x90] sm:$0xff]  }
 0x647   :  { %13388 = vmatprep.subr.bf16.mxu1 %v4615_v21 }
 0x64a   :  { %13389 = vmatpush3.bf16.msra.mxu1 %v4615_v21  ;;  %v15252_v21 = vld [vmem:[%s19061_s4 + $0x88] sm:$0xff]  }
 0x64b   :  { %v13376_v23 = vpop.f32.mrb[4].mxu1 }
 0x64c   :  { %v4588_v25 = vadd.f32 %v13376_v23, %v11856_v4  ;;  %v4512_v27 = vpop.f32.mrb[5].mxu1  ;;  %v15254_v23 = vld [vmem:[%s19061_s4 + $0x98] sm:$0xff]  }
 0x64d   :  { %v4586_v32 = vadd.f32 %v11856_v4, %v4512_v27  ;;  %v13377_v57 = vpop.f32.mrb[6].mxu1  ;;  %v15257_v27 = vld [vmem:[%s19061_s4 + $0xa8] sm:$0xff]  }
 0x64e   :  { %v4589_v35 = vadd.f32 %v13377_v57, %v11856_v4  ;;  %v4515_v41 = vpop.f32.mrb[7].mxu1  ;;  %v4604_v60 = vmax.f32 %v4588_v25, 0.0  ;;  %v15256_v25 = vld [vmem:[%s19061_s4 + $0xa0] sm:$0xff]   ;;  %v15259_v57 = vld [vmem:[%s19061_s4 + $0xb8] sm:$0xff]  }
 0x64f   :  { %v4587_v31 = vadd.f32 %v11856_v4, %v4515_v41  ;;  %v4602_v49 = vmax.f32 %v4586_v32, 0.0  ;;  %v15258_v32 = vld [vmem:[%s19061_s4 + $0xb0] sm:$0xff]   ;;  %v15293_v41 = vld [vmem:[%s19062_s5 + $0x38] sm:$0xff]  }
 0x650   :  { %v4605_v43 = vmax.f32 %v4589_v35, 0.0  ;;  %v15260_v35 = vld [vmem:[%s19061_s4 + $0xc0] sm:$0xff]  }
 0x651   :  { %v4603_v30 = vmax.f32 %v4587_v31, 0.0  ;;  %v15261_v31 = vld [vmem:[%s19061_s4 + $0xc8] sm:$0xff]  }
 0x652   :  { %v4617_v63 = vpack.c.bf16 %v4605_v43, %v4604_v60  ;;  %v15262_v60 = vld [vmem:[%s19061_s4 + $0xd0] sm:$0xff]   ;;  %v15263_v43 = vld [vmem:[%s19061_s4 + $0xd8] sm:$0xff]  }
 0x653   :  { %v4616_v10 = vpack.c.bf16 %v4603_v30, %v4602_v49  ;;  %v15264_v49 = vld [vmem:[%s19061_s4 + $0xe0] sm:$0xff]   ;;  %v15265_v30 = vld [vmem:[%s19061_s4 + $0xe8] sm:$0xff]  }
 0x655   :  { %13390 = vmatprep.subr.bf16.mxu1 %v4616_v10 }
 0x656   :  { %13391 = vmatpush3.bf16.msra.mxu1 %v4616_v10  ;;  %v15267_v10 = vld [vmem:[%s19061_s4 + $0xf8] sm:$0xff]  }
 0x657   :  { %13392 = vmatprep.subr.bf16.mxu1 %v4617_v63 }
 0x65a   :  { %13393 = vmatpush3.bf16.msra.mxu1 %v4617_v63  ;;  %v15266_v63 = vld [vmem:[%s19061_s4 + $0xf0] sm:$0xff]  }
 0x65b   :  { %v13380_v34 = vpop.f32.mrb[8].mxu1 }
 0x65c   :  { %v4592_v37 = vadd.f32 %v13380_v34, %v11856_v4  ;;  %v4528_v40 = vpop.f32.mrb[9].mxu1  ;;  %v15268_v34 = vld [vmem:[%s19061_s4 + $0x100] sm:$0xff]  }
 0x65d   :  { %v4590_v44 = vadd.f32 %v11856_v4, %v4528_v40  ;;  %v13381_v3 = vpop.f32.mrb[10].mxu1  ;;  %v15270_v40 = vld [vmem:[%s19061_s4 + $0x110] sm:$0xff]  }
 0x65e   :  { %v4593_v47 = vadd.f32 %v13381_v3, %v11856_v4  ;;  %v4531_v28 = vpop.f32.mrb[11].mxu1  ;;  %v4608_v50 = vmax.f32 %v4592_v37, 0.0  ;;  %v15269_v37 = vld [vmem:[%s19061_s4 + $0x108] sm:$0xff]   ;;  %v15272_v3 = vld [vmem:[%s19061_s4 + $0x120] sm:$0xff]  }
 0x65f   :  { %v4591_v53 = vadd.f32 %v11856_v4, %v4531_v28  ;;  %v4606_v6 = vmax.f32 %v4590_v44, 0.0  ;;  %v15271_v44 = vld [vmem:[%s19061_s4 + $0x118] sm:$0xff]   ;;  %v15275_v28 = vld [vmem:[%s19061_s4 + $0x130] sm:$0xff]  }
 0x660   :  { %v4609_v55 = vmax.f32 %v4593_v47, 0.0  ;;  %v15273_v47 = vld [vmem:[%s19061_s4 + $0x128] sm:$0xff]  }
 0x661   :  { %v4607_v58 = vmax.f32 %v4591_v53, 0.0  ;;  %v15276_v53 = vld [vmem:[%s19061_s4 + $0x138] sm:$0xff]  }
 0x662   :  { %v4619_v56 = vpack.c.bf16 %v4609_v55, %v4608_v50  ;;  %v15277_v50 = vld [vmem:[%s19061_s4 + $0x140] sm:$0xff]   ;;  %v15278_v55 = vld [vmem:[%s19061_s4 + $0x148] sm:$0xff]  }
 0x663   :  { %v4618_v59 = vpack.c.bf16 %v4607_v58, %v4606_v6  ;;  %v15279_v6 = vld [vmem:[%s19061_s4 + $0x150] sm:$0xff]   ;;  %v17191_v58 = vld [vmem:[%s19062_s5] sm:$0xff]  }
 0x665   :  { %13394 = vmatprep.subr.bf16.mxu1 %v4618_v59 }
 0x666   :  { %13395 = vmatpush3.bf16.msra.mxu1 %v4618_v59  ;;  %v15281_v59 = vld [vmem:[%s19061_s4 + $0x160] sm:$0xff]  }
 0x667   :  { %13396 = vmatprep.subr.bf16.mxu1 %v4619_v56 }
 0x66a   :  { %13397 = vmatpush3.bf16.msra.mxu1 %v4619_v56  ;;  %v15280_v56 = vld [vmem:[%s19061_s4 + $0x158] sm:$0xff]  }
 0x66b   :  { %v13384_v9 = vpop.f32.mrb[12].mxu1 }
 0x66c   :  { %v4596_v61 = vadd.f32 %v13384_v9, %v11856_v4  ;;  %v4544_v2 = vpop.f32.mrb[13].mxu1  ;;  %v15282_v9 = vld [vmem:[%s19061_s4 + $0x168] sm:$0xff]  }
 0x66d   :  { %v4594_v5 = vadd.f32 %v11856_v4, %v4544_v2  ;;  %v13385_v36 = vpop.f32.mrb[14].mxu1  ;;  %v15284_v2 = vld [vmem:[%s19061_s4 + $0x178] sm:$0xff]  }
 0x66e   :  { %v4597_v8 = vadd.f32 %v13385_v36, %v11856_v4  ;;  %v4547_v13 = vpop.f32.mrb[15].mxu1  ;;  %v4612_v16 = vmax.f32 %v4596_v61, 0.0  ;;  %v15283_v61 = vld [vmem:[%s19061_s4 + $0x170] sm:$0xff]   ;;  %v15286_v36 = vld [vmem:[%s19061_s4 + $0x188] sm:$0xff]  }
 0x66f   :  { %v4595_v12 = vadd.f32 %v11856_v4, %v4547_v13  ;;  %v4610_v39 = vmax.f32 %v4594_v5, 0.0  ;;  %v15240_v4 = vld [vmem:[%s19061_s4 + $0x28] sm:$0xff]   ;;  %v15285_v5 = vld [vmem:[%s19061_s4 + $0x180] sm:$0xff]   ;;  %v15288_v13 = vld [vmem:[%s19061_s4 + $0x198] sm:$0xff]  }
 0x670   :  { %v4613_v62 = vmax.f32 %v4597_v8, 0.0  ;;  %v15287_v8 = vld [vmem:[%s19061_s4 + $0x190] sm:$0xff]  }
 0x671   :  { %v4611_v22 = vmax.f32 %v4595_v12, 0.0  ;;  %v15289_v12 = vld [vmem:[%s19061_s4 + $0x1a0] sm:$0xff]  }
 0x672   :  { %v4621_v15 = vpack.c.bf16 %v4613_v62, %v4612_v16  ;;  %v15290_v16 = vld [vmem:[%s19061_s4 + $0x1a8] sm:$0xff]   ;;  %v15291_v62 = vld [vmem:[%s19061_s4 + $0x1b0] sm:$0xff]  }
 0x673   :  { %v4620_v24 = vpack.c.bf16 %v4611_v22, %v4610_v39 }
 0x675   :  { %13398 = vmatprep.subr.bf16.mxu1 %v4620_v24 }
 0x676   :  { %13399 = vmatpush3.bf16.msra.mxu1 %v4620_v24 }
 0x677   :  { %13400 = vmatprep.subr.bf16.mxu1 %v4621_v15 }
 0x67a   :  { %13401 = vmatpush3.bf16.msra.mxu1 %v4621_v15  ;;  %v15292_v15 = vld [vmem:[%s19061_s4 + $0x1b8] sm:$0xff]  }
 0x67b   :  { %13546 = vmatprep.subr.bf16.mxu1 %v15236_v26 }
 0x67d   :  { %13403 = vmatmul.mubr.bf16.vlgmr.msra.gmra.mrb[16].mxu1 %v15235_v42 }
 0x67e   :  { %13547 = vmatpush3.bf16.msra.mxu1 %v15236_v26  ;;  %13406 = vmatprep.mubr.bf16.mxu1 %v15237_v29  ;;  %v15294_v26 = vld [vmem:[%s19061_s4 + $0x1c0] sm:$0xff]  }
 0x67f   :  { %13548 = vmatprep.subr.bf16.mxu1 %v15255_v18 }
 0x682   :  { %13549 = vmatpush3.bf16.msra.mxu1 %v15255_v18 }
 0x683   :  { %13550 = vmatprep.subr.bf16.mxu1 %v15274_v7 }
 0x685   :  { %13407 = vmatmul.mubr.bf16.gmra.mrb[20].mxu1 %v15238_v33 }
 0x686   :  { %13410 = vmatprep.mubr.bf16.mxu1 %v15239_v1  ;;  %13551 = vmatpush3.bf16.msra.mxu1 %v15274_v7  ;;  %v15296_v7 = vld [vmem:[%s19061_s4 + $0x1d0] sm:$0xff]  }
 0x687   :  { %13552 = vmatprep.subr.bf16.mxu1 %v15293_v41 }
 0x68a   :  { %13553 = vmatpush3.bf16.msra.mxu1 %v15293_v41 }
 0x68b   :  { %13570 = vmatprep.subr.bf16.mxu1 %v17191_v58 }
 0x68d   :  { %13411 = vmatmul.mubr.bf16.gmra.mrb[24].mxu1 %v15240_v4  ;;  %v15295_v4 = vld [vmem:[%s19061_s4 + $0x1c8] sm:$0xff]  }
 0x68e   :  { %13414 = vmatprep.mubr.bf16.mxu1 %v15241_v45 }
 0x695   :  { %13415 = vmatmul.mubr.bf16.gmra.mrb[28].mxu1 %v15242_v38 }
 0x696   :  { %13418 = vmatprep.mubr.bf16.mxu1 %v15243_v46 }
 0x69d   :  { %13419 = vmatmul.mubr.bf16.gmra.mrb[32].mxu1 %v15244_v48 }
 0x69e   :  { %13422 = vmatprep.mubr.bf16.mxu1 %v15245_v52 }
 0x6a5   :  { %13423 = vmatmul.mubr.bf16.gmra.mrb[36].mxu1 %v15246_v11 }
 0x6a6   :  { %13426 = vmatprep.mubr.bf16.mxu1 %v15247_v14  ;;  %v15297_v14 = vld [vmem:[%s19061_s4 + $0x1d8] sm:$0xff]  }
 0x6ad   :  { %13427 = vmatmul.mubr.bf16.gmra.mrb[40].mxu1 %v15248_v17 }
 0x6ae   :  { %13430 = vmatprep.mubr.bf16.mxu1 %v15249_v51  ;;  %v15298_v51 = vld [vmem:[%s19061_s4 + $0x1e0] sm:$0xff]  }
 0x6b5   :  { %13431 = vmatmul.mubr.bf16.gmra.mrb[44].mxu1 %v15250_v19 }
 0x6b6   :  { %13434 = vmatprep.mubr.bf16.mxu1 %v15251_v20 }
 0x6bd   :  { %13435 = vmatmul.mubr.bf16.gmra.mrb[48].mxu1 %v15252_v21 }
 0x6be   :  { %13438 = vmatprep.mubr.bf16.mxu1 %v15253_v54 }
 0x6c5   :  { %13439 = vmatmul.mubr.bf16.gmra.mrb[52].mxu1 %v15254_v23 }
 0x6c6   :  { %13442 = vmatprep.mubr.bf16.mxu1 %v15256_v25  ;;  %v15299_v25 = vld [vmem:[%s19061_s4 + $0x1e8] sm:$0xff]  }
 0x6cd   :  { %13443 = vmatmul.mubr.bf16.gmra.mrb[56].mxu1 %v15257_v27 }
 0x6ce   :  { %13446 = vmatprep.mubr.bf16.mxu1 %v15258_v32  ;;  %v15300_v32 = vld [vmem:[%s19061_s4 + $0x1f0] sm:$0xff]  }
 0x6d5   :  { %13447 = vmatmul.mubr.bf16.gmra.mrb[60].mxu1 %v15259_v57 }
 0x6d6   :  { %13450 = vmatprep.mubr.bf16.mxu1 %v15260_v35 }
 0x6dd   :  { %13451 = vmatmul.mubr.bf16.gmra.mrb[64].mxu1 %v15261_v31 }
 0x6de   :  { %13454 = vmatprep.mubr.bf16.mxu1 %v15262_v60 }
 0x6e5   :  { %13455 = vmatmul.mubr.bf16.gmra.mrb[68].mxu1 %v15263_v43  ;;  %v15301_v43 = vld [vmem:[%s19061_s4 + $0x1f8] sm:$0xff]  }
 0x6e6   :  { %13458 = vmatprep.mubr.bf16.mxu1 %v15264_v49 }
 0x6ed   :  { %13459 = vmatmul.mubr.bf16.gmra.mrb[72].mxu1 %v15265_v30  ;;  %v15302_v30 = vld [vmem:[%s19061_s4 + $0x200] sm:$0xff]  }
 0x6ee   :  { %13462 = vmatprep.mubr.bf16.mxu1 %v15266_v63 }
 0x6f5   :  { %13463 = vmatmul.mubr.bf16.gmra.mrb[76].mxu1 %v15267_v10 }
 0x6f6   :  { %13466 = vmatprep.mubr.bf16.mxu1 %v15268_v34 }
 0x6fd   :  { %13467 = vmatmul.mubr.bf16.gmra.mrb[80].mxu1 %v15269_v37 }
 0x6fe   :  { %13470 = vmatprep.mubr.bf16.mxu1 %v15270_v40 }
 0x705   :  { %13471 = vmatmul.mubr.bf16.gmra.mrb[84].mxu1 %v15271_v44  ;;  %v15303_v44 = vld [vmem:[%s19061_s4 + $0x208] sm:$0xff]  }
 0x706   :  { %13474 = vmatprep.mubr.bf16.mxu1 %v15272_v3 }
 0x70d   :  { %13475 = vmatmul.mubr.bf16.gmra.mrb[88].mxu1 %v15273_v47  ;;  %v15304_v47 = vld [vmem:[%s19061_s4 + $0x210] sm:$0xff]  }
 0x70e   :  { %13478 = vmatprep.mubr.bf16.mxu1 %v15275_v28 }
 0x715   :  { %13479 = vmatmul.mubr.bf16.gmra.mrb[92].mxu1 %v15276_v53 }
 0x716   :  { %13482 = vmatprep.mubr.bf16.mxu1 %v15277_v50 }
 0x71d   :  { %13483 = vmatmul.mubr.bf16.gmra.mrb[96].mxu1 %v15278_v55 }
 0x71e   :  { %13486 = vmatprep.mubr.bf16.mxu1 %v15279_v6 }
 0x725   :  { %13487 = vmatmul.mubr.bf16.gmra.mrb[100].mxu1 %v15280_v56  ;;  %v15305_v56 = vld [vmem:[%s19061_s4 + $0x218] sm:$0xff]  }
 0x726   :  { %13490 = vmatprep.mubr.bf16.mxu1 %v15281_v59 }
 0x72d   :  { %13491 = vmatmul.mubr.bf16.gmra.mrb[104].mxu1 %v15282_v9  ;;  %v15306_v9 = vld [vmem:[%s19061_s4 + $0x220] sm:$0xff]  }
 0x72e   :  { %13494 = vmatprep.mubr.bf16.mxu1 %v15283_v61 }
 0x735   :  { %13495 = vmatmul.mubr.bf16.gmra.mrb[108].mxu1 %v15284_v2 }
 0x736   :  { %13498 = vmatprep.mubr.bf16.mxu1 %v15285_v5 }
 0x73d   :  { %13499 = vmatmul.mubr.bf16.gmra.mrb[112].mxu1 %v15286_v36 }
 0x73e   :  { %13502 = vmatprep.mubr.bf16.mxu1 %v15287_v8 }
 0x745   :  { %13503 = vmatmul.mubr.bf16.gmra.mrb[116].mxu1 %v15288_v13  ;;  %v15307_v13 = vld [vmem:[%s19061_s4 + $0x228] sm:$0xff]  }
 0x746   :  { %13506 = vmatprep.mubr.bf16.mxu1 %v15289_v12 }
 0x74d   :  { %13507 = vmatmul.mubr.bf16.gmra.mrb[120].mxu1 %v15290_v16  ;;  %v15308_v16 = vld [vmem:[%s19061_s4 + $0x230] sm:$0xff]  }
 0x74e   :  { %13510 = vmatprep.mubr.bf16.mxu1 %v15291_v62 }
 0x750   :  { %v17230_v39 = vpop.f32.mrb[16].mxu1 }
 0x751   :  { %v17232_v22 = vpop.f32.mrb[17].mxu1 }
 0x752   :  { %v17237_v24 = vpop.f32.mrb[18].mxu1 }
 0x753   :  { %v5808_v42 = vpack.c.bf16 %v17237_v24, %v17230_v39  ;;  %v17244_v29 = vpop.f32.mrb[19].mxu1 }
 0x754   :  { %v5807_v18 = vpack.c.bf16 %v17244_v29, %v17232_v22  ;;  %v15316_v29 = vld [vmem:[%s19062_s5 + $0x50] sm:$0xff]  }
 0x755   :  { %13511 = vmatmul.mubr.bf16.gmra.mrb[124].mxu1 %v15292_v15 }
 0x756   :  { %13514 = vmatprep.mubr.bf16.mxu1 %v15294_v26 }
 0x758   :  { %v17248_v33 = vpop.f32.mrb[20].mxu1 }
 0x759   :  { %v17250_v1 = vpop.f32.mrb[21].mxu1 }
 0x75a   :  { %v17255_v45 = vpop.f32.mrb[22].mxu1 }
 0x75b   :  { %v5810_v38 = vpack.c.bf16 %v17255_v45, %v17248_v33  ;;  %v17262_v46 = vpop.f32.mrb[23].mxu1 }
 0x75c   :  { %v5809_v48 = vpack.c.bf16 %v17262_v46, %v17250_v1  ;;  %v15318_v46 = vld [vmem:[%s19062_s5 + $0x60] sm:$0xff]  }
 0x75d   :  { %13515 = vmatmul.mubr.bf16.gmra.mrb[128].mxu1 %v15295_v4 }
 0x75e   :  { %13518 = vmatprep.mubr.bf16.mxu1 %v15296_v7 }
 0x760   :  { %v17266_v52 = vpop.f32.mrb[24].mxu1 }
 0x761   :  { %v17268_v11 = vpop.f32.mrb[25].mxu1 }
 0x762   :  { %v17273_v17 = vpop.f32.mrb[26].mxu1 }
 0x763   :  { %v5812_v19 = vpack.c.bf16 %v17273_v17, %v17266_v52  ;;  %v17280_v20 = vpop.f32.mrb[27].mxu1 }
 0x764   :  { %v5811_v21 = vpack.c.bf16 %v17280_v20, %v17268_v11 }
 0x765   :  { %13519 = vmatmul.mubr.bf16.gmra.mrb[132].mxu1 %v15297_v14  ;;  %v15309_v14 = vld [vmem:[%s19061_s4 + $0x238] sm:$0xff]  }
 0x766   :  { %13522 = vmatprep.mubr.bf16.mxu1 %v15298_v51 }
 0x768   :  { %v17284_v54 = vpop.f32.mrb[28].mxu1 }
 0x769   :  { %v17286_v23 = vpop.f32.mrb[29].mxu1 }
 0x76a   :  { %v17291_v27 = vpop.f32.mrb[30].mxu1 }
 0x76b   :  { %v5814_v57 = vpack.c.bf16 %v17291_v27, %v17284_v54  ;;  %v17298_v35 = vpop.f32.mrb[31].mxu1  ;;  %v15319_v54 = vld [vmem:[%s19062_s5 + $0x68] sm:$0xff]  }
 0x76c   :  { %v5813_v41 = vpack.c.bf16 %v17298_v35, %v17286_v23 }
 0x76d   :  { %13523 = vmatmul.mubr.bf16.gmra.mrb[136].mxu1 %v15299_v25 }
 0x76e   :  { %13526 = vmatprep.mubr.bf16.mxu1 %v15300_v32 }
 0x770   :  { %v13420_v31 = vpop.f32.mrb[32].mxu1 }
 0x771   :  { %v5296_v60 = vpop.f32.mrb[33].mxu1 }
 0x772   :  { %v13421_v49 = vpop.f32.mrb[34].mxu1 }
 0x773   :  { %v5816_v63 = vpack.c.bf16 %v13421_v49, %v13420_v31  ;;  %v5299_v10 = vpop.f32.mrb[35].mxu1 }
 0x774   :  { %v5815_v34 = vpack.c.bf16 %v5299_v10, %v5296_v60 }
 0x775   :  { %13527 = vmatmul.mubr.bf16.gmra.mrb[140].mxu1 %v15301_v43 }
 0x776   :  { %13530 = vmatprep.mubr.bf16.mxu1 %v15302_v30 }
 0x778   :  { %v13424_v37 = vpop.f32.mrb[36].mxu1 }
 0x779   :  { %v5312_v40 = vpop.f32.mrb[37].mxu1 }
 0x77a   :  { %v13425_v3 = vpop.f32.mrb[38].mxu1 }
 0x77b   :  { %v5818_v28 = vpack.c.bf16 %v13425_v3, %v13424_v37  ;;  %v5315_v53 = vpop.f32.mrb[39].mxu1  ;;  %v15311_v37 = vld [vmem:[%s19062_s5 + $0x8] sm:$0xff]  }
 0x77c   :  { %v5817_v50 = vpack.c.bf16 %v5315_v53, %v5312_v40 }
 0x77d   :  { %13531 = vmatmul.mubr.bf16.gmra.mrb[144].mxu1 %v15303_v44 }
 0x77e   :  { %13534 = vmatprep.mubr.bf16.mxu1 %v15304_v47 }
 0x780   :  { %v17314_v55 = vpop.f32.mrb[40].mxu1 }
 0x781   :  { %v5328_v6 = vpop.f32.mrb[41].mxu1 }
 0x782   :  { %v13429_v59 = vpop.f32.mrb[42].mxu1 }
 0x783   :  { %v5820_v61 = vpack.c.bf16 %v13429_v59, %v17314_v55  ;;  %v5331_v2 = vpop.f32.mrb[43].mxu1  ;;  %v15314_v55 = vld [vmem:[%s19062_s5 + $0x40] sm:$0xff]  }
 0x784   :  { %v5819_v5 = vpack.c.bf16 %v5331_v2, %v5328_v6 }
 0x785   :  { %13535 = vmatmul.mubr.bf16.gmra.mrb[148].mxu1 %v15305_v56 }
 0x786   :  { %13538 = vmatprep.mubr.bf16.mxu1 %v15306_v9 }
 0x788   :  { %v17323_v36 = vpop.f32.mrb[44].mxu1 }
 0x789   :  { %v5344_v8 = vpop.f32.mrb[45].mxu1 }
 0x78a   :  { %v13433_v12 = vpop.f32.mrb[46].mxu1 }
 0x78b   :  { %v5822_v62 = vpack.c.bf16 %v13433_v12, %v17323_v36  ;;  %v5347_v15 = vpop.f32.mrb[47].mxu1 }
 0x78c   :  { %v5821_v26 = vpack.c.bf16 %v5347_v15, %v5344_v8 }
 0x78d   :  { %13539 = vmatmul.mubr.bf16.gmra.mrb[152].mxu1 %v15307_v13 }
 0x78e   :  { %13542 = vmatprep.mubr.bf16.mxu1 %v15308_v16 }
 0x790   :  { %v17332_v4 = vpop.f32.mrb[48].mxu1 }
 0x791   :  { %v17334_v7 = vpop.f32.mrb[49].mxu1 }
 0x792   :  { %v17339_v51 = vpop.f32.mrb[50].mxu1 }
 0x793   :  { %v5824_v25 = vpack.c.bf16 %v17339_v51, %v17332_v4  ;;  %v17343_v32 = vpop.f32.mrb[51].mxu1 }
 0x794   :  { %v5823_v31 = vpack.c.bf16 %v17343_v32, %v17334_v7 }
 0x795   :  { %13543 = vmatmul.mubr.bf16.gmra.mrb[156].mxu1 %v15309_v14 }
 0x796   :  { %13554 = vmatprep.mubr.msk.bf16.mxu1 %vm5920_vm2, %v5815_v34  ;;  %v15312_v34 = vld [vmem:[%s19062_s5 + $0x10] sm:$0xff]  }
 0x798   :  { %v17348_v60 = vpop.f32.mrb[52].mxu1 }
 0x799   :  { %v17350_v43 = vpop.f32.mrb[53].mxu1 }
 0x79a   :  { %v17352_v49 = vpop.f32.mrb[54].mxu1 }
 0x79b   :  { %v5826_v30 = vpack.c.bf16 %v17352_v49, %v17348_v60  ;;  %v17356_v10 = vpop.f32.mrb[55].mxu1 }
 0x79c   :  { %v5825_v40 = vpack.c.bf16 %v17356_v10, %v17350_v43  ;;  %v15322_v10 = vld [vmem:[%s19062_s5 + $0x80] sm:$0xff]  }
 0x79d   :  { %13555 = vmatmul.mubr.msk.bf16.vlgmr.msra.gmra.mrb[160].mxu1 %vm5920_vm2, %v5816_v63 }
 0x79e   :  { %13558 = vmatprep.mubr.msk.bf16.mxu1 %vm5920_vm2, %v5817_v50  ;;  %13571 = vmatpush3.bf16.msra.mxu1 %v17191_v58  ;;  %v15313_v58 = vld [vmem:[%s19062_s5 + $0x18] sm:$0xff]  }
 0x79f   :  { %13572 = vmatprep.subr.bf16.mxu1 %v15311_v37 }
 0x7a0   :  { %v17369_v44 = vpop.f32.mrb[56].mxu1 }
 0x7a1   :  { %v17371_v3 = vpop.f32.mrb[57].mxu1 }
 0x7a2   :  { %v17373_v47 = vpop.f32.mrb[58].mxu1  ;;  %13573 = vmatpush3.bf16.msra.mxu1 %v15311_v37 }
 0x7a3   :  { %v5828_v53 = vpack.c.bf16 %v17373_v47, %v17369_v44  ;;  %v17377_v63 = vpop.f32.mrb[59].mxu1  ;;  %13574 = vmatprep.subr.bf16.mxu1 %v15312_v34 }
 0x7a4   :  { %v5827_v50 = vpack.c.bf16 %v17377_v63, %v17371_v3 }
 0x7a5   :  { %13559 = vmatmul.mubr.msk.bf16.gmra.mrb[164].mxu1 %vm5920_vm2, %v5818_v28 }
 0x7a6   :  { %13562 = vmatprep.mubr.msk.bf16.mxu1 %vm5920_vm2, %v5819_v5  ;;  %13575 = vmatpush3.bf16.msra.mxu1 %v15312_v34 }
 0x7a7   :  { %13576 = vmatprep.subr.bf16.mxu1 %v15313_v58 }
 0x7a8   :  { %v17389_v6 = vpop.f32.mrb[60].mxu1 }
 0x7a9   :  { %v17391_v56 = vpop.f32.mrb[61].mxu1 }
 0x7aa   :  { %v17393_v59 = vpop.f32.mrb[62].mxu1  ;;  %13577 = vmatpush3.bf16.msra.mxu1 %v15313_v58 }
 0x7ab   :  { %v5830_v9 = vpack.c.bf16 %v17393_v59, %v17389_v6  ;;  %v17397_v2 = vpop.f32.mrb[63].mxu1  ;;  %13594 = vmatprep.subr.bf16.mxu1 %v15314_v55  ;;  %v15323_v6 = vld [vmem:[%s19062_s5 + $0x88] sm:$0xff]  }
 0x7ac   :  { %v5829_v28 = vpack.c.bf16 %v17397_v2, %v17391_v56 }
 0x7ad   :  { %13563 = vmatmul.mubr.msk.bf16.gmra.mrb[168].mxu1 %vm5920_vm2, %v5820_v61 }
 0x7ae   :  { %13566 = vmatprep.mubr.msk.bf16.mxu1 %vm5920_vm2, %v5821_v26 }
 0x7b0   :  { %v17403_v5 = vpop.f32.mrb[64].mxu1 }
 0x7b1   :  { %v17405_v36 = vpop.f32.mrb[65].mxu1 }
 0x7b2   :  { %v17407_v8 = vpop.f32.mrb[66].mxu1 }
 0x7b3   :  { %v5832_v13 = vpack.c.bf16 %v17407_v8, %v17403_v5  ;;  %v17411_v12 = vpop.f32.mrb[67].mxu1 }
 0x7b4   :  { %v5831_v16 = vpack.c.bf16 %v17411_v12, %v17405_v36 }
 0x7b5   :  { %13567 = vmatmul.mubr.msk.bf16.gmra.mrb[172].mxu1 %vm5920_vm2, %v5822_v62  ;;  %v15315_v62 = vld [vmem:[%s19062_s5 + $0x48] sm:$0xff]  }
 0x7b6   :  { %13578 = vmatprep.mubr.msk.bf16.mxu1 %vm5920_vm2, %v5807_v18 }
 0x7b8   :  { %v17420_v61 = vpop.f32.mrb[68].mxu1 }
 0x7b9   :  { %v17422_v15 = vpop.f32.mrb[69].mxu1 }
 0x7ba   :  { %v17424_v26 = vpop.f32.mrb[70].mxu1 }
 0x7bb   :  { %v5834_v14 = vpack.c.bf16 %v17424_v26, %v17420_v61  ;;  %v17428_v37 = vpop.f32.mrb[71].mxu1 }
 0x7bc   :  { %v5833_v22 = vpack.c.bf16 %v17428_v37, %v17422_v15  ;;  %v15326_v37 = vld [vmem:[%s19062_s5 + $0xa0] sm:$0xff]  }
 0x7bd   :  { %13579 = vmatmul.mubr.msk.bf16.vlgmr.msra.gmra.mrb[160].mxu1 %vm5920_vm2, %v5808_v42  ;;  %v15317_v42 = vld [vmem:[%s19062_s5 + $0x58] sm:$0xff]  }
 0x7be   :  { %13582 = vmatprep.mubr.msk.bf16.mxu1 %vm5920_vm2, %v5809_v48  ;;  %13595 = vmatpush3.bf16.msra.mxu1 %v15314_v55 }
 0x7bf   :  { %13596 = vmatprep.subr.bf16.mxu1 %v15315_v62 }
 0x7c0   :  { %v17446_v18 = vpop.f32.mrb[72].mxu1 }
 0x7c1   :  { %v17448_v34 = vpop.f32.mrb[73].mxu1 }
 0x7c2   :  { %v17450_v58 = vpop.f32.mrb[74].mxu1  ;;  %13597 = vmatpush3.bf16.msra.mxu1 %v15315_v62 }
 0x7c3   :  { %v5836_v39 = vpack.c.bf16 %v17450_v58, %v17446_v18  ;;  %v17454_v24 = vpop.f32.mrb[75].mxu1  ;;  %13598 = vmatprep.subr.bf16.mxu1 %v15316_v29 }
 0x7c4   :  { %v5835_v1 = vpack.c.bf16 %v17454_v24, %v17448_v34 }
 0x7c5   :  { %13583 = vmatmul.mubr.msk.bf16.gmra.mrb[164].mxu1 %vm5920_vm2, %v5810_v38 }
 0x7c6   :  { %13586 = vmatprep.mubr.msk.bf16.mxu1 %vm5920_vm2, %v5811_v21  ;;  %13599 = vmatpush3.bf16.msra.mxu1 %v15316_v29 }
 0x7c7   :  { %13600 = vmatprep.subr.bf16.mxu1 %v15317_v42 }
 0x7c8   :  { %v17472_v48 = vpop.f32.mrb[76].mxu1 }
 0x7c9   :  { %v17474_v55 = vpop.f32.mrb[77].mxu1 }
 0x7ca   :  { %v17476_v62 = vpop.f32.mrb[78].mxu1  ;;  %13601 = vmatpush3.bf16.msra.mxu1 %v15317_v42 }
 0x7cb   :  { %v5838_v33 = vpack.c.bf16 %v17476_v62, %v17472_v48  ;;  %v17480_v45 = vpop.f32.mrb[79].mxu1  ;;  %13618 = vmatprep.subr.bf16.mxu1 %v15318_v46  ;;  %v15327_v48 = vld [vmem:[%s19062_s5 + $0xa8] sm:$0xff]  }
 0x7cc   :  { %v5837_v38 = vpack.c.bf16 %v17480_v45, %v17474_v55 }
 0x7cd   :  { %13587 = vmatmul.mubr.msk.bf16.gmra.mrb[168].mxu1 %vm5920_vm2, %v5812_v19 }
 0x7ce   :  { %13590 = vmatprep.mubr.msk.bf16.mxu1 %vm5920_vm2, %v5813_v41 }
 0x7d0   :  { %v17492_v11 = vpop.f32.mrb[80].mxu1 }
 0x7d1   :  { %v17494_v20 = vpop.f32.mrb[81].mxu1 }
 0x7d2   :  { %v17496_v21 = vpop.f32.mrb[82].mxu1 }
 0x7d3   :  { %v5840_v29 = vpack.c.bf16 %v17496_v21, %v17492_v11  ;;  %v17500_v42 = vpop.f32.mrb[83].mxu1 }
 0x7d4   :  { %v5839_v52 = vpack.c.bf16 %v17500_v42, %v17494_v20  ;;  %v15342_v20 = vld [vmem:[%s19064_s8 + $0x20] sm:$0xff]  }
 0x7d5   :  { %13591 = vmatmul.mubr.msk.bf16.gmra.mrb[172].mxu1 %vm5920_vm2, %v5814_v57  ;;  %v15320_v57 = vld [vmem:[%s19062_s5 + $0x70] sm:$0xff]   ;;  %13814 = vmatprep.subr.bf16.mxu0 %v15342_v20 }
 0x7d6   :  { %13602 = vmatprep.mubr.msk.bf16.mxu1 %vm5920_vm2, %v5823_v31  ;;  %13815 = vmatpush3.bf16.msra.mxu0 %v15342_v20 }
 0x7d8   :  { %v17512_v17 = vpop.f32.mrb[84].mxu1 }
 0x7d9   :  { %v17514_v19 = vpop.f32.mrb[85].mxu1 }
 0x7da   :  { %v17516_v23 = vpop.f32.mrb[86].mxu1 }
 0x7db   :  { %v5842_v35 = vpack.c.bf16 %v17516_v23, %v17512_v17  ;;  %v17520_v41 = vpop.f32.mrb[87].mxu1 }
 0x7dc   :  { %v5841_v27 = vpack.c.bf16 %v17520_v41, %v17514_v19  ;;  %v15329_v19 = vld [vmem:[%s19062_s5 + $0xb8] sm:$0xff]  }
 0x7dd   :  { %13603 = vmatmul.mubr.msk.bf16.vlgmr.msra.gmra.mrb[160].mxu1 %vm5920_vm2, %v5824_v25  ;;  %v15321_v25 = vld [vmem:[%s19062_s5 + $0x78] sm:$0xff]  }
 0x7de   :  { %13606 = vmatprep.mubr.msk.bf16.mxu1 %vm5920_vm2, %v5825_v40  ;;  %13619 = vmatpush3.bf16.msra.mxu1 %v15318_v46 }
 0x7df   :  { %13620 = vmatprep.subr.bf16.mxu1 %v15319_v54 }
 0x7e0   :  { %v17538_v7 = vpop.f32.mrb[88].mxu1 }
 0x7e1   :  { %v17540_v32 = vpop.f32.mrb[89].mxu1 }
 0x7e2   :  { %v17542_v31 = vpop.f32.mrb[90].mxu1  ;;  %13621 = vmatpush3.bf16.msra.mxu1 %v15319_v54 }
 0x7e3   :  { %v5844_v4 = vpack.c.bf16 %v17542_v31, %v17538_v7  ;;  %v17546_v51 = vpop.f32.mrb[91].mxu1  ;;  %13622 = vmatprep.subr.bf16.mxu1 %v15320_v57  ;;  %v15343_v31 = vld [vmem:[%s19064_s8 + $0x28] sm:$0xff]  }
 0x7e4   :  { %v5843_v43 = vpack.c.bf16 %v17546_v51, %v17540_v32  ;;  %13816 = vmatprep.subr.bf16.mxu0 %v15343_v31 }
 0x7e5   :  { %13607 = vmatmul.mubr.msk.bf16.gmra.mrb[164].mxu1 %vm5920_vm2, %v5826_v30  ;;  %13817 = vmatpush3.bf16.msra.mxu0 %v15343_v31 }
 0x7e6   :  { %13610 = vmatprep.mubr.msk.bf16.mxu1 %vm5920_vm2, %v5827_v50  ;;  %13623 = vmatpush3.bf16.msra.mxu1 %v15320_v57 }
 0x7e7   :  { %13624 = vmatprep.subr.bf16.mxu1 %v15321_v25 }
 0x7e8   :  { %v17564_v40 = vpop.f32.mrb[92].mxu1 }
 0x7e9   :  { %v17566_v46 = vpop.f32.mrb[93].mxu1 }
 0x7ea   :  { %v17568_v54 = vpop.f32.mrb[94].mxu1  ;;  %13625 = vmatpush3.bf16.msra.mxu1 %v15321_v25 }
 0x7eb   :  { %v5846_v60 = vpack.c.bf16 %v17568_v54, %v17564_v40  ;;  %v17572_v49 = vpop.f32.mrb[95].mxu1  ;;  %13642 = vmatprep.subr.bf16.mxu1 %v15322_v10 }
 0x7ec   :  { %v5845_v30 = vpack.c.bf16 %v17572_v49, %v17566_v46 }
 0x7ed   :  { %13611 = vmatmul.mubr.msk.bf16.gmra.mrb[168].mxu1 %vm5920_vm2, %v5828_v53 }
 0x7ee   :  { %13614 = vmatprep.mubr.msk.bf16.mxu1 %vm5920_vm2, %v5829_v28 }
 0x7f0   :  { %v17584_v3 = vpop.f32.mrb[96].mxu1 }
 0x7f1   :  { %v17586_v63 = vpop.f32.mrb[97].mxu1 }
 0x7f2   :  { %v17588_v50 = vpop.f32.mrb[98].mxu1 }
 0x7f3   :  { %v5848_v57 = vpack.c.bf16 %v17588_v50, %v17584_v3  ;;  %v17592_v25 = vpop.f32.mrb[99].mxu1 }
 0x7f4   :  { %v5847_v44 = vpack.c.bf16 %v17592_v25, %v17586_v63  ;;  %v15332_v63 = vld [vmem:[%s19062_s5 + $0xd0] sm:$0xff]  }
 0x7f5   :  { %13615 = vmatmul.mubr.msk.bf16.gmra.mrb[172].mxu1 %vm5920_vm2, %v5830_v9  ;;  %v15324_v9 = vld [vmem:[%s19062_s5 + $0x90] sm:$0xff]  }
 0x7f6   :  { %13626 = vmatprep.mubr.msk.bf16.mxu1 %vm5920_vm2, %v5831_v16 }
 0x7f8   :  { %v17604_v47 = vpop.f32.mrb[100].mxu1 }
 0x7f9   :  { %v17606_v53 = vpop.f32.mrb[101].mxu1 }
 0x7fa   :  { %v17608_v56 = vpop.f32.mrb[102].mxu1 }
 0x7fb   :  { %v5850_v2 = vpack.c.bf16 %v17608_v56, %v17604_v47  ;;  %v17612_v28 = vpop.f32.mrb[103].mxu1 }
 0x7fc   :  { %v5849_v59 = vpack.c.bf16 %v17612_v28, %v17606_v53  ;;  %v15334_v28 = vld [vmem:[%s19062_s5 + $0xe0] sm:$0xff]  }
 0x7fd   :  { %13627 = vmatmul.mubr.msk.bf16.vlgmr.msra.gmra.mrb[160].mxu1 %vm5920_vm2, %v5832_v13  ;;  %v15325_v13 = vld [vmem:[%s19062_s5 + $0x98] sm:$0xff]  }
 0x7fe   :  { %13630 = vmatprep.mubr.msk.bf16.mxu1 %vm5920_vm2, %v5833_v22  ;;  %13643 = vmatpush3.bf16.msra.mxu1 %v15322_v10 }
 0x7ff   :  { %13644 = vmatprep.subr.bf16.mxu1 %v15323_v6 }
 0x800   :  { %v17630_v36 = vpop.f32.mrb[104].mxu1 }
 0x801   :  { %v17632_v12 = vpop.f32.mrb[105].mxu1 }
 0x802   :  { %v17634_v16 = vpop.f32.mrb[106].mxu1  ;;  %13645 = vmatpush3.bf16.msra.mxu1 %v15323_v6 }
 0x803   :  { %v5852_v5 = vpack.c.bf16 %v17634_v16, %v17630_v36  ;;  %v17638_v8 = vpop.f32.mrb[107].mxu1  ;;  %13646 = vmatprep.subr.bf16.mxu1 %v15324_v9 }
 0x804   :  { %v5851_v15 = vpack.c.bf16 %v17638_v8, %v17632_v12 }
 0x805   :  { %13631 = vmatmul.mubr.msk.bf16.gmra.mrb[164].mxu1 %vm5920_vm2, %v5834_v14 }
 0x806   :  { %13634 = vmatprep.mubr.msk.bf16.mxu1 %vm5920_vm2, %v5835_v1  ;;  %13647 = vmatpush3.bf16.msra.mxu1 %v15324_v9 }
 0x807   :  { %13648 = vmatprep.subr.bf16.mxu1 %v15325_v13 }
 0x808   :  { %v17656_v22 = vpop.f32.mrb[108].mxu1 }
 0x809   :  { %v17658_v10 = vpop.f32.mrb[109].mxu1 }
 0x80a   :  { %v17660_v6 = vpop.f32.mrb[110].mxu1  ;;  %13649 = vmatpush3.bf16.msra.mxu1 %v15325_v13 }
 0x80b   :  { %v5854_v61 = vpack.c.bf16 %v17660_v6, %v17656_v22  ;;  %v17664_v26 = vpop.f32.mrb[111].mxu1  ;;  %13666 = vmatprep.subr.bf16.mxu1 %v15326_v37  ;;  %v15336_v22 = vld [vmem:[%s19062_s5 + $0xf0] sm:$0xff]  }
 0x80c   :  { %v5853_v14 = vpack.c.bf16 %v17664_v26, %v17658_v10 }
 0x80d   :  { %13635 = vmatmul.mubr.msk.bf16.gmra.mrb[168].mxu1 %vm5920_vm2, %v5836_v39 }
 0x80e   :  { %13638 = vmatprep.mubr.msk.bf16.mxu1 %vm5920_vm2, %v5837_v38 }
 0x810   :  { %v17676_v34 = vpop.f32.mrb[112].mxu1 }
 0x811   :  { %v17678_v24 = vpop.f32.mrb[113].mxu1 }
 0x812   :  { %v17680_v1 = vpop.f32.mrb[114].mxu1 }
 0x813   :  { %v5856_v9 = vpack.c.bf16 %v17680_v1, %v17676_v34  ;;  %v17684_v13 = vpop.f32.mrb[115].mxu1  ;;  %v15337_v34 = vld [vmem:[%s19062_s5 + $0xf8] sm:$0xff]  }
 0x814   :  { %v5855_v18 = vpack.c.bf16 %v17684_v13, %v17678_v24 }
 0x815   :  { %13639 = vmatmul.mubr.msk.bf16.gmra.mrb[172].mxu1 %vm5920_vm2, %v5838_v33  ;;  %v15328_v33 = vld [vmem:[%s19062_s5 + $0xb0] sm:$0xff]  }
 0x816   :  { %13650 = vmatprep.mubr.msk.bf16.mxu1 %vm5920_vm2, %v5839_v52 }
 0x818   :  { %v17696_v58 = vpop.f32.mrb[116].mxu1 }
 0x819   :  { %v17698_v39 = vpop.f32.mrb[117].mxu1 }
 0x81a   :  { %v17700_v55 = vpop.f32.mrb[118].mxu1 }
 0x81b   :  { %v5858_v45 = vpack.c.bf16 %v17700_v55, %v17696_v58  ;;  %v17704_v38 = vpop.f32.mrb[119].mxu1  ;;  %v15339_v55 = vld [vmem:[%s19062_s5 + $0x108] sm:$0xff]  }
 0x81c   :  { %v5857_v62 = vpack.c.bf16 %v17704_v38, %v17698_v39 }
 0x81d   :  { %13651 = vmatmul.mubr.msk.bf16.vlgmr.msra.gmra.mrb[160].mxu1 %vm5920_vm2, %v5840_v29 }
 0x81e   :  { %13654 = vmatprep.mubr.msk.bf16.mxu1 %vm5920_vm2, %v5841_v27  ;;  %13667 = vmatpush3.bf16.msra.mxu1 %v15326_v37  ;;  %v15330_v27 = vld [vmem:[%s19062_s5 + $0xc0] sm:$0xff]  }
 0x81f   :  { %13668 = vmatprep.subr.bf16.mxu1 %v15327_v48 }
 0x820   :  { %v17725_v42 = vpop.f32.mrb[120].mxu1 }
 0x821   :  { %v17727_v11 = vpop.f32.mrb[121].mxu1 }
 0x822   :  { %v17729_v21 = vpop.f32.mrb[122].mxu1  ;;  %13669 = vmatpush3.bf16.msra.mxu1 %v15327_v48 }
 0x823   :  { %v5860_v29 = vpack.c.bf16 %v17729_v21, %v17725_v42  ;;  %v17733_v52 = vpop.f32.mrb[123].mxu1  ;;  %13670 = vmatprep.subr.bf16.mxu1 %v15328_v33  ;;  %v15341_v42 = vld [vmem:[%s19062_s5 + $0x118] sm:$0xff]  }
 0x824   :  { %v5859_v41 = vpack.c.bf16 %v17733_v52, %v17727_v11  ;;  %v15344_v11 = vld [vmem:[%s19065_s7] sm:$0xff]   ;;  %v15366_v21 = vld [vmem:[%s19064_s8 + $0x38] sm:$0xff]  }
 0x825   :  { %13655 = vmatmul.mubr.msk.bf16.gmra.mrb[164].mxu1 %vm5920_vm2, %v5842_v35 }
 0x826   :  { %13658 = vmatprep.mubr.msk.bf16.mxu1 %vm5920_vm2, %v5843_v43  ;;  %13671 = vmatpush3.bf16.msra.mxu1 %v15328_v33 }
 0x827   :  { %13672 = vmatprep.subr.bf16.mxu1 %v15329_v19 }
 0x828   :  { %v17751_v37 = vpop.f32.mrb[124].mxu1 }
 0x829   :  { %v17753_v48 = vpop.f32.mrb[125].mxu1 }
 0x82a   :  { %v17755_v20 = vpop.f32.mrb[126].mxu1  ;;  %13673 = vmatpush3.bf16.msra.mxu1 %v15329_v19 }
 0x82b   :  { %v5862_v17 = vpack.c.bf16 %v17755_v20, %v17751_v37  ;;  %v17759_v23 = vpop.f32.mrb[127].mxu1  ;;  %13690 = vmatprep.subr.bf16.mxu1 %v15330_v27 }
 0x82c   :  { %v5861_v35 = vpack.c.bf16 %v17759_v23, %v17753_v48 }
 0x82d   :  { %13659 = vmatmul.mubr.msk.bf16.gmra.mrb[168].mxu1 %vm5920_vm2, %v5844_v4 }
 0x82e   :  { %13662 = vmatprep.mubr.msk.bf16.mxu1 %vm5920_vm2, %v5845_v30 }
 0x830   :  { %v17771_v32 = vpop.f32.mrb[128].mxu1 }
 0x831   :  { %v17773_v51 = vpop.f32.mrb[129].mxu1 }
 0x832   :  { %v17775_v43 = vpop.f32.mrb[130].mxu1 }
 0x833   :  { %v5864_v33 = vpack.c.bf16 %v17775_v43, %v17771_v32  ;;  %v17779_v19 = vpop.f32.mrb[131].mxu1 }
 0x834   :  { %v5863_v7 = vpack.c.bf16 %v17779_v19, %v17773_v51 }
 0x835   :  { %13663 = vmatmul.mubr.msk.bf16.gmra.mrb[172].mxu1 %vm5920_vm2, %v5846_v60  ;;  %v15331_v60 = vld [vmem:[%s19062_s5 + $0xc8] sm:$0xff]  }
 0x836   :  { %13674 = vmatprep.mubr.msk.bf16.mxu1 %vm5920_vm2, %v5847_v44 }
 0x838   :  { %v17794_v4 = vpop.f32.mrb[132].mxu1 }
 0x839   :  { %v17796_v46 = vpop.f32.mrb[133].mxu1 }
 0x83a   :  { %v17798_v49 = vpop.f32.mrb[134].mxu1 }
 0x83b   :  { %v5866_v40 = vpack.c.bf16 %v17798_v49, %v17794_v4  ;;  %v17802_v54 = vpop.f32.mrb[135].mxu1 }
 0x83c   :  { %v5865_v30 = vpack.c.bf16 %v17802_v54, %v17796_v46 }
 0x83d   :  { %13675 = vmatmul.mubr.msk.bf16.vlgmr.msra.gmra.mrb[160].mxu1 %vm5920_vm2, %v5848_v57  ;;  %v15333_v57 = vld [vmem:[%s19062_s5 + $0xd8] sm:$0xff]  }
 0x83e   :  { %13678 = vmatprep.mubr.msk.bf16.mxu1 %vm5920_vm2, %v5849_v59  ;;  %13691 = vmatpush3.bf16.msra.mxu1 %v15330_v27 }
 0x83f   :  { %13692 = vmatprep.subr.bf16.mxu1 %v15331_v60 }
 0x840   :  { %v17820_v25 = vpop.f32.mrb[136].mxu1 }
 0x841   :  { %v17822_v44 = vpop.f32.mrb[137].mxu1 }
 0x842   :  { %v17824_v31 = vpop.f32.mrb[138].mxu1  ;;  %13693 = vmatpush3.bf16.msra.mxu1 %v15331_v60 }
 0x843   :  { %v5868_v3 = vpack.c.bf16 %v17824_v31, %v17820_v25  ;;  %v17828_v50 = vpop.f32.mrb[139].mxu1  ;;  %13694 = vmatprep.subr.bf16.mxu1 %v15332_v63 }
 0x844   :  { %v5867_v53 = vpack.c.bf16 %v17828_v50, %v17822_v44 }
 0x845   :  { %13679 = vmatmul.mubr.msk.bf16.gmra.mrb[164].mxu1 %vm5920_vm2, %v5850_v2 }
 0x846   :  { %13682 = vmatprep.mubr.msk.bf16.mxu1 %vm5920_vm2, %v5851_v15  ;;  %13695 = vmatpush3.bf16.msra.mxu1 %v15332_v63 }
 0x847   :  { %13696 = vmatprep.subr.bf16.mxu1 %v15333_v57 }
 0x848   :  { %v17846_v59 = vpop.f32.mrb[140].mxu1 }
 0x849   :  { %v17848_v27 = vpop.f32.mrb[141].mxu1 }
 0x84a   :  { %v17850_v60 = vpop.f32.mrb[142].mxu1  ;;  %13697 = vmatpush3.bf16.msra.mxu1 %v15333_v57 }
 0x84b   :  { %v5870_v47 = vpack.c.bf16 %v17850_v60, %v17846_v59  ;;  %v17854_v56 = vpop.f32.mrb[143].mxu1  ;;  %13714 = vmatprep.subr.bf16.mxu1 %v15334_v28 }
 0x84c   :  { %v5869_v2 = vpack.c.bf16 %v17854_v56, %v17848_v27 }
 0x84d   :  { %13683 = vmatmul.mubr.msk.bf16.gmra.mrb[168].mxu1 %vm5920_vm2, %v5852_v5 }
 0x84e   :  { %13686 = vmatprep.mubr.msk.bf16.mxu1 %vm5920_vm2, %v5853_v14  ;;  %v15335_v14 = vld [vmem:[%s19062_s5 + $0xe8] sm:$0xff]  }
 0x850   :  { %v17866_v12 = vpop.f32.mrb[144].mxu1 }
 0x851   :  { %v17868_v8 = vpop.f32.mrb[145].mxu1 }
 0x852   :  { %v17870_v15 = vpop.f32.mrb[146].mxu1 }
 0x853   :  { %v5872_v63 = vpack.c.bf16 %v17870_v15, %v17866_v12  ;;  %v5747_v57 = vpop.f32.mrb[147].mxu1 }
 0x854   :  { %v5871_v0 = vpack.c.bf16 %v5747_v57, %v17868_v8 }
 0x855   :  { %13687 = vmatmul.mubr.msk.bf16.gmra.mrb[172].mxu1 %vm5920_vm2, %v5854_v61 }
 0x856   :  { %13698 = vmatprep.mubr.msk.bf16.mxu1 %vm5920_vm2, %v5855_v18 }
 0x858   :  { %v13536_v36 = vpop.f32.mrb[148].mxu1 }
 0x859   :  { %v5760_v16 = vpop.f32.mrb[149].mxu1 }
 0x85a   :  { %v13537_v5 = vpop.f32.mrb[150].mxu1 }
 0x85b   :  { %v5874_v10 = vpack.c.bf16 %v13537_v5, %v13536_v36  ;;  %v5763_v26 = vpop.f32.mrb[151].mxu1 }
 0x85c   :  { %v5873_v12 = vpack.c.bf16 %v5763_v26, %v5760_v16 }
 0x85d   :  { %13699 = vmatmul.mubr.msk.bf16.vlgmr.msra.gmra.mrb[160].mxu1 %vm5920_vm2, %v5856_v9  ;;  %v15338_v9 = vld [vmem:[%s19062_s5 + $0x100] sm:$0xff]  }
 0x85e   :  { %13702 = vmatprep.mubr.msk.bf16.mxu1 %vm5920_vm2, %v5857_v62  ;;  %13715 = vmatpush3.bf16.msra.mxu1 %v15334_v28 }
 0x85f   :  { %13716 = vmatprep.subr.bf16.mxu1 %v15335_v14 }
 0x860   :  { %v13540_v6 = vpop.f32.mrb[152].mxu1 }
 0x861   :  { %v5776_v61 = vpop.f32.mrb[153].mxu1 }
 0x862   :  { %v13541_v24 = vpop.f32.mrb[154].mxu1  ;;  %13717 = vmatpush3.bf16.msra.mxu1 %v15335_v14 }
 0x863   :  { %v5876_v13 = vpack.c.bf16 %v13541_v24, %v13540_v6  ;;  %v5779_v18 = vpop.f32.mrb[155].mxu1  ;;  %13718 = vmatprep.subr.bf16.mxu1 %v15336_v22 }
 0x864   :  { %v5875_v1 = vpack.c.bf16 %v5779_v18, %v5776_v61 }
 0x865   :  { %13703 = vmatmul.mubr.msk.bf16.gmra.mrb[164].mxu1 %vm5920_vm2, %v5858_v45  ;;  %v15340_v45 = vld [vmem:[%s19062_s5 + $0x110] sm:$0xff]  }
 0x866   :  { %13706 = vmatprep.mubr.msk.bf16.mxu1 %vm5920_vm2, %v5859_v41  ;;  %13719 = vmatpush3.bf16.msra.mxu1 %v15336_v22 }
 0x867   :  { %13720 = vmatprep.subr.bf16.mxu1 %v15337_v34 }
 0x868   :  { %v13544_v39 = vpop.f32.mrb[156].mxu1 }
 0x869   :  { %v5792_v38 = vpop.f32.mrb[157].mxu1 }
 0x86a   :  { %v13545_v62 = vpop.f32.mrb[158].mxu1  ;;  %13721 = vmatpush3.bf16.msra.mxu1 %v15337_v34 }
 0x86b   :  { %v5878_v28 = vpack.c.bf16 %v13545_v62, %v13544_v39  ;;  %v5795_v8 = vpop.f32.mrb[159].mxu1  ;;  %13738 = vmatprep.subr.bf16.mxu1 %v15338_v9 }
 0x86c   :  { %v5877_v58 = vpack.c.bf16 %v5795_v8, %v5792_v38 }
 0x86d   :  { %13707 = vmatmul.mubr.msk.bf16.gmra.mrb[168].mxu1 %vm5920_vm2, %v5860_v29  ;;  %v12101_v29 = vld [vmem:[%s19066_s6] ss:$0 sm:$0xff] }
 0x86e   :  { %13710 = vmatprep.mubr.msk.bf16.mxu1 %vm5920_vm2, %v5861_v35 }
 0x875   :  { %13711 = vmatmul.mubr.msk.bf16.gmra.mrb[172].mxu1 %vm5920_vm2, %v5862_v17 }
 0x876   :  { %13722 = vmatprep.mubr.msk.bf16.mxu1 %vm5920_vm2, %v5863_v7 }
 0x87d   :  { %13723 = vmatmul.mubr.msk.bf16.vlgmr.msra.gmra.mrb[160].mxu1 %vm5920_vm2, %v5864_v33 }
 0x87e   :  { %13726 = vmatprep.mubr.msk.bf16.mxu1 %vm5920_vm2, %v5865_v30  ;;  %13739 = vmatpush3.bf16.msra.mxu1 %v15338_v9 }
 0x87f   :  { %13740 = vmatprep.subr.bf16.mxu1 %v15339_v55 }
 0x882   :  { %13741 = vmatpush3.bf16.msra.mxu1 %v15339_v55  ;;  %v15345_v55 = vld [vmem:[%s19065_s7 + $0x8] sm:$0xff]  }
 0x883   :  { %13742 = vmatprep.subr.bf16.mxu1 %v15340_v45 }
 0x885   :  { %13727 = vmatmul.mubr.msk.bf16.gmra.mrb[164].mxu1 %vm5920_vm2, %v5866_v40 }
 0x886   :  { %13730 = vmatprep.mubr.msk.bf16.mxu1 %vm5920_vm2, %v5867_v53  ;;  %13743 = vmatpush3.bf16.msra.mxu1 %v15340_v45  ;;  %v15346_v45 = vld [vmem:[%s19065_s7 + $0x10] sm:$0xff]  }
 0x887   :  { %13744 = vmatprep.subr.bf16.mxu1 %v15341_v42 }
 0x88a   :  { %13745 = vmatpush3.bf16.msra.mxu1 %v15341_v42  ;;  %v15364_v42 = vld [vmem:[%s19064_s8 + $0x8] sm:$0xff]  }
 0x88d   :  { %13731 = vmatmul.mubr.msk.bf16.gmra.mrb[168].mxu1 %vm5920_vm2, %v5868_v3 }
 0x88e   :  { %13734 = vmatprep.mubr.msk.bf16.mxu1 %vm5920_vm2, %v5869_v2 }
 0x895   :  { %13735 = vmatmul.mubr.msk.bf16.gmra.mrb[172].mxu1 %vm5920_vm2, %v5870_v47 }
 0x896   :  { %13746 = vmatprep.mubr.msk.bf16.mxu1 %vm5920_vm2, %v5871_v0  ;;  %v15352_v0 = vld [vmem:[%s19064_s8 + $0x30] sm:$0xff]  }
 0x897   :  { %13818 = vmatprep.subr.bf16.mxu0 %v15352_v0 }
 0x898   :  { %13819 = vmatpush3.bf16.msra.mxu0 %v15352_v0  ;;  %v15347_v0 = vld [vmem:[%s19065_s7 + $0x18] sm:$0xff]  }
 0x899   :  { %13820 = vmatprep.subr.bf16.mxu0 %v15366_v21 }
 0x89c   :  { %13821 = vmatpush3.bf16.msra.mxu0 %v15366_v21  ;;  %v15348_v21 = vld [vmem:[%s19065_s7 + $0x20] sm:$0xff]  }
 0x89d   :  { %13747 = vmatmul.mubr.msk.bf16.vlgmr.msra.gmra.mrb[160].mxu1 %vm5920_vm2, %v5872_v63 }
 0x89e   :  { %13750 = vmatprep.mubr.msk.bf16.mxu1 %vm5920_vm2, %v5873_v12 }
 0x8a5   :  { %13751 = vmatmul.mubr.msk.bf16.gmra.mrb[164].mxu1 %vm5920_vm2, %v5874_v10 }
 0x8a6   :  { %13754 = vmatprep.mubr.msk.bf16.mxu1 %vm5920_vm2, %v5875_v1 }
 0x8ad   :  { %13755 = vmatmul.mubr.msk.bf16.gmra.mrb[168].mxu1 %vm5920_vm2, %v5876_v13 }
 0x8ae   :  { %13758 = vmatprep.mubr.msk.bf16.mxu1 %vm5920_vm2, %v5877_v58  ;;  %v15363_v58 = vld [vmem:[%s19064_s8] sm:$0xff]  }
 0x8b5   :  { %13759 = vmatmul.mubr.msk.bf16.gmra.mrb[172].mxu1 %vm5920_vm2, %v5878_v28 }
 0x8b6   :  { %13778 = vmatprep.mubr.bf16.mxu1 %v15344_v11  ;;  %v15365_v11 = vld [vmem:[%s19064_s8 + $0x10] sm:$0xff]  }
 0x970   :  { %v13748_v52 = vpop.f32.mrb[160].mxu1 }
 0x971   :  { %v7386_v41 = vadd.f32 %v13748_v52, %v12101_v29  ;;  %v7298_v37 = vpop.f32.mrb[161].mxu1  ;;  %v15349_v52 = vld [vmem:[%s19065_s7 + $0x28] sm:$0xff]  }
 0x972   :  { %v7384_v48 = vadd.f32 %v12101_v29, %v7298_v37  ;;  %v13749_v20 = vpop.f32.mrb[162].mxu1  ;;  %v15351_v37 = vld [vmem:[%s19065_s7 + $0x38] sm:$0xff]  }
 0x973   :  { %v7387_v17 = vadd.f32 %v13749_v20, %v12101_v29  ;;  %v7301_v23 = vpop.f32.mrb[163].mxu1  ;;  %v7402_v32 = vmax.f32 %v7386_v41, 0.0  ;;  %v15350_v41 = vld [vmem:[%s19065_s7 + $0x30] sm:$0xff]   ;;  %v15354_v20 = vld [vmem:[%s19065_s7 + $0x48] sm:$0xff]  }
 0x974   :  { %v7385_v35 = vadd.f32 %v12101_v29, %v7301_v23  ;;  %v7400_v43 = vmax.f32 %v7384_v48, 0.0  ;;  %v15353_v48 = vld [vmem:[%s19065_s7 + $0x40] sm:$0xff]   ;;  %v15356_v23 = vld [vmem:[%s19065_s7 + $0x58] sm:$0xff]  }
 0x975   :  { %v7403_v51 = vmax.f32 %v7387_v17, 0.0  ;;  %v15355_v17 = vld [vmem:[%s19065_s7 + $0x50] sm:$0xff]  }
 0x976   :  { %v7401_v33 = vmax.f32 %v7385_v35, 0.0  ;;  %v15357_v35 = vld [vmem:[%s19065_s7 + $0x60] sm:$0xff]  }
 0x977   :  { %v7417_v19 = vpack.c.bf16 %v7403_v51, %v7402_v32  ;;  %v15358_v32 = vld [vmem:[%s19065_s7 + $0x68] sm:$0xff]   ;;  %v15359_v51 = vld [vmem:[%s19065_s7 + $0x70] sm:$0xff]  }
 0x978   :  { %v7416_v7 = vpack.c.bf16 %v7401_v33, %v7400_v43  ;;  %v13752_v4 = vpop.f32.mrb[164].mxu1  ;;  %v15360_v43 = vld [vmem:[%s19065_s7 + $0x78] sm:$0xff]   ;;  %v15361_v33 = vld [vmem:[%s19065_s7 + $0x80] sm:$0xff]  }
 0x979   :  { %v7390_v46 = vadd.f32 %v13752_v4, %v12101_v29  ;;  %v7314_v49 = vpop.f32.mrb[165].mxu1 }
 0x97a   :  { %v7388_v40 = vadd.f32 %v12101_v29, %v7314_v49  ;;  %v13753_v54 = vpop.f32.mrb[166].mxu1  ;;  %13762 = vmatprep.subr.bf16.mxu1 %v7416_v7 }
 0x97b   :  { %v7391_v30 = vadd.f32 %v13753_v54, %v12101_v29  ;;  %v7317_v25 = vpop.f32.mrb[167].mxu1  ;;  %13763 = vmatpush3.bf16.msra.mxu1 %v7416_v7  ;;  %v7406_v31 = vmax.f32 %v7390_v46, 0.0  ;;  %v15368_v7 = vld [vmem:[%s19064_s8 + $0x40] sm:$0xff]  }
 0x97c   :  { %v7389_v44 = vadd.f32 %v12101_v29, %v7317_v25  ;;  %13764 = vmatprep.subr.bf16.mxu1 %v7417_v19  ;;  %v7404_v50 = vmax.f32 %v7388_v40, 0.0  ;;  %v15369_v25 = vld [vmem:[%s19064_s8 + $0x48] sm:$0xff]  }
 0x97d   :  { %v7407_v3 = vmax.f32 %v7391_v30, 0.0 }
 0x97e   :  { %v7405_v53 = vmax.f32 %v7389_v44, 0.0 }
 0x97f   :  { %v7419_v59 = vpack.c.bf16 %v7407_v3, %v7406_v31  ;;  %13765 = vmatpush3.bf16.msra.mxu1 %v7417_v19  ;;  %v15362_v19 = vld [vmem:[%s19065_s7 + $0x88] sm:$0xff]   ;;  %v15370_v3 = vld [vmem:[%s19064_s8 + $0x50] sm:$0xff]  }
 0x980   :  { %v7418_v27 = vpack.c.bf16 %v7405_v53, %v7404_v50  ;;  %v13756_v60 = vpop.f32.mrb[168].mxu1 }
 0x981   :  { %v7394_v47 = vadd.f32 %v13756_v60, %v12101_v29  ;;  %v7330_v56 = vpop.f32.mrb[169].mxu1  ;;  %v15371_v60 = vld [vmem:[%s19064_s8 + $0x58] sm:$0xff]  }
 0x982   :  { %v7392_v2 = vadd.f32 %v12101_v29, %v7330_v56  ;;  %v13757_v15 = vpop.f32.mrb[170].mxu1  ;;  %13766 = vmatprep.subr.bf16.mxu1 %v7418_v27 }
 0x983   :  { %v7395_v63 = vadd.f32 %v13757_v15, %v12101_v29  ;;  %v7333_v57 = vpop.f32.mrb[171].mxu1  ;;  %13767 = vmatpush3.bf16.msra.mxu1 %v7418_v27  ;;  %v7410_v16 = vmax.f32 %v7394_v47, 0.0 }
 0x984   :  { %v7393_v36 = vadd.f32 %v12101_v29, %v7333_v57  ;;  %13768 = vmatprep.subr.bf16.mxu1 %v7419_v59  ;;  %v7408_v10 = vmax.f32 %v7392_v2, 0.0  ;;  %v15372_v2 = vld [vmem:[%s19064_s8 + $0x60] sm:$0xff]  }
 0x985   :  { %v7411_v5 = vmax.f32 %v7395_v63, 0.0 }
 0x986   :  { %v7409_v26 = vmax.f32 %v7393_v36, 0.0 }
 0x987   :  { %v7421_v14 = vpack.c.bf16 %v7411_v5, %v7410_v16  ;;  %13769 = vmatpush3.bf16.msra.mxu1 %v7419_v59  ;;  %v15373_v16 = vld [vmem:[%s19064_s8 + $0x68] sm:$0xff]  }
 0x988   :  { %v7420_v12 = vpack.c.bf16 %v7409_v26, %v7408_v10  ;;  %v13760_v22 = vpop.f32.mrb[172].mxu1  ;;  %v15374_v26 = vld [vmem:[%s19064_s8 + $0x70] sm:$0xff]  }
 0x989   :  { %v7398_v6 = vadd.f32 %v13760_v22, %v12101_v29  ;;  %v7346_v61 = vpop.f32.mrb[173].mxu1 }
 0x98a   :  { %v7396_v24 = vadd.f32 %v12101_v29, %v7346_v61  ;;  %v13761_v13 = vpop.f32.mrb[174].mxu1  ;;  %13770 = vmatprep.subr.bf16.mxu1 %v7420_v12  ;;  %v15375_v61 = vld [vmem:[%s19064_s8 + $0x78] sm:$0xff]  }
 0x98b   :  { %v7399_v18 = vadd.f32 %v13761_v13, %v12101_v29  ;;  %v7349_v34 = vpop.f32.mrb[175].mxu1  ;;  %13771 = vmatpush3.bf16.msra.mxu1 %v7420_v12  ;;  %v7414_v9 = vmax.f32 %v7398_v6, 0.0  ;;  %v15376_v13 = vld [vmem:[%s19064_s8 + $0x80] sm:$0xff]  }
 0x98c   :  { %v7397_v1 = vadd.f32 %v12101_v29, %v7349_v34  ;;  %13772 = vmatprep.subr.bf16.mxu1 %v7421_v14  ;;  %v7412_v38 = vmax.f32 %v7396_v24, 0.0  ;;  %v15367_v29 = vld [vmem:[%s19064_s8 + $0x18] sm:$0xff]  }
 0x98d   :  { %v7415_v39 = vmax.f32 %v7399_v18, 0.0 }
 0x98e   :  { %v7413_v62 = vmax.f32 %v7397_v1, 0.0 }
 0x98f   :  { %v7423_v28 = vpack.c.bf16 %v7415_v39, %v7414_v9  ;;  %13773 = vmatpush3.bf16.msra.mxu1 %v7421_v14 }
 0x990   :  { %v7422_v8 = vpack.c.bf16 %v7413_v62, %v7412_v38  ;;  %v15377_v38 = vld [vmem:[%s19064_s8 + $0x88] sm:$0xff]  }
 0x992   :  { %13774 = vmatprep.subr.bf16.mxu1 %v7422_v8 }
 0x993   :  { %13775 = vmatpush3.bf16.msra.mxu1 %v7422_v8 }
 0x994   :  { %13776 = vmatprep.subr.bf16.mxu1 %v7423_v28 }
 0x997   :  { %13777 = vmatpush3.bf16.msra.mxu1 %v7423_v28  ;;  %v15378_v28 = vld [vmem:[%s19064_s8 + $0x90] sm:$0xff]  }
 0x998   :  { %13826 = vmatprep.subr.bf16.mxu1 %v15363_v58 }
 0x99a   :  { %13779 = vmatmul.mubr.bf16.vlgmr.msra.gmra.mrb[176].mxu1 %v15345_v55 }
 0x99b   :  { %13782 = vmatprep.mubr.bf16.mxu1 %v15346_v45  ;;  %13827 = vmatpush3.bf16.msra.mxu1 %v15363_v58 }
 0x99c   :  { %13828 = vmatprep.subr.bf16.mxu1 %v15364_v42 }
 0x99f   :  { %13829 = vmatpush3.bf16.msra.mxu1 %v15364_v42 }
 0x9a0   :  { %13830 = vmatprep.subr.bf16.mxu1 %v15365_v11 }
 0x9a2   :  { %13783 = vmatmul.mubr.bf16.gmra.mrb[180].mxu1 %v15347_v0 }
 0x9a3   :  { %13786 = vmatprep.mubr.bf16.mxu1 %v15348_v21  ;;  %13831 = vmatpush3.bf16.msra.mxu1 %v15365_v11  ;;  %v15379_v11 = vld [vmem:[%s19064_s8 + $0x98] sm:$0xff]   ;;  %v15380_v21 = vld [vmem:[%s19064_s8 + $0xa0] sm:$0xff]  }
 0x9a4   :  { %13832 = vmatprep.subr.bf16.mxu1 %v15367_v29 }
 0x9a7   :  { %13833 = vmatpush3.bf16.msra.mxu1 %v15367_v29 }
 0x9a8   :  { %13838 = vmatprep.subr.bf16.mxu1 %v15368_v7 }
 0x9aa   :  { %13787 = vmatmul.mubr.bf16.gmra.mrb[184].mxu1 %v15349_v52 }
 0x9ab   :  { %13790 = vmatprep.mubr.bf16.mxu1 %v15350_v41 }
 0x9b2   :  { %13791 = vmatmul.mubr.bf16.gmra.mrb[188].mxu1 %v15351_v37 }
 0x9b3   :  { %13794 = vmatprep.mubr.bf16.mxu1 %v15353_v48 }
 0x9ba   :  { %13795 = vmatmul.mubr.bf16.gmra.mrb[192].mxu1 %v15354_v20  ;;  %v15381_v20 = vld [vmem:[%s19064_s8 + $0xa8] sm:$0xff]  }
 0x9bb   :  { %13798 = vmatprep.mubr.bf16.mxu1 %v15355_v17 }
 0x9c2   :  { %13799 = vmatmul.mubr.bf16.gmra.mrb[196].mxu1 %v15356_v23  ;;  %v15382_v23 = vld [vmem:[%s19064_s8 + $0xb0] sm:$0xff]  }
 0x9c3   :  { %13802 = vmatprep.mubr.bf16.mxu1 %v15357_v35 }
 0x9ca   :  { %13803 = vmatmul.mubr.bf16.gmra.mrb[200].mxu1 %v15358_v32 }
 0x9cb   :  { %13806 = vmatprep.mubr.bf16.mxu1 %v15359_v51 }
 0x9d2   :  { %13807 = vmatmul.mubr.bf16.gmra.mrb[204].mxu1 %v15360_v43 }
 0x9d3   :  { %13810 = vmatprep.mubr.bf16.mxu1 %v15361_v33 }
 0x9da   :  { %13811 = vmatmul.mubr.bf16.gmra.mrb[208].mxu1 %v15362_v19  ;;  %v15383_v19 = vld [vmem:[%s19064_s8 + $0xb8] sm:$0xff]  }
 0xa6d   :  { %v13780_v4 = vpop.f32.mrb[176].mxu1 }
 0xa6e   :  { %v7602_v46 = vpop.f32.mrb[177].mxu1 }
 0xa6f   :  { %v13781_v49 = vpop.f32.mrb[178].mxu1 }
 0xa70   :  { %v7746_v40 = vpack.c.bf16 %v13781_v49, %v13780_v4  ;;  %v7605_v54 = vpop.f32.mrb[179].mxu1  ;;  %v15384_v4 = vld [vmem:[%s19064_s8 + $0xc0] sm:$0xff]  }
 0xa71   :  { %v7745_v30 = vpack.c.bf16 %v7605_v54, %v7602_v46 }
 0xa73   :  { %13834 = vmatprep.mubr.msk.bf16.mxu1 %vm5920_vm2, %v7745_v30 }
 0xa74   :  { %13835 = vmatmul.mubr.msk.bf16.vlgmr.msra.gmra.mrb[212].mxu1 %vm5920_vm2, %v7746_v40 }
 0xa75   :  { %13839 = vmatpush3.bf16.msra.mxu1 %v15368_v7  ;;  %v13784_v44 = vpop.f32.mrb[180].mxu1 }
 0xa76   :  { %v7618_v31 = vpop.f32.mrb[181].mxu1  ;;  %13840 = vmatprep.subr.bf16.mxu1 %v15369_v25 }
 0xa77   :  { %v13785_v50 = vpop.f32.mrb[182].mxu1 }
 0xa78   :  { %v7748_v53 = vpack.c.bf16 %v13785_v50, %v13784_v44  ;;  %v7621_v59 = vpop.f32.mrb[183].mxu1  ;;  %v15386_v44 = vld [vmem:[%s19064_s8 + $0xd0] sm:$0xff]   ;;  %v15389_v50 = vld [vmem:[%s19064_s8 + $0xe8] sm:$0xff]  }
 0xa79   :  { %v7747_v27 = vpack.c.bf16 %v7621_v59, %v7618_v31  ;;  %13841 = vmatpush3.bf16.msra.mxu1 %v15369_v25  ;;  %v15385_v25 = vld [vmem:[%s19064_s8 + $0xc8] sm:$0xff]   ;;  %v15387_v31 = vld [vmem:[%s19064_s8 + $0xd8] sm:$0xff]  }
 0xa7a   :  { %13842 = vmatprep.subr.bf16.mxu1 %v15370_v3  ;;  %v15391_v59 = vld [vmem:[%s19064_s8 + $0xf8] sm:$0xff]  }
 0xa7b   :  { %13822 = vmatprep.mubr.msk.bf16.mxu0 %vm5920_vm2, %v7747_v27  ;;  %v15392_v27 = vld [vmem:[%s19064_s8 + $0x100] sm:$0xff]  }
 0xa7c   :  { %13823 = vmatmul.mubr.msk.bf16.vlgmr.msra.gmra.mrb[32].mxu0 %vm5920_vm2, %v7748_v53  ;;  %v15390_v53 = vld [vmem:[%s19064_s8 + $0xf0] sm:$0xff]  }
 0xa7d   :  { %13843 = vmatpush3.bf16.msra.mxu1 %v15370_v3  ;;  %v13788_v47 = vpop.f32.mrb[184].mxu1  ;;  %v15388_v3 = vld [vmem:[%s19064_s8 + $0xe0] sm:$0xff]  }
 0xa7e   :  { %v7634_v56 = vpop.f32.mrb[185].mxu1  ;;  %13844 = vmatprep.subr.bf16.mxu1 %v15371_v60 }
 0xa7f   :  { %v13789_v15 = vpop.f32.mrb[186].mxu1 }
 0xa80   :  { %v7750_v63 = vpack.c.bf16 %v13789_v15, %v13788_v47  ;;  %v7637_v57 = vpop.f32.mrb[187].mxu1  ;;  %v15394_v47 = vld [vmem:[%s19064_s8 + $0x110] sm:$0xff]  }
 0xa81   :  { %v7749_v36 = vpack.c.bf16 %v7637_v57, %v7634_v56  ;;  %13845 = vmatpush3.bf16.msra.mxu1 %v15371_v60  ;;  %v15393_v60 = vld [vmem:[%s19064_s8 + $0x108] sm:$0xff]   ;;  %v15395_v56 = vld [vmem:[%s19064_s8 + $0x118] sm:$0xff]  }
 0xa82   :  { %13850 = vmatprep.subr.bf16.mxu1 %v15372_v2 }
 0xa83   :  { %13846 = vmatprep.mubr.msk.bf16.mxu1 %vm5920_vm2, %v7749_v36 }
 0xa84   :  { %13847 = vmatmul.mubr.msk.bf16.vlgmr.msra.gmra.mrb[212].mxu1 %vm5920_vm2, %v7750_v63 }
 0xa85   :  { %13851 = vmatpush3.bf16.msra.mxu1 %v15372_v2  ;;  %v13792_v5 = vpop.f32.mrb[188].mxu1  ;;  %v15396_v2 = vld [vmem:[%s19067_s10] sm:$0xff]  }
 0xa86   :  { %13852 = vmatprep.subr.bf16.mxu1 %v15373_v16  ;;  %v7650_v10 = vpop.f32.mrb[189].mxu1 }
 0xa87   :  { %v13793_v14 = vpop.f32.mrb[190].mxu1 }
 0xa88   :  { %v7752_v12 = vpack.c.bf16 %v13793_v14, %v13792_v5  ;;  %v7653_v22 = vpop.f32.mrb[191].mxu1  ;;  %v12238_v5 = vld [vmem:[%s19069_s9] ss:$0 sm:$0xff] }
 0xa89   :  { %13853 = vmatpush3.bf16.msra.mxu1 %v15373_v16  ;;  %v7751_v6 = vpack.c.bf16 %v7653_v22, %v7650_v10 }
 0xa8a   :  { %13854 = vmatprep.subr.bf16.mxu1 %v15374_v26 }
 0xa8b   :  { %13858 = vmatprep.mubr.msk.bf16.mxu1 %vm5920_vm2, %v7751_v6 }
 0xa8d   :  { %13855 = vmatpush3.bf16.msra.mxu1 %v15374_v26  ;;  %v13796_v24 = vpop.f32.mrb[192].mxu1 }
 0xa8e   :  { %13856 = vmatprep.subr.bf16.mxu1 %v15375_v61  ;;  %v7666_v18 = vpop.f32.mrb[193].mxu1 }
 0xa8f   :  { %v13797_v34 = vpop.f32.mrb[194].mxu1 }
 0xa90   :  { %v7754_v1 = vpack.c.bf16 %v13797_v34, %v13796_v24  ;;  %v7669_v9 = vpop.f32.mrb[195].mxu1 }
 0xa91   :  { %13857 = vmatpush3.bf16.msra.mxu1 %v15375_v61  ;;  %v7753_v39 = vpack.c.bf16 %v7669_v9, %v7666_v18 }
 0xa92   :  { %13862 = vmatprep.subr.bf16.mxu1 %v15376_v13 }
 0xa94   :  { %13859 = vmatmul.mubr.msk.bf16.vlgmr.msra.gmra.mrb[212].mxu1 %vm5920_vm2, %v7752_v12 }
 0xa95   :  { %13863 = vmatpush3.bf16.msra.mxu1 %v15376_v13  ;;  %13870 = vmatprep.mubr.msk.bf16.mxu1 %vm5920_vm2, %v7753_v39  ;;  %v13800_v62 = vpop.f32.mrb[196].mxu1 }
 0xa96   :  { %13864 = vmatprep.subr.bf16.mxu1 %v15377_v38  ;;  %v7682_v8 = vpop.f32.mrb[197].mxu1 }
 0xa97   :  { %v13801_v58 = vpop.f32.mrb[198].mxu1 }
 0xa98   :  { %v7756_v55 = vpack.c.bf16 %v13801_v58, %v13800_v62  ;;  %v7685_v45 = vpop.f32.mrb[199].mxu1  ;;  %v15397_v58 = vld [vmem:[%s19067_s10 + $0x8] sm:$0xff]  }
 0xa99   :  { %13865 = vmatpush3.bf16.msra.mxu1 %v15377_v38  ;;  %v7755_v42 = vpack.c.bf16 %v7685_v45, %v7682_v8  ;;  %v15406_v8 = vld [vmem:[%s19068_s11 + $0x40] sm:$0xff]   ;;  %v15407_v45 = vld [vmem:[%s19068_s11 + $0x48] sm:$0xff]  }
 0xa9a   :  { %13866 = vmatprep.subr.bf16.mxu1 %v15378_v28 }
 0xa9d   :  { %13867 = vmatpush3.bf16.msra.mxu1 %v15378_v28  ;;  %v13804_v0 = vpop.f32.mrb[200].mxu1 }
 0xa9e   :  { %13868 = vmatprep.subr.bf16.mxu1 %v15379_v11  ;;  %v7698_v29 = vpop.f32.mrb[201].mxu1 }
 0xa9f   :  { %v13805_v52 = vpop.f32.mrb[202].mxu1 }
 0xaa0   :  { %v7758_v41 = vpack.c.bf16 %v13805_v52, %v13804_v0  ;;  %v7701_v37 = vpop.f32.mrb[203].mxu1  ;;  %v15400_v0 = vld [vmem:[%s19067_s10 + $0x20] sm:$0xff]   ;;  %v15401_v52 = vld [vmem:[%s19067_s10 + $0x28] sm:$0xff]  }
 0xaa1   :  { %13869 = vmatpush3.bf16.msra.mxu1 %v15379_v11  ;;  %v7757_v48 = vpack.c.bf16 %v7701_v37, %v7698_v29  ;;  %v15399_v11 = vld [vmem:[%s19067_s10 + $0x18] sm:$0xff]   ;;  %v15412_v29 = vld [vmem:[%s19068_s11 + $0x60] sm:$0xff]   ;;  %v15415_v37 = vld [vmem:[%s19068_s11 + $0x68] sm:$0xff]  }
 0xaa2   :  { %13874 = vmatprep.subr.bf16.mxu1 %v15380_v21 }
 0xaa4   :  { %13871 = vmatmul.mubr.msk.bf16.vlgmr.msra.gmra.mrb[212].mxu1 %vm5920_vm2, %v7754_v1 }
 0xaa5   :  { %13875 = vmatpush3.bf16.msra.mxu1 %v15380_v21  ;;  %13882 = vmatprep.mubr.msk.bf16.mxu1 %vm5920_vm2, %v7755_v42  ;;  %v13808_v17 = vpop.f32.mrb[204].mxu1  ;;  %v15410_v42 = vld [vmem:[%s19068_s11 + $0x50] sm:$0xff]   ;;  %v15411_v21 = vld [vmem:[%s19068_s11 + $0x58] sm:$0xff]  }
 0xaa6   :  { %13876 = vmatprep.subr.bf16.mxu1 %v15381_v20  ;;  %v7714_v35 = vpop.f32.mrb[205].mxu1 }
 0xaa7   :  { %v13809_v32 = vpop.f32.mrb[206].mxu1 }
 0xaa8   :  { %v7760_v51 = vpack.c.bf16 %v13809_v32, %v13808_v17  ;;  %v7717_v43 = vpop.f32.mrb[207].mxu1  ;;  %v15404_v17 = vld [vmem:[%s19067_s10 + $0x40] sm:$0xff]   ;;  %v15409_v32 = vld [vmem:[%s19067_s10 + $0x58] sm:$0xff]  }
 0xaa9   :  { %13877 = vmatpush3.bf16.msra.mxu1 %v15381_v20  ;;  %v7759_v33 = vpack.c.bf16 %v7717_v43, %v7714_v35  ;;  %v15403_v20 = vld [vmem:[%s19067_s10 + $0x38] sm:$0xff]   ;;  %v15408_v35 = vld [vmem:[%s19067_s10 + $0x50] sm:$0xff]   ;;  %v15414_v43 = vld [vmem:[%s19067_s10 + $0x68] sm:$0xff]  }
 0xaaa   :  { %13878 = vmatprep.subr.bf16.mxu1 %v15382_v23 }
 0xaad   :  { %13879 = vmatpush3.bf16.msra.mxu1 %v15382_v23  ;;  %v13812_v7 = vpop.f32.mrb[208].mxu1  ;;  %v15405_v23 = vld [vmem:[%s19067_s10 + $0x48] sm:$0xff]  }
 0xaae   :  { %13880 = vmatprep.subr.bf16.mxu1 %v15383_v19  ;;  %v7730_v46 = vpop.f32.mrb[209].mxu1 }
 0xaaf   :  { %v13813_v49 = vpop.f32.mrb[210].mxu1 }
 0xab0   :  { %v7762_v40 = vpack.c.bf16 %v13813_v49, %v13812_v7  ;;  %v7733_v54 = vpop.f32.mrb[211].mxu1  ;;  %v15419_v7 = vld [vmem:[%s19067_s10 + $0x80] sm:$0xff]  }
 0xab1   :  { %13881 = vmatpush3.bf16.msra.mxu1 %v15383_v19  ;;  %v7761_v30 = vpack.c.bf16 %v7733_v54, %v7730_v46  ;;  %v15417_v19 = vld [vmem:[%s19067_s10 + $0x78] sm:$0xff]   ;;  %v15422_v49 = vld [vmem:[%s19068_s11] sm:$0xff]  }
 0xab2   :  { %13886 = vmatprep.subr.bf16.mxu1 %v15384_v4  ;;  %v15421_v46 = vld [vmem:[%s19068_s11 + $0x78] sm:$0xff]  }
 0xab4   :  { %13883 = vmatmul.mubr.msk.bf16.vlgmr.msra.gmra.mrb[212].mxu1 %vm5920_vm2, %v7756_v55  ;;  %v15398_v55 = vld [vmem:[%s19067_s10 + $0x10] sm:$0xff]  }
 0xab5   :  { %13887 = vmatpush3.bf16.msra.mxu1 %v15384_v4  ;;  %13894 = vmatprep.mubr.msk.bf16.mxu1 %vm5920_vm2, %v7757_v48  ;;  %v15418_v48 = vld [vmem:[%s19068_s11 + $0x70] sm:$0xff]   ;;  %v15420_v4 = vld [vmem:[%s19067_s10 + $0x88] sm:$0xff]  }
 0xab6   :  { %13888 = vmatprep.subr.bf16.mxu1 %v15385_v25 }
 0xab9   :  { %13889 = vmatpush3.bf16.msra.mxu1 %v15385_v25 }
 0xaba   :  { %13890 = vmatprep.subr.bf16.mxu1 %v15386_v44 }
 0xabd   :  { %13891 = vmatpush3.bf16.msra.mxu1 %v15386_v44 }
 0xabe   :  { %13892 = vmatprep.subr.bf16.mxu1 %v15387_v31 }
 0xac1   :  { %13893 = vmatpush3.bf16.msra.mxu1 %v15387_v31 }
 0xac2   :  { %13898 = vmatprep.subr.bf16.mxu1 %v15388_v3 }
 0xac4   :  { %13895 = vmatmul.mubr.msk.bf16.vlgmr.msra.gmra.mrb[212].mxu1 %vm5920_vm2, %v7758_v41  ;;  %v15402_v41 = vld [vmem:[%s19067_s10 + $0x30] sm:$0xff]  }
 0xac5   :  { %13899 = vmatpush3.bf16.msra.mxu1 %v15388_v3  ;;  %13906 = vmatprep.mubr.msk.bf16.mxu1 %vm5920_vm2, %v7759_v33  ;;  %v15416_v33 = vld [vmem:[%s19067_s10 + $0x70] sm:$0xff]  }
 0xac6   :  { %13900 = vmatprep.subr.bf16.mxu1 %v15389_v50 }
 0xac9   :  { %13901 = vmatpush3.bf16.msra.mxu1 %v15389_v50 }
 0xaca   :  { %13902 = vmatprep.subr.bf16.mxu1 %v15390_v53 }
 0xacd   :  { %13903 = vmatpush3.bf16.msra.mxu1 %v15390_v53 }
 0xace   :  { %13904 = vmatprep.subr.bf16.mxu1 %v15391_v59 }
 0xad1   :  { %13905 = vmatpush3.bf16.msra.mxu1 %v15391_v59 }
 0xad2   :  { %13910 = vmatprep.subr.bf16.mxu1 %v15392_v27 }
 0xad4   :  { %13907 = vmatmul.mubr.msk.bf16.vlgmr.msra.gmra.mrb[212].mxu1 %vm5920_vm2, %v7760_v51  ;;  %v15413_v51 = vld [vmem:[%s19067_s10 + $0x60] sm:$0xff]  }
 0xad5   :  { %13911 = vmatpush3.bf16.msra.mxu1 %v15392_v27  ;;  %13918 = vmatprep.mubr.msk.bf16.mxu1 %vm5920_vm2, %v7761_v30 }
 0xad6   :  { %13912 = vmatprep.subr.bf16.mxu1 %v15393_v60 }
 0xad9   :  { %13913 = vmatpush3.bf16.msra.mxu1 %v15393_v60 }
 0xada   :  { %13914 = vmatprep.subr.bf16.mxu1 %v15394_v47 }
 0xadd   :  { %13915 = vmatpush3.bf16.msra.mxu1 %v15394_v47  ;;  %v15423_v47 = vld [vmem:[%s19068_s11 + $0x8] sm:$0xff]  }
 0xade   :  { %13916 = vmatprep.subr.bf16.mxu1 %v15395_v56 }
 0xae1   :  { %13917 = vmatpush3.bf16.msra.mxu1 %v15395_v56 }
 0xae4   :  { %13919 = vmatmul.mubr.msk.bf16.vlgmr.msra.gmra.mrb[212].mxu1 %vm5920_vm2, %v7762_v40 }
 0xae5   :  { %13926 = vmatprep.mubr.msk.bf16.mxu1 %vm8725_vm3, %v15396_v2  ;;  %v15424_v2 = vld [vmem:[%s19068_s11 + $0x10] sm:$0xff]  }
 0xb4f   :  { %v13824_v15 = vpop.f32.mrb[32].mxu0 }
 0xb50   :  { %v7844_v63 = vpop.f32.mrb[33].mxu0 }
 0xb51   :  { %v13825_v57 = vpop.f32.mrb[34].mxu0 }
 0xb52   :  { %v7847_v36 = vpop.f32.mrb[35].mxu0 }
 0xbb7   :  { %v13920_v16 = vpop.f32.mrb[212].mxu1 }
 0xbb8   :  { %v14182_v10 = vadd.f32 %v13920_v16, %v13824_v15  ;;  %v8563_v26 = vpop.f32.mrb[213].mxu1 }
 0xbb9   :  { %v14183_v14 = vadd.f32 %v8563_v26, %v7844_v63  ;;  %v13921_v12 = vpop.f32.mrb[214].mxu1  ;;  %v15426_v26 = vld [vmem:[%s19068_s11 + $0x20] sm:$0xff]  }
 0xbba   :  { %v8591_v22 = vadd.f32 %v14182_v10, %v12238_v5  ;;  %v14184_v6 = vadd.f32 %v13921_v12, %v13825_v57  ;;  %v8566_v61 = vpop.f32.mrb[215].mxu1 }
 0xbbb   :  { %v8589_v24 = vadd.f32 %v14183_v14, %v12238_v5  ;;  %v14185_v13 = vadd.f32 %v8566_v61, %v7847_v36 }
 0xbbc   :  { %v8592_v18 = vadd.f32 %v14184_v6, %v12238_v5  ;;  %v8595_v1 = vmax.f32 %v8591_v22, 0.0 }
 0xbbd   :  { %v8590_v34 = vadd.f32 %v14185_v13, %v12238_v5  ;;  %v8593_v39 = vmax.f32 %v8589_v24, 0.0  ;;  %v15425_v5 = vld [vmem:[%s19068_s11 + $0x18] sm:$0xff]   ;;  %v15427_v24 = vld [vmem:[%s19068_s11 + $0x28] sm:$0xff]  }
 0xbbe   :  { %v8596_v9 = vmax.f32 %v8592_v18, 0.0  ;;  %v15428_v18 = vld [vmem:[%s19068_s11 + $0x30] sm:$0xff]  }
 0xbbf   :  { %v8594_v38 = vmax.f32 %v8590_v34, 0.0 }
 0xbc0   :  { %v8598_v62 = vpack.c.bf16 %v8596_v9, %v8595_v1 }
 0xbc1   :  { %v8597_v28 = vpack.c.bf16 %v8594_v38, %v8593_v39 }
 0xbc3   :  { %13922 = vmatprep.subr.bf16.mxu1 %v8597_v28 }
 0xbc4   :  { %13923 = vmatpush3.bf16.msra.mxu1 %v8597_v28 }
 0xbc5   :  { %13924 = vmatprep.subr.bf16.mxu1 %v8598_v62 }
 0xbc8   :  { %13925 = vmatpush3.bf16.msra.mxu1 %v8598_v62  ;;  %v15429_v62 = vld [vmem:[%s19068_s11 + $0x38] sm:$0xff]  }
 0xbc9   :  { %13962 = vmatprep.subr.bf16.mxu1 %v15406_v8 }
 0xbcb   :  { %13927 = vmatmul.mubr.msk.bf16.vlgmr.msra.gmra.mrb[216].mxu1 %vm8725_vm3, %v15397_v58 }
 0xbcc   :  { %13930 = vmatprep.mubr.msk.bf16.mxu1 %vm8725_vm3, %v15398_v55  ;;  %13963 = vmatpush3.bf16.msra.mxu1 %v15406_v8  ;;  %v15430_v8 = vld [vmem:[%s19068_s11 + $0x80] sm:$0xff]  }
 0xbcd   :  { %13964 = vmatprep.subr.bf16.mxu1 %v15407_v45 }
 0xbd0   :  { %13965 = vmatpush3.bf16.msra.mxu1 %v15407_v45 }
 0xbd1   :  { %13966 = vmatprep.subr.bf16.mxu1 %v15410_v42 }
 0xbd3   :  { %13931 = vmatmul.mubr.msk.bf16.gmra.mrb[220].mxu1 %vm8725_vm3, %v15399_v11 }
 0xbd4   :  { %13934 = vmatprep.mubr.msk.bf16.mxu1 %vm8725_vm3, %v15400_v0  ;;  %13967 = vmatpush3.bf16.msra.mxu1 %v15410_v42  ;;  %v15431_v0 = vld [vmem:[%s19068_s11 + $0x88] sm:$0xff]  }
 0xbd5   :  { %13968 = vmatprep.subr.bf16.mxu1 %v15411_v21 }
 0xbd8   :  { %13969 = vmatpush3.bf16.msra.mxu1 %v15411_v21  ;;  %v15432_v21 = vld [vmem:[%s19068_s11 + $0x90] sm:$0xff]  }
 0xbd9   :  { %13970 = vmatprep.subr.bf16.mxu1 %v15412_v29 }
 0xbdb   :  { %13935 = vmatmul.mubr.msk.bf16.gmra.mrb[224].mxu1 %vm8725_vm3, %v15401_v52  ;;  %v15434_v52 = vld [vmem:[%s19068_s11 + $0xa0] sm:$0xff]  }
 0xbdc   :  { %13938 = vmatprep.mubr.msk.bf16.mxu1 %vm8725_vm3, %v15402_v41  ;;  %13971 = vmatpush3.bf16.msra.mxu1 %v15412_v29  ;;  %v15433_v29 = vld [vmem:[%s19068_s11 + $0x98] sm:$0xff]   ;;  %v15435_v41 = vld [vmem:[%s19068_s11 + $0xa8] sm:$0xff]  }
 0xbdd   :  { %13972 = vmatprep.subr.bf16.mxu1 %v15415_v37 }
 0xbe0   :  { %13973 = vmatpush3.bf16.msra.mxu1 %v15415_v37  ;;  %v15436_v37 = vld [vmem:[%s19068_s11 + $0xb0] sm:$0xff]  }
 0xbe1   :  { %13974 = vmatprep.subr.bf16.mxu1 %v15418_v48 }
 0xbe3   :  { %13939 = vmatmul.mubr.msk.bf16.gmra.mrb[228].mxu1 %vm8725_vm3, %v15403_v20  ;;  %v15437_v20 = vld [vmem:[%s19068_s11 + $0xb8] sm:$0xff]  }
 0xbe4   :  { %13942 = vmatprep.mubr.msk.bf16.mxu1 %vm8725_vm3, %v15404_v17  ;;  %13975 = vmatpush3.bf16.msra.mxu1 %v15418_v48 }
 0xbe5   :  { %13976 = vmatprep.subr.bf16.mxu1 %v15421_v46 }
 0xbe8   :  { %13977 = vmatpush3.bf16.msra.mxu1 %v15421_v46 }
 0xbe9   :  { %13982 = vmatprep.subr.bf16.mxu1 %v15422_v49 }
 0xbeb   :  { %13943 = vmatmul.mubr.msk.bf16.gmra.mrb[232].mxu1 %vm8725_vm3, %v15405_v23 }
 0xbec   :  { %13946 = vmatprep.mubr.msk.bf16.mxu1 %vm8725_vm3, %v15408_v35 }
 0xbf3   :  { %13947 = vmatmul.mubr.msk.bf16.gmra.mrb[236].mxu1 %vm8725_vm3, %v15409_v32 }
 0xbf4   :  { %13950 = vmatprep.mubr.msk.bf16.mxu1 %vm8725_vm3, %v15413_v51  ;;  %v15438_v51 = vld [vmem:[%s19068_s11 + $0xc0] sm:$0xff]  }
 0xbfb   :  { %13951 = vmatmul.mubr.msk.bf16.gmra.mrb[240].mxu1 %vm8725_vm3, %v15414_v43 }
 0xbfc   :  { %13954 = vmatprep.mubr.msk.bf16.mxu1 %vm8725_vm3, %v15416_v33  ;;  %v15439_v33 = vld [vmem:[%s19068_s11 + $0xc8] sm:$0xff]  }
 0xc03   :  { %13955 = vmatmul.mubr.msk.bf16.gmra.mrb[244].mxu1 %vm8725_vm3, %v15417_v19 }
 0xc04   :  { %13958 = vmatprep.mubr.msk.bf16.mxu1 %vm8725_vm3, %v15419_v7 }
 0xc0b   :  { %13959 = vmatmul.mubr.msk.bf16.gmra.mrb[248].mxu1 %vm8725_vm3, %v15420_v4  ;;  %v15440_v4 = vld [vmem:[%s19068_s11 + $0xd0] sm:$0xff]  }
 0xc9e   :  { %v18251_v40 = vpop.f32.mrb[216].mxu1 }
 0xc9f   :  { %v8814_v54 = vpop.f32.mrb[217].mxu1 }
 0xca0   :  { %v13929_v30 = vpop.f32.mrb[218].mxu1 }
 0xca1   :  { %v8958_v25 = vpack.c.bf16 %v13929_v30, %v18251_v40  ;;  %v8817_v44 = vpop.f32.mrb[219].mxu1  ;;  %v15441_v30 = vld [vmem:[%s19068_s11 + $0xd8] sm:$0xff]  }
 0xca2   :  { %v8957_v31 = vpack.c.bf16 %v8817_v44, %v8814_v54 }
 0xca6   :  { %v13932_v3 = vpop.f32.mrb[220].mxu1 }
 0xca7   :  { %v8830_v50 = vpop.f32.mrb[221].mxu1 }
 0xca8   :  { %v13933_v53 = vpop.f32.mrb[222].mxu1 }
 0xca9   :  { %v8960_v59 = vpack.c.bf16 %v13933_v53, %v13932_v3  ;;  %v8833_v27 = vpop.f32.mrb[223].mxu1 }
 0xcaa   :  { %v8959_v60 = vpack.c.bf16 %v8833_v27, %v8830_v50  ;;  %v15443_v27 = vld [vmem:[%s19068_s11 + $0xe8] sm:$0xff]  }
 0xcac   :  { %13978 = vmatprep.mubr.bf16.mxu1 %v8959_v60  ;;  %v15444_v60 = vld [vmem:[%s19068_s11 + $0xf0] sm:$0xff]  }
 0xcad   :  { %13979 = vmatmul.mubr.bf16.vlgmr.msra.gmra.mrb[252].mxu1 %v8960_v59 }
 0xcae   :  { %13983 = vmatpush3.bf16.msra.mxu1 %v15422_v49  ;;  %13998 = vmatprep.mubr.bf16.mxu1 %v8957_v31  ;;  %v18257_v56 = vpop.f32.mrb[224].mxu1  ;;  %v15442_v31 = vld [vmem:[%s19068_s11 + $0xe0] sm:$0xff]  }
 0xcaf   :  { %13984 = vmatprep.subr.bf16.mxu1 %v15423_v47  ;;  %v8846_v15 = vpop.f32.mrb[225].mxu1 }
 0xcb0   :  { %v18262_v63 = vpop.f32.mrb[226].mxu1 }
 0xcb1   :  { %v8962_v57 = vpack.c.bf16 %v18262_v63, %v18257_v56  ;;  %v8849_v36 = vpop.f32.mrb[227].mxu1  ;;  %v15446_v56 = vld [vmem:[%s19068_s11 + $0x100] sm:$0xff]   ;;  %v15449_v63 = vld [vmem:[%s19068_s11 + $0x118] sm:$0xff]  }
 0xcb2   :  { %13985 = vmatpush3.bf16.msra.mxu1 %v15423_v47  ;;  %v8961_v16 = vpack.c.bf16 %v8849_v36, %v8846_v15  ;;  %v15445_v47 = vld [vmem:[%s19068_s11 + $0xf8] sm:$0xff]   ;;  %v15448_v15 = vld [vmem:[%s19068_s11 + $0x110] sm:$0xff]   ;;  %v15451_v36 = vld [vmem:[%s19068_s11 + $0x128] sm:$0xff]  }
 0xcb3   :  { %13986 = vmatprep.subr.bf16.mxu1 %v15424_v2 }
 0xcb6   :  { %13987 = vmatpush3.bf16.msra.mxu1 %v15424_v2  ;;  %v18269_v10 = vpop.f32.mrb[228].mxu1  ;;  %v15447_v2 = vld [vmem:[%s19068_s11 + $0x108] sm:$0xff]  }
 0xcb7   :  { %13988 = vmatprep.subr.bf16.mxu1 %v15425_v5  ;;  %v18274_v14 = vpop.f32.mrb[229].mxu1 }
 0xcb8   :  { %v18276_v12 = vpop.f32.mrb[230].mxu1 }
 0xcb9   :  { %v8964_v22 = vpack.c.bf16 %v18276_v12, %v18269_v10  ;;  %v18280_v6 = vpop.f32.mrb[231].mxu1  ;;  %v15454_v10 = vld [vmem:[%s19068_s11 + $0x140] sm:$0xff]   ;;  %v15457_v12 = vld [vmem:[%s19068_s11 + $0x158] sm:$0xff]  }
 0xcba   :  { %13989 = vmatpush3.bf16.msra.mxu1 %v15425_v5  ;;  %v8963_v61 = vpack.c.bf16 %v18280_v6, %v18274_v14  ;;  %v15453_v5 = vld [vmem:[%s19068_s11 + $0x138] sm:$0xff]   ;;  %v15456_v14 = vld [vmem:[%s19068_s11 + $0x150] sm:$0xff]   ;;  %v15459_v6 = vld [vmem:[%s19068_s11 + $0x168] sm:$0xff]  }
 0xcbb   :  { %13990 = vmatprep.subr.bf16.mxu1 %v15426_v26 }
 0xcbe   :  { %13991 = vmatpush3.bf16.msra.mxu1 %v15426_v26  ;;  %v18287_v13 = vpop.f32.mrb[232].mxu1  ;;  %v15455_v26 = vld [vmem:[%s19068_s11 + $0x148] sm:$0xff]  }
 0xcbf   :  { %13992 = vmatprep.subr.bf16.mxu1 %v15427_v24  ;;  %v18292_v34 = vpop.f32.mrb[233].mxu1 }
 0xcc0   :  { %v18294_v1 = vpop.f32.mrb[234].mxu1 }
 0xcc1   :  { %v8966_v9 = vpack.c.bf16 %v18294_v1, %v18287_v13  ;;  %v18298_v39 = vpop.f32.mrb[235].mxu1  ;;  %v15462_v13 = vld [vmem:[%s19068_s11 + $0x180] sm:$0xff]   ;;  %v15465_v1 = vld [vmem:[%s19068_s11 + $0x198] sm:$0xff]  }
 0xcc2   :  { %13993 = vmatpush3.bf16.msra.mxu1 %v15427_v24  ;;  %v8965_v38 = vpack.c.bf16 %v18298_v39, %v18292_v34  ;;  %v15461_v24 = vld [vmem:[%s19068_s11 + $0x178] sm:$0xff]   ;;  %v15464_v34 = vld [vmem:[%s19068_s11 + $0x190] sm:$0xff]   ;;  %v15467_v39 = vld [vmem:[%s19068_s11 + $0x1a8] sm:$0xff]  }
 0xcc3   :  { %13994 = vmatprep.subr.bf16.mxu1 %v15428_v18 }
 0xcc6   :  { %13995 = vmatpush3.bf16.msra.mxu1 %v15428_v18  ;;  %v18305_v28 = vpop.f32.mrb[236].mxu1  ;;  %v15463_v18 = vld [vmem:[%s19068_s11 + $0x188] sm:$0xff]  }
 0xcc7   :  { %13996 = vmatprep.subr.bf16.mxu1 %v15429_v62  ;;  %v18310_v58 = vpop.f32.mrb[237].mxu1 }
 0xcc8   :  { %v18312_v55 = vpop.f32.mrb[238].mxu1 }
 0xcc9   :  { %v8968_v45 = vpack.c.bf16 %v18312_v55, %v18305_v28  ;;  %v18316_v42 = vpop.f32.mrb[239].mxu1  ;;  %v15470_v28 = vld [vmem:[%s19068_s11 + $0x1c0] sm:$0xff]   ;;  %v15473_v55 = vld [vmem:[%s19068_s11 + $0x1d8] sm:$0xff]  }
 0xcca   :  { %13997 = vmatpush3.bf16.msra.mxu1 %v15429_v62  ;;  %v8967_v11 = vpack.c.bf16 %v18316_v42, %v18310_v58  ;;  %v15469_v62 = vld [vmem:[%s19068_s11 + $0x1b8] sm:$0xff]   ;;  %v15472_v58 = vld [vmem:[%s19068_s11 + $0x1d0] sm:$0xff]   ;;  %v15475_v42 = vld [vmem:[%s19068_s11 + $0x1e8] sm:$0xff]  }
 0xccb   :  { %14002 = vmatprep.subr.bf16.mxu1 %v15430_v8 }
 0xccd   :  { %13999 = vmatmul.mubr.bf16.vlgmr.msra.gmra.mrb[252].mxu1 %v8958_v25 }
 0xcce   :  { %14003 = vmatpush3.bf16.msra.mxu1 %v15430_v8  ;;  %14018 = vmatprep.mubr.bf16.mxu1 %v8961_v16  ;;  %v18338_v48 = vpop.f32.mrb[240].mxu1  ;;  %v15452_v16 = vld [vmem:[%s19068_s11 + $0x130] sm:$0xff]   ;;  %v15471_v8 = vld [vmem:[%s19068_s11 + $0x1c8] sm:$0xff]  }
 0xccf   :  { %14004 = vmatprep.subr.bf16.mxu1 %v15431_v0  ;;  %v18343_v17 = vpop.f32.mrb[241].mxu1 }
 0xcd0   :  { %v18345_v23 = vpop.f32.mrb[242].mxu1 }
 0xcd1   :  { %v8970_v35 = vpack.c.bf16 %v18345_v23, %v18338_v48  ;;  %v18349_v32 = vpop.f32.mrb[243].mxu1  ;;  %v15483_v48 = vld [vmem:[%s19068_s11 + $0x228] sm:$0xff]   ;;  %v19080_v23 = vmov 0  }
 0xcd2   :  { %14005 = vmatpush3.bf16.msra.mxu1 %v15431_v0  ;;  %v8969_v43 = vpack.c.bf16 %v18349_v32, %v18343_v17  ;;  %v15477_v0 = vld [vmem:[%s19068_s11 + $0x1f8] sm:$0xff]   ;;  %v12475_v32 = vld [vmem:[%s19072_s12] ss:$0 sm:$0xff] }
 0xcd3   :  { %14006 = vmatprep.subr.bf16.mxu1 %v15432_v21  ;;  %v15485_v17 = vld [vmem:[%s19068_s11 + $0x238] sm:$0xff]  }
 0xcd6   :  { %14007 = vmatpush3.bf16.msra.mxu1 %v15432_v21  ;;  %v18362_v19 = vpop.f32.mrb[244].mxu1  ;;  %v15478_v21 = vld [vmem:[%s19068_s11 + $0x200] sm:$0xff]  }
 0xcd7   :  { %14008 = vmatprep.subr.bf16.mxu1 %v15433_v29  ;;  %v18364_v7 = vpop.f32.mrb[245].mxu1 }
 0xcd8   :  { %v18369_v46 = vpop.f32.mrb[246].mxu1 }
 0xcd9   :  { %v8972_v49 = vpack.c.bf16 %v18369_v46, %v18362_v19  ;;  %v18373_v40 = vpop.f32.mrb[247].mxu1 }
 0xcda   :  { %14009 = vmatpush3.bf16.msra.mxu1 %v15433_v29  ;;  %v8971_v54 = vpack.c.bf16 %v18373_v40, %v18364_v7  ;;  %v15479_v29 = vld [vmem:[%s19068_s11 + $0x208] sm:$0xff]  }
 0xcdb   :  { %14010 = vmatprep.subr.bf16.mxu1 %v15434_v52 }
 0xcde   :  { %14011 = vmatpush3.bf16.msra.mxu1 %v15434_v52  ;;  %v18380_v25 = vpop.f32.mrb[248].mxu1  ;;  %v15480_v52 = vld [vmem:[%s19068_s11 + $0x210] sm:$0xff]  }
 0xcdf   :  { %14012 = vmatprep.subr.bf16.mxu1 %v15435_v41  ;;  %v18382_v44 = vpop.f32.mrb[249].mxu1 }
 0xce0   :  { %v18387_v3 = vpop.f32.mrb[250].mxu1 }
 0xce1   :  { %v8974_v50 = vpack.c.bf16 %v18387_v3, %v18380_v25  ;;  %v18391_v53 = vpop.f32.mrb[251].mxu1  ;;  %v15492_v3 = vld [vmem:[%s19071_s14 + $0x84] ss:$8 sps:$4 sm:$0xff]  }
 0xce2   :  { %14013 = vmatpush3.bf16.msra.mxu1 %v15435_v41  ;;  %v8973_v59 = vpack.c.bf16 %v18391_v53, %v18382_v44  ;;  %v15481_v41 = vld [vmem:[%s19068_s11 + $0x218] sm:$0xff]   ;;  %v15490_v53 = vld [vmem:[%s19071_s14 + $0x80] ss:$8 sps:$4 sm:$0xff]  }
 0xce3   :  { %14014 = vmatprep.subr.bf16.mxu1 %v15436_v37 }
 0xce6   :  { %14015 = vmatpush3.bf16.msra.mxu1 %v15436_v37  ;;  %v15482_v37 = vld [vmem:[%s19068_s11 + $0x220] sm:$0xff]  }
 0xce7   :  { %14016 = vmatprep.subr.bf16.mxu1 %v15437_v20 }
 0xcea   :  { %14017 = vmatpush3.bf16.msra.mxu1 %v15437_v20  ;;  %v15484_v20 = vld [vmem:[%s19068_s11 + $0x230] sm:$0xff]  }
 0xceb   :  { %14022 = vmatprep.subr.bf16.mxu1 %v15438_v51 }
 0xced   :  { %14019 = vmatmul.mubr.bf16.vlgmr.msra.gmra.mrb[252].mxu1 %v8962_v57  ;;  %v15450_v57 = vld [vmem:[%s19068_s11 + $0x120] sm:$0xff]  }
 0xcee   :  { %14023 = vmatpush3.bf16.msra.mxu1 %v15438_v51  ;;  %14038 = vmatprep.mubr.bf16.mxu1 %v8963_v61  ;;  %v15460_v61 = vld [vmem:[%s19068_s11 + $0x170] sm:$0xff]  }
 0xcef   :  { %14024 = vmatprep.subr.bf16.mxu1 %v15439_v33 }
 0xcf2   :  { %14025 = vmatpush3.bf16.msra.mxu1 %v15439_v33 }
 0xcf3   :  { %14026 = vmatprep.subr.bf16.mxu1 %v15440_v4 }
 0xcf6   :  { %14027 = vmatpush3.bf16.msra.mxu1 %v15440_v4 }
 0xcf7   :  { %14028 = vmatprep.subr.bf16.mxu1 %v15441_v30 }
 0xcfa   :  { %14029 = vmatpush3.bf16.msra.mxu1 %v15441_v30 }
 0xcfb   :  { %14030 = vmatprep.subr.bf16.mxu1 %v15442_v31 }
 0xcfe   :  { %14031 = vmatpush3.bf16.msra.mxu1 %v15442_v31 }
 0xcff   :  { %14032 = vmatprep.subr.bf16.mxu1 %v15443_v27 }
 0xd02   :  { %14033 = vmatpush3.bf16.msra.mxu1 %v15443_v27  ;;  %v15493_v27 = vld [vmem:[%s19071_s14 + $0x90] ss:$8 sps:$4 sm:$0xff]  }
 0xd03   :  { %14034 = vmatprep.subr.bf16.mxu1 %v15444_v60 }
 0xd06   :  { %14035 = vmatpush3.bf16.msra.mxu1 %v15444_v60  ;;  %v15498_v60 = vld [vmem:[%s19071_s14 + $0xa4] ss:$8 sps:$4 sm:$0xff]  }
 0xd07   :  { %14036 = vmatprep.subr.bf16.mxu1 %v15445_v47 }
 0xd0a   :  { %14037 = vmatpush3.bf16.msra.mxu1 %v15445_v47  ;;  %v15487_v47 = vld [vmem:[%s19070_s13 + $0x8] sm:$0xff]  }
 0xd0b   :  { %14042 = vmatprep.subr.bf16.mxu1 %v15446_v56 }
 0xd0d   :  { %14039 = vmatmul.mubr.bf16.vlgmr.msra.gmra.mrb[252].mxu1 %v8964_v22  ;;  %v15458_v22 = vld [vmem:[%s19068_s11 + $0x160] sm:$0xff]  }
 0xd0e   :  { %14043 = vmatpush3.bf16.msra.mxu1 %v15446_v56  ;;  %14058 = vmatprep.mubr.bf16.mxu1 %v8965_v38  ;;  %v15468_v38 = vld [vmem:[%s19068_s11 + $0x1b0] sm:$0xff]   ;;  %v15496_v56 = vld [vmem:[%s19071_s14 + $0xa0] ss:$8 sps:$4 sm:$0xff]  }
 0xd0f   :  { %14044 = vmatprep.subr.bf16.mxu1 %v15447_v2 }
 0xd12   :  { %14045 = vmatpush3.bf16.msra.mxu1 %v15447_v2  ;;  %v15501_v2 = vld [vmem:[%s19071_s14 + $0xb4] ss:$8 sps:$4 sm:$0xff]  }
 0xd13   :  { %14046 = vmatprep.subr.bf16.mxu1 %v15448_v15 }
 0xd16   :  { %14047 = vmatpush3.bf16.msra.mxu1 %v15448_v15  ;;  %v15499_v15 = vld [vmem:[%s19071_s14 + $0xb0] ss:$8 sps:$4 sm:$0xff]  }
 0xd17   :  { %14048 = vmatprep.subr.bf16.mxu1 %v15449_v63 }
 0xd1a   :  { %14049 = vmatpush3.bf16.msra.mxu1 %v15449_v63  ;;  %v15505_v63 = vld [vmem:[%s19071_s14 + $0xc4] ss:$8 sps:$4 sm:$0xff]  }
 0xd1b   :  { %14050 = vmatprep.subr.bf16.mxu1 %v15450_v57 }
 0xd1e   :  { %14051 = vmatpush3.bf16.msra.mxu1 %v15450_v57  ;;  %v15488_v57 = vld [vmem:[%s19070_s13 + $0x10] sm:$0xff]  }
 0xd1f   :  { %14052 = vmatprep.subr.bf16.mxu1 %v15451_v36 }
 0xd22   :  { %14053 = vmatpush3.bf16.msra.mxu1 %v15451_v36  ;;  %v15503_v36 = vld [vmem:[%s19071_s14 + $0xc0] ss:$8 sps:$4 sm:$0xff]  }
 0xd23   :  { %14054 = vmatprep.subr.bf16.mxu1 %v15452_v16 }
 0xd26   :  { %14055 = vmatpush3.bf16.msra.mxu1 %v15452_v16  ;;  %v15508_v16 = vld [vmem:[%s19071_s14 + $0xd4] ss:$8 sps:$4 sm:$0xff]  }
 0xd27   :  { %14056 = vmatprep.subr.bf16.mxu1 %v15453_v5 }
 0xd2a   :  { %14057 = vmatpush3.bf16.msra.mxu1 %v15453_v5  ;;  %v15506_v5 = vld [vmem:[%s19071_s14 + $0xd0] ss:$8 sps:$4 sm:$0xff]  }
 0xd2b   :  { %14062 = vmatprep.subr.bf16.mxu1 %v15454_v10 }
 0xd2d   :  { %14059 = vmatmul.mubr.bf16.vlgmr.msra.gmra.mrb[252].mxu1 %v8966_v9  ;;  %v15466_v9 = vld [vmem:[%s19068_s11 + $0x1a0] sm:$0xff]  }
 0xd2e   :  { %14063 = vmatpush3.bf16.msra.mxu1 %v15454_v10  ;;  %14078 = vmatprep.mubr.bf16.mxu1 %v8967_v11  ;;  %v15476_v11 = vld [vmem:[%s19068_s11 + $0x1f0] sm:$0xff]   ;;  %v15511_v10 = vld [vmem:[%s19071_s14 + $0xe4] ss:$8 sps:$4 sm:$0xff]  }
 0xd2f   :  { %14064 = vmatprep.subr.bf16.mxu1 %v15455_v26 }
 0xd32   :  { %14065 = vmatpush3.bf16.msra.mxu1 %v15455_v26  ;;  %v15489_v26 = vld [vmem:[%s19070_s13 + $0x18] sm:$0xff]  }
 0xd33   :  { %14066 = vmatprep.subr.bf16.mxu1 %v15456_v14 }
 0xd36   :  { %14067 = vmatpush3.bf16.msra.mxu1 %v15456_v14  ;;  %v15509_v14 = vld [vmem:[%s19071_s14 + $0xe0] ss:$8 sps:$4 sm:$0xff]  }
 0xd37   :  { %14068 = vmatprep.subr.bf16.mxu1 %v15457_v12 }
 0xd3a   :  { %14069 = vmatpush3.bf16.msra.mxu1 %v15457_v12  ;;  %v15502_v12 = vld [vmem:[%s19070_s13 + $0x20] ss:$0 sps:$4 sm:$0xff]  }
 0xd3b   :  { %14070 = vmatprep.subr.bf16.mxu1 %v15458_v22 }
 0xd3e   :  { %14071 = vmatpush3.bf16.msra.mxu1 %v15458_v22  ;;  %v15514_v22 = vld [vmem:[%s19071_s14 + $0xf4] ss:$8 sps:$4 sm:$0xff]  }
 0xd3f   :  { %14072 = vmatprep.subr.bf16.mxu1 %v15459_v6 }
 0xd42   :  { %14073 = vmatpush3.bf16.msra.mxu1 %v15459_v6  ;;  %v15512_v6 = vld [vmem:[%s19071_s14 + $0xf0] ss:$8 sps:$4 sm:$0xff]  }
 0xd43   :  { %14074 = vmatprep.subr.bf16.mxu1 %v15460_v61 }
 0xd46   :  { %14075 = vmatpush3.bf16.msra.mxu1 %v15460_v61  ;;  %v15517_v61 = vld [vmem:[%s19071_s14 + $0x4] ss:$8 sps:$4 sm:$0xff]  }
 0xd47   :  { %14076 = vmatprep.subr.bf16.mxu1 %v15461_v24 }
 0xd4a   :  { %14077 = vmatpush3.bf16.msra.mxu1 %v15461_v24 }
 0xd4b   :  { %14082 = vmatprep.subr.bf16.mxu1 %v15462_v13 }
 0xd4d   :  { %14079 = vmatmul.mubr.bf16.vlgmr.msra.gmra.mrb[252].mxu1 %v8968_v45  ;;  %v15474_v45 = vld [vmem:[%s19068_s11 + $0x1e0] sm:$0xff]  }
 0xd4e   :  { %14083 = vmatpush3.bf16.msra.mxu1 %v15462_v13  ;;  %14098 = vmatprep.mubr.bf16.mxu1 %v8969_v43 }
 0xd4f   :  { %14084 = vmatprep.subr.bf16.mxu1 %v15463_v18 }
 0xd52   :  { %14085 = vmatpush3.bf16.msra.mxu1 %v15463_v18 }
 0xd53   :  { %14086 = vmatprep.subr.bf16.mxu1 %v15464_v34 }
 0xd56   :  { %14087 = vmatpush3.bf16.msra.mxu1 %v15464_v34 }
 0xd57   :  { %14088 = vmatprep.subr.bf16.mxu1 %v15465_v1 }
 0xd5a   :  { %14089 = vmatpush3.bf16.msra.mxu1 %v15465_v1 }
 0xd5b   :  { %14090 = vmatprep.subr.bf16.mxu1 %v15466_v9 }
 0xd5e   :  { %14091 = vmatpush3.bf16.msra.mxu1 %v15466_v9  ;;  %v15613_v9 = vld [vmem:[%s19071_s14 + $0x304] ss:$8 sps:$4 sm:$0xff]  }
 0xd5f   :  { %14092 = vmatprep.subr.bf16.mxu1 %v15467_v39 }
 0xd62   :  { %14093 = vmatpush3.bf16.msra.mxu1 %v15467_v39  ;;  %v15515_v39 = vld [vmem:[%s19071_s14] ss:$8 sps:$4 sm:$0xff]  }
 0xd63   :  { %14094 = vmatprep.subr.bf16.mxu1 %v15468_v38 }
 0xd66   :  { %14095 = vmatpush3.bf16.msra.mxu1 %v15468_v38  ;;  %v15611_v38 = vld [vmem:[%s19071_s14 + $0x300] ss:$8 sps:$4 sm:$0xff]  }
 0xd67   :  { %14096 = vmatprep.subr.bf16.mxu1 %v15469_v62 }
 0xd6a   :  { %14097 = vmatpush3.bf16.msra.mxu1 %v15469_v62 }
 0xd6b   :  { %14102 = vmatprep.subr.bf16.mxu1 %v15470_v28 }
 0xd6d   :  { %14099 = vmatmul.mubr.bf16.vlgmr.msra.gmra.mrb[252].mxu1 %v8970_v35  ;;  %v15708_v35 = vmov 0.0  }
 0xd6e   :  { %14103 = vmatpush3.bf16.msra.mxu1 %v15470_v28  ;;  %14118 = vmatprep.mubr.bf16.mxu1 %v8971_v54  ;;  %v15520_v28 = vld [vmem:[%s19071_s14 + $0x14] ss:$8 sps:$4 sm:$0xff]  }
 0xd6f   :  { %14104 = vmatprep.subr.bf16.mxu1 %v15471_v8  ;;  %14142 = vmatprep.subr.bf16.mxu0 %v15708_v35 }
 0xd70   :  { %14146 = vmatprep.mubr.msk.bf16.mxu0 %vm15709_vm4, %v15708_v35 }
 0xd72   :  { %14105 = vmatpush3.bf16.msra.mxu1 %v15471_v8  ;;  %v15619_v8 = vld [vmem:[%s19071_s14 + $0x314] ss:$8 sps:$4 sm:$0xff]  }
 0xd73   :  { %14106 = vmatprep.subr.bf16.mxu1 %v15472_v58 }
 0xd76   :  { %14107 = vmatpush3.bf16.msra.mxu1 %v15472_v58  ;;  %v15518_v58 = vld [vmem:[%s19071_s14 + $0x10] ss:$8 sps:$4 sm:$0xff]  }
 0xd77   :  { %14108 = vmatprep.subr.bf16.mxu1 %v15473_v55 }
 0xd7a   :  { %14109 = vmatpush3.bf16.msra.mxu1 %v15473_v55 }
 0xd7b   :  { %14110 = vmatprep.subr.bf16.mxu1 %v15474_v45 }
 0xd7e   :  { %14111 = vmatpush3.bf16.msra.mxu1 %v15474_v45  ;;  %v15617_v45 = vld [vmem:[%s19071_s14 + $0x310] ss:$8 sps:$4 sm:$0xff]  }
 0xd7f   :  { %14112 = vmatprep.subr.bf16.mxu1 %v15475_v42 }
 0xd82   :  { %14113 = vmatpush3.bf16.msra.mxu1 %v15475_v42  ;;  %v15523_v42 = vld [vmem:[%s19071_s14 + $0x24] ss:$8 sps:$4 sm:$0xff]  }
 0xd83   :  { %14114 = vmatprep.subr.bf16.mxu1 %v15476_v11 }
 0xd86   :  { %14115 = vmatpush3.bf16.msra.mxu1 %v15476_v11 }
 0xd87   :  { %14116 = vmatprep.subr.bf16.mxu1 %v15477_v0 }
 0xd8a   :  { %14117 = vmatpush3.bf16.msra.mxu1 %v15477_v0 }
 0xd8b   :  { %14122 = vmatprep.subr.bf16.mxu1 %v15478_v21 }
 0xd8d   :  { %14119 = vmatmul.mubr.bf16.vlgmr.msra.gmra.mrb[252].mxu1 %v8972_v49 }
 0xd8e   :  { %14123 = vmatpush3.bf16.msra.mxu1 %v15478_v21  ;;  %14138 = vmatprep.mubr.bf16.mxu1 %v8973_v59  ;;  %v15495_v59 = vld [vmem:[%s19071_s14 + $0x94] ss:$8 sps:$4 sm:$0xff]  }
 0xd8f   :  { %14124 = vmatprep.subr.bf16.mxu1 %v15479_v29 }
 0xd92   :  { %14125 = vmatpush3.bf16.msra.mxu1 %v15479_v29 }
 0xd93   :  { %14126 = vmatprep.subr.bf16.mxu1 %v15480_v52 }
 0xd96   :  { %14127 = vmatpush3.bf16.msra.mxu1 %v15480_v52  ;;  %v15625_v52 = vld [vmem:[%s19071_s14 + $0x324] ss:$8 sps:$4 sm:$0xff]  }
 0xd97   :  { %14128 = vmatprep.subr.bf16.mxu1 %v15481_v41 }
 0xd9a   :  { %14129 = vmatpush3.bf16.msra.mxu1 %v15481_v41  ;;  %v15521_v41 = vld [vmem:[%s19071_s14 + $0x20] ss:$8 sps:$4 sm:$0xff]  }
 0xd9b   :  { %14130 = vmatprep.subr.bf16.mxu1 %v15482_v37 }
 0xd9e   :  { %14131 = vmatpush3.bf16.msra.mxu1 %v15482_v37  ;;  %v15623_v37 = vld [vmem:[%s19071_s14 + $0x320] ss:$8 sps:$4 sm:$0xff]  }
 0xd9f   :  { %14132 = vmatprep.subr.bf16.mxu1 %v15483_v48 }
 0xda2   :  { %14133 = vmatpush3.bf16.msra.mxu1 %v15483_v48  ;;  %v15526_v48 = vld [vmem:[%s19071_s14 + $0x34] ss:$8 sps:$4 sm:$0xff]  }
 0xda3   :  { %14134 = vmatprep.subr.bf16.mxu1 %v15484_v20 }
 0xda6   :  { %14135 = vmatpush3.bf16.msra.mxu1 %v15484_v20  ;;  %v15631_v20 = vld [vmem:[%s19071_s14 + $0x334] ss:$8 sps:$4 sm:$0xff]  }
 0xda7   :  { %14136 = vmatprep.subr.bf16.mxu1 %v15485_v17 }
 0xdaa   :  { %14137 = vmatpush3.bf16.msra.mxu1 %v15485_v17  ;;  %v15524_v17 = vld [vmem:[%s19071_s14 + $0x30] ss:$8 sps:$4 sm:$0xff]  }
 0xdab   :  { %11110 = vmatprep.subr.bf16.mxu1 %v15613_v9  ;;  %v15680_v9 = vld [vmem:[%s19071_s14 + $0x430] ss:$8 sps:$4 sm:$0xff]  }
 0xdad   :  { %14139 = vmatmul.mubr.bf16.vlgmr.msra.gmra.mrb[252].mxu1 %v8974_v50  ;;  %v15486_v50 = vld [vmem:[%s19070_s13] sm:$0xff]  }
 0xdae   :  { %11142 = vmatprep.mubr.bf16.mxu1 %v19080_v23  ;;  %11111 = vmatpush1.bf16.msra.mxu1 %v15611_v38  ;;  %v15688_v38 = vld [vmem:[%s19071_s14 + $0x444] ss:$8 sps:$4 sm:$0xff]  }
 0xdaf   :  { %11112 = vmatprep.subr.bf16.mxu1 %v15619_v8  ;;  %v15554_v8 = vld [vmem:[%s19071_s14 + $0x150] ss:$8 sps:$4 sm:$0xff]  }
 0xdb2   :  { %11113 = vmatpush1.bf16.msra.mxu1 %v15617_v45  ;;  %v15692_v45 = vld [vmem:[%s19071_s14 + $0x450] ss:$8 sps:$4 sm:$0xff]  }
 0xdb3   :  { %11114 = vmatprep.subr.bf16.mxu1 %v15625_v52  ;;  %v15560_v52 = vld [vmem:[%s19071_s14 + $0x170] ss:$8 sps:$4 sm:$0xff]  }
 0xdb6   :  { %11115 = vmatpush1.bf16.msra.mxu1 %v15623_v37  ;;  %v15565_v37 = vld [vmem:[%s19071_s14 + $0x184] ss:$8 sps:$4 sm:$0xff]  }
 0xdb7   :  { %11116 = vmatprep.subr.bf16.mxu1 %v15631_v20 }
 0xe80   :  { %v14140_v51 = vpop.f32.mrb[252].mxu1 }
 0xe81   :  { %v10037_v43 = vadd.f32 %v14140_v51, %v12475_v32  ;;  %v10009_v33 = vpop.f32.mrb[253].mxu1  ;;  %v15529_v51 = vld [vmem:[%s19071_s14 + $0x44] ss:$8 sps:$4 sm:$0xff]  }
 0xe82   :  { %v10035_v19 = vadd.f32 %v12475_v32, %v10009_v33  ;;  %v14141_v7 = vpop.f32.mrb[254].mxu1 }
 0xe83   :  { %v10038_v4 = vadd.f32 %v14141_v7, %v12475_v32  ;;  %v10012_v46 = vpop.f32.mrb[255].mxu1  ;;  %v10041_v40 = vmax.f32 %v10037_v43, 0.0 }
 0xe84   :  { %v10036_v49 = vadd.f32 %v12475_v32, %v10012_v46  ;;  %v10039_v30 = vmax.f32 %v10035_v19, 0.0  ;;  %v15629_v32 = vld [vmem:[%s19071_s14 + $0x330] ss:$8 sps:$4 sm:$0xff]   ;;  %v15527_v46 = vld [vmem:[%s19071_s14 + $0x40] ss:$8 sps:$4 sm:$0xff]  }
 0xe85   :  { %v10042_v54 = vmax.f32 %v10038_v4, 0.0  ;;  %11117 = vmatpush1.bf16.msra.mxu1 %v15629_v32  ;;  %v15637_v4 = vld [vmem:[%s19071_s14 + $0x344] ss:$8 sps:$4 sm:$0xff]  }
 0xe86   :  { %v10040_v25 = vmax.f32 %v10036_v49, 0.0  ;;  %v15635_v49 = vld [vmem:[%s19071_s14 + $0x340] ss:$8 sps:$4 sm:$0xff]   ;;  %11118 = vmatprep.subr.bf16.mxu1 %v15637_v4  ;;  %v15571_v4 = vld [vmem:[%s19071_s14 + $0x1a4] ss:$8 sps:$4 sm:$0xff]  }
 0xe87   :  { %v10044_v44 = vpack.c.bf16 %v10042_v54, %v10041_v40  ;;  %v15532_v40 = vld [vmem:[%s19071_s14 + $0x54] ss:$8 sps:$4 sm:$0xff]  }
 0xe88   :  { %v10043_v31 = vpack.c.bf16 %v10040_v25, %v10039_v30  ;;  %v15643_v54 = vld [vmem:[%s19071_s14 + $0x354] ss:$8 sps:$4 sm:$0xff]   ;;  %v15530_v30 = vld [vmem:[%s19071_s14 + $0x50] ss:$8 sps:$4 sm:$0xff]  }
 0xe89   :  { %11119 = vmatpush1.bf16.msra.mxu1 %v15635_v49  ;;  %v15641_v25 = vld [vmem:[%s19071_s14 + $0x350] ss:$8 sps:$4 sm:$0xff]   ;;  %v15574_v49 = vld [vmem:[%s19071_s14 + $0x1b4] ss:$8 sps:$4 sm:$0xff]  }
 0xe8a   :  { %14143 = vmatpush3.bf16.msra.mxu0 %v10043_v31  ;;  %11120 = vmatprep.subr.bf16.mxu1 %v15643_v54  ;;  %v15649_v31 = vld [vmem:[%s19071_s14 + $0x364] ss:$8 sps:$4 sm:$0xff]  }
 0xe8b   :  { %14144 = vmatprep.subr.bf16.mxu0 %v15708_v35  ;;  %v15577_v54 = vld [vmem:[%s19071_s14 + $0x1c4] ss:$8 sps:$4 sm:$0xff]  }
 0xe8d   :  { %11121 = vmatpush1.bf16.msra.mxu1 %v15641_v25  ;;  %v15580_v25 = vld [vmem:[%s19071_s14 + $0x1d4] ss:$8 sps:$4 sm:$0xff]  }
 0xe8e   :  { %14145 = vmatpush3.bf16.msra.mxu0 %v10044_v44  ;;  %v15535_v44 = vld [vmem:[%s19071_s14 + $0x64] ss:$8 sps:$4 sm:$0xff]   ;;  %11122 = vmatprep.subr.bf16.mxu1 %v15649_v31 }
 0xe8f   :  { %10285 = vmatprep.subr.bf16.mxu0 %v15492_v3  ;;  %v15533_v3 = vld [vmem:[%s19071_s14 + $0x60] ss:$8 sps:$4 sm:$0xff]   ;;  %v15583_v31 = vld [vmem:[%s19071_s14 + $0x1e4] ss:$8 sps:$4 sm:$0xff]  }
 0xe91   :  { %14147 = vmatmul.mubr.msk.bf16.vlgmr.msra.gmra.mrb[36].mxu0 %vm8725_vm3, %v15486_v50  ;;  %v15647_v50 = vld [vmem:[%s19071_s14 + $0x360] ss:$8 sps:$4 sm:$0xff]  }
 0xe92   :  { %14150 = vmatprep.mubr.msk.bf16.mxu0 %vm15709_vm4, %v15708_v35  ;;  %10286 = vmatpush1.bf16.msra.mxu0 %v15490_v53  ;;  %v15538_v53 = vld [vmem:[%s19071_s14 + $0x74] ss:$8 sps:$4 sm:$0xff]  }
 0xe93   :  { %10287 = vmatprep.subr.bf16.mxu0 %v15495_v59  ;;  %11123 = vmatpush1.bf16.msra.mxu1 %v15647_v50  ;;  %v15655_v59 = vld [vmem:[%s19071_s14 + $0x374] ss:$8 sps:$4 sm:$0xff]  }
 0xe94   :  { %11124 = vmatprep.subr.bf16.mxu1 %v15655_v59  ;;  %v15586_v50 = vld [vmem:[%s19071_s14 + $0x1f4] ss:$8 sps:$4 sm:$0xff]   ;;  %v15589_v59 = vld [vmem:[%s19071_s14 + $0x204] ss:$8 sps:$4 sm:$0xff]  }
 0xe96   :  { %10288 = vmatpush1.bf16.msra.mxu0 %v15493_v27  ;;  %v15536_v27 = vld [vmem:[%s19071_s14 + $0x70] ss:$8 sps:$4 sm:$0xff]  }
 0xe97   :  { %10289 = vmatprep.subr.bf16.mxu0 %v15498_v60 }
 0xe99   :  { %14151 = vmatmul.mubr.msk.bf16.gmra.mrb[40].mxu0 %vm8725_vm3, %v15487_v47  ;;  %v15653_v47 = vld [vmem:[%s19071_s14 + $0x370] ss:$8 sps:$4 sm:$0xff]  }
 0xe9a   :  { %14154 = vmatprep.mubr.msk.bf16.mxu0 %vm15709_vm4, %v15708_v35  ;;  %10290 = vmatpush1.bf16.msra.mxu0 %v15496_v56  ;;  %v15541_v56 = vld [vmem:[%s19071_s14 + $0x104] ss:$8 sps:$4 sm:$0xff]  }
 0xe9b   :  { %10291 = vmatprep.subr.bf16.mxu0 %v15501_v2  ;;  %11125 = vmatpush1.bf16.msra.mxu1 %v15653_v47  ;;  %v15592_v47 = vld [vmem:[%s19071_s14 + $0x214] ss:$8 sps:$4 sm:$0xff]  }
 0xe9e   :  { %10292 = vmatpush1.bf16.msra.mxu0 %v15499_v15 }
 0xe9f   :  { %10293 = vmatprep.subr.bf16.mxu0 %v15505_v63 }
 0xea1   :  { %14155 = vmatmul.mubr.msk.bf16.gmra.mrb[44].mxu0 %vm8725_vm3, %v15488_v57 }
 0xea2   :  { %14158 = vmatprep.mubr.msk.bf16.mxu0 %vm15709_vm4, %v15708_v35  ;;  %10294 = vmatpush1.bf16.msra.mxu0 %v15503_v36  ;;  %v15539_v36 = vld [vmem:[%s19071_s14 + $0x100] ss:$8 sps:$4 sm:$0xff]  }
 0xea3   :  { %10295 = vmatprep.subr.bf16.mxu0 %v15508_v16  ;;  %v15664_v16 = vld [vmem:[%s19071_s14 + $0x404] ss:$8 sps:$4 sm:$0xff]  }
 0xea4   :  { %11393 = vmatprep.subr.bf16.mxu1 %v15664_v16  ;;  %v15599_v16 = vld [vmem:[%s19071_s14 + $0x240] ss:$8 sps:$4 sm:$0xff]  }
 0xea6   :  { %10296 = vmatpush1.bf16.msra.mxu0 %v15506_v5  ;;  %v15544_v5 = vld [vmem:[%s19071_s14 + $0x114] ss:$8 sps:$4 sm:$0xff]  }
 0xea7   :  { %10297 = vmatprep.subr.bf16.mxu0 %v15511_v10  ;;  %v15662_v10 = vld [vmem:[%s19071_s14 + $0x400] ss:$8 sps:$4 sm:$0xff]  }
 0xea9   :  { %14159 = vmatmul.mubr.msk.bf16.gmra.mrb[48].mxu0 %vm8725_vm3, %v15489_v26  ;;  %v15542_v26 = vld [vmem:[%s19071_s14 + $0x110] ss:$8 sps:$4 sm:$0xff]  }
 0xeaa   :  { %14162 = vmatprep.mubr.msk.bf16.mxu0 %vm15709_vm4, %v15708_v35  ;;  %10298 = vmatpush1.bf16.msra.mxu0 %v15509_v14  ;;  %v15670_v14 = vld [vmem:[%s19071_s14 + $0x414] ss:$8 sps:$4 sm:$0xff]  }
 0xeab   :  { %10299 = vmatprep.subr.bf16.mxu0 %v15514_v22  ;;  %v15668_v22 = vld [vmem:[%s19071_s14 + $0x410] ss:$8 sps:$4 sm:$0xff]  }
 0xeae   :  { %10300 = vmatpush1.bf16.msra.mxu0 %v15512_v6  ;;  %v15545_v6 = vld [vmem:[%s19071_s14 + $0x120] ss:$8 sps:$4 sm:$0xff]  }
 0xeaf   :  { %10406 = vmatprep.subr.bf16.mxu0 %v15517_v61  ;;  %v15676_v61 = vld [vmem:[%s19071_s14 + $0x424] ss:$8 sps:$4 sm:$0xff]  }
 0xeb1   :  { %14163 = vmatmul.mubr.msk.bf16.gmra.mrb[52].mxu0 %vm8725_vm3, %v15502_v12  ;;  %v15547_v12 = vld [vmem:[%s19071_s14 + $0x124] ss:$8 sps:$4 sm:$0xff]  }
 0xeb2   :  { %10317 = vmatprep.mubr.bf16.mxu0 %v19080_v23 }
 0xf64   :  { %v10126_v24 = vpop.f32.mrb[36].mxu0 }
 0xf65   :  { %v14148_v13 = vpop.f32.mrb[37].mxu0 }
 0xf66   :  { %v10129_v18 = vpop.f32.mrb[38].mxu0  ;;  %v15674_v13 = vld [vmem:[%s19071_s14 + $0x420] ss:$8 sps:$4 sm:$0xff]  }
 0xf67   :  { %v18645_v34 = vpack.c.bf16 %v10129_v18, %v10126_v24  ;;  %v14149_v1 = vpop.f32.mrb[39].mxu0  ;;  %v15550_v24 = vld [vmem:[%s19071_s14 + $0x134] ss:$8 sps:$4 sm:$0xff]   ;;  %v15548_v18 = vld [vmem:[%s19071_s14 + $0x130] ss:$8 sps:$4 sm:$0xff]  }
 0xf68   :  { %v15553_v1 = vld [vmem:[%s19071_s14 + $0x144] ss:$8 sps:$4 sm:$0xff]  }
 0xf69   :  { %v10203_v62 = vrot.slane %v18645_v34, 4 }
 0xf6b   :  { %10318 = vmatmul.mubr.bf16.vlgmr.msra.gmra.mrb[56].mxu0 %v10203_v62  ;;  %v15556_v62 = vld [vmem:[%s19071_s14 + $0x154] ss:$8 sps:$4 sm:$0xff]  }
 0xf6c   :  { %10407 = vmatpush1.bf16.msra.mxu0 %v15515_v39  ;;  %10438 = vmatprep.mubr.bf16.mxu0 %v19080_v23  ;;  %v10134_v55 = vpop.f32.mrb[40].mxu0  ;;  %v15551_v39 = vld [vmem:[%s19071_s14 + $0x140] ss:$8 sps:$4 sm:$0xff]  }
 0xf6d   :  { %10408 = vmatprep.subr.bf16.mxu0 %v15520_v28  ;;  %v14152_v11 = vpop.f32.mrb[41].mxu0  ;;  %v15686_v28 = vld [vmem:[%s19071_s14 + $0x440] ss:$8 sps:$4 sm:$0xff]  }
 0xf6e   :  { %v10137_v0 = vpop.f32.mrb[42].mxu0  ;;  %v15700_v11 = vld [vmem:[%s19071_s14 + $0x464] ss:$8 sps:$4 sm:$0xff]  }
 0xf6f   :  { %v18673_v21 = vpack.c.bf16 %v10137_v0, %v10134_v55  ;;  %v14153_v29 = vpop.f32.mrb[43].mxu0  ;;  %v15559_v55 = vld [vmem:[%s19071_s14 + $0x164] ss:$8 sps:$4 sm:$0xff]   ;;  %v15562_v0 = vld [vmem:[%s19071_s14 + $0x174] ss:$8 sps:$4 sm:$0xff]  }
 0xf70   :  { %10409 = vmatpush1.bf16.msra.mxu0 %v15518_v58  ;;  %v15694_v58 = vld [vmem:[%s19071_s14 + $0x454] ss:$8 sps:$4 sm:$0xff]   ;;  %v15698_v29 = vld [vmem:[%s19071_s14 + $0x460] ss:$8 sps:$4 sm:$0xff]  }
 0xf71   :  { %10410 = vmatprep.subr.bf16.mxu0 %v15523_v42  ;;  %v15557_v42 = vld [vmem:[%s19071_s14 + $0x160] ss:$8 sps:$4 sm:$0xff]  }
 0xf74   :  { %10411 = vmatpush1.bf16.msra.mxu0 %v15521_v41  ;;  %v10142_v35 = vpop.f32.mrb[44].mxu0  ;;  %v15706_v41 = vld [vmem:[%s19071_s14 + $0x474] ss:$8 sps:$4 sm:$0xff]  }
 0xf75   :  { %10412 = vmatprep.subr.bf16.mxu0 %v15526_v48  ;;  %v14156_v43 = vpop.f32.mrb[45].mxu0  ;;  %v15704_v48 = vld [vmem:[%s19071_s14 + $0x470] ss:$8 sps:$4 sm:$0xff]  }
 0xf76   :  { %v10145_v33 = vpop.f32.mrb[46].mxu0 }
 0xf77   :  { %v18699_v19 = vpack.c.bf16 %v10145_v33, %v10142_v35  ;;  %v14157_v7 = vpop.f32.mrb[47].mxu0  ;;  %v15568_v33 = vld [vmem:[%s19071_s14 + $0x194] ss:$8 sps:$4 sm:$0xff]  }
 0xf78   :  { %10413 = vmatpush1.bf16.msra.mxu0 %v15524_v17  ;;  %v15566_v7 = vld [vmem:[%s19071_s14 + $0x190] ss:$8 sps:$4 sm:$0xff]  }
 0xf79   :  { %10414 = vmatprep.subr.bf16.mxu0 %v15529_v51  ;;  %v15563_v51 = vld [vmem:[%s19071_s14 + $0x180] ss:$8 sps:$4 sm:$0xff]  }
 0xf7c   :  { %10415 = vmatpush1.bf16.msra.mxu0 %v15527_v46  ;;  %v10150_v60 = vpop.f32.mrb[48].mxu0  ;;  %v15569_v46 = vld [vmem:[%s19071_s14 + $0x1a0] ss:$8 sps:$4 sm:$0xff]  }
 0xf7d   :  { %10416 = vmatprep.subr.bf16.mxu0 %v15532_v40  ;;  %v14160_v2 = vpop.f32.mrb[49].mxu0  ;;  %v15572_v40 = vld [vmem:[%s19071_s14 + $0x1b0] ss:$8 sps:$4 sm:$0xff]  }
 0xf7e   :  { %v10153_v15 = vpop.f32.mrb[50].mxu0  ;;  %v15595_v2 = vld [vmem:[%s19071_s14 + $0x224] ss:$8 sps:$4 sm:$0xff]  }
 0xf7f   :  { %v18749_v63 = vpack.c.bf16 %v10153_v15, %v10150_v60  ;;  %v14161_v57 = vpop.f32.mrb[51].mxu0  ;;  %v10605_v60 = vrot.slane %v18673_v21, 4  ;;  %v15598_v15 = vld [vmem:[%s19071_s14 + $0x234] ss:$8 sps:$4 sm:$0xff]  }
 0xf80   :  { %10417 = vmatpush1.bf16.msra.mxu0 %v15530_v30  ;;  %v15575_v30 = vld [vmem:[%s19071_s14 + $0x1c0] ss:$8 sps:$4 sm:$0xff]   ;;  %v15596_v57 = vld [vmem:[%s19071_s14 + $0x230] ss:$8 sps:$4 sm:$0xff]  }
 0xf81   :  { %10418 = vmatprep.subr.bf16.mxu0 %v15535_v44  ;;  %11143 = vmatmul.mubr.bf16.vlgmr.msra.gmra.mrb[0].mxu1 %v18749_v63  ;;  %v15578_v44 = vld [vmem:[%s19071_s14 + $0x1d0] ss:$8 sps:$4 sm:$0xff]  }
 0xf82   :  { %11425 = vmatprep.mubr.bf16.mxu1 %v19080_v23  ;;  %11394 = vmatpush1.bf16.msra.mxu1 %v15662_v10  ;;  %v15602_v10 = vld [vmem:[%s19071_s14 + $0x250] ss:$8 sps:$4 sm:$0xff]  }
 0xf83   :  { %11395 = vmatprep.subr.bf16.mxu1 %v15670_v14  ;;  %v15605_v14 = vld [vmem:[%s19071_s14 + $0x260] ss:$8 sps:$4 sm:$0xff]  }
 0xf84   :  { %10419 = vmatpush1.bf16.msra.mxu0 %v15533_v3  ;;  %v10158_v20 = vpop.f32.mrb[52].mxu0  ;;  %v15581_v3 = vld [vmem:[%s19071_s14 + $0x1e0] ss:$8 sps:$4 sm:$0xff]  }
 0xf85   :  { %10420 = vmatprep.subr.bf16.mxu0 %v15538_v53  ;;  %v10168_v17 = vpack.c.bf16 %v10158_v20, %v10158_v20  ;;  %v14164_v35 = vpop.f32.mrb[53].mxu0  ;;  %v15584_v53 = vld [vmem:[%s19071_s14 + $0x1f0] ss:$8 sps:$4 sm:$0xff]   ;;  %v15683_v20 = vld [vmem:[%s19071_s14 + $0x3c0] ss:$8 sps:$4 sm:$0xff]  }
 0xf86   :  { %11396 = vmatpush1.bf16.msra.mxu1 %v15668_v22  ;;  %v10161_v32 = vpop.f32.mrb[54].mxu0  ;;  %v15608_v22 = vld [vmem:[%s19071_s14 + $0x270] ss:$8 sps:$4 sm:$0xff]  }
 0xf87   :  { %11397 = vmatprep.subr.bf16.mxu1 %v15676_v61  ;;  %v14165_v43 = vpop.f32.mrb[55].mxu0  ;;  %v15614_v61 = vld [vmem:[%s19071_s14 + $0x280] ss:$8 sps:$4 sm:$0xff]   ;;  %v15689_v35 = vld [vmem:[%s19071_s14 + $0x3d0] ss:$8 sps:$4 sm:$0xff]  }
 0xf88   :  { %10421 = vmatpush1.bf16.msra.mxu0 %v15536_v27  ;;  %v15587_v27 = vld [vmem:[%s19071_s14 + $0x200] ss:$8 sps:$4 sm:$0xff]   ;;  %v15697_v32 = vld [vmem:[%s19071_s14 + $0x3e4] ss:$8 sps:$4 sm:$0xff]   ;;  %v15703_v43 = vld [vmem:[%s19071_s14 + $0x3f4] ss:$8 sps:$4 sm:$0xff]  }
 0xf89   :  { %10544 = vmatprep.subr.bf16.mxu0 %v15541_v56  ;;  %v15590_v56 = vld [vmem:[%s19071_s14 + $0x210] ss:$8 sps:$4 sm:$0xff]  }
 0xf8a   :  { %11398 = vmatpush1.bf16.msra.mxu1 %v15674_v13  ;;  %v15620_v13 = vld [vmem:[%s19071_s14 + $0x290] ss:$8 sps:$4 sm:$0xff]  }
 0xf8b   :  { %10439 = vmatmul.mubr.bf16.vlgmr.msra.gmra.mrb[60].mxu0 %v18645_v34  ;;  %v15682_v34 = vld [vmem:[%s19071_s14 + $0x434] ss:$8 sps:$4 sm:$0xff]  }
 0xf8c   :  { %10545 = vmatpush1.bf16.msra.mxu0 %v15539_v36  ;;  %10576 = vmatprep.mubr.bf16.mxu0 %v19080_v23  ;;  %v15601_v36 = vld [vmem:[%s19071_s14 + $0x244] ss:$8 sps:$4 sm:$0xff]  }
 0xf8d   :  { %10546 = vmatprep.subr.bf16.mxu0 %v15544_v5  ;;  %11399 = vmatprep.subr.bf16.mxu1 %v15682_v34  ;;  %v15604_v5 = vld [vmem:[%s19071_s14 + $0x254] ss:$8 sps:$4 sm:$0xff]   ;;  %v15626_v34 = vld [vmem:[%s19071_s14 + $0x2a0] ss:$8 sps:$4 sm:$0xff]  }
 0xf8e   :  { %11400 = vmatpush1.bf16.msra.mxu1 %v15680_v9  ;;  %v15632_v9 = vld [vmem:[%s19071_s14 + $0x2b0] ss:$8 sps:$4 sm:$0xff]  }
 0xf8f   :  { %11401 = vmatprep.subr.bf16.mxu1 %v15688_v38  ;;  %v15638_v38 = vld [vmem:[%s19071_s14 + $0x2c0] ss:$8 sps:$4 sm:$0xff]  }
 0xf90   :  { %10547 = vmatpush1.bf16.msra.mxu0 %v15542_v26  ;;  %v15607_v26 = vld [vmem:[%s19071_s14 + $0x264] ss:$8 sps:$4 sm:$0xff]  }
 0xf91   :  { %10548 = vmatprep.subr.bf16.mxu0 %v15547_v12  ;;  %v15610_v12 = vld [vmem:[%s19071_s14 + $0x274] ss:$8 sps:$4 sm:$0xff]  }
 0xf92   :  { %11402 = vmatpush1.bf16.msra.mxu1 %v15686_v28  ;;  %v15644_v28 = vld [vmem:[%s19071_s14 + $0x2d0] ss:$8 sps:$4 sm:$0xff]  }
 0xf93   :  { %11403 = vmatprep.subr.bf16.mxu1 %v15694_v58  ;;  %v15650_v58 = vld [vmem:[%s19071_s14 + $0x2e0] ss:$8 sps:$4 sm:$0xff]  }
 0xf94   :  { %10549 = vmatpush1.bf16.msra.mxu0 %v15545_v6  ;;  %v15616_v6 = vld [vmem:[%s19071_s14 + $0x284] ss:$8 sps:$4 sm:$0xff]  }
 0xf95   :  { %10550 = vmatprep.subr.bf16.mxu0 %v15550_v24  ;;  %v15622_v24 = vld [vmem:[%s19071_s14 + $0x294] ss:$8 sps:$4 sm:$0xff]  }
 0xf96   :  { %11404 = vmatpush1.bf16.msra.mxu1 %v15692_v45  ;;  %v15656_v45 = vld [vmem:[%s19071_s14 + $0x2f0] ss:$8 sps:$4 sm:$0xff]  }
 0xf97   :  { %11405 = vmatprep.subr.bf16.mxu1 %v15700_v11  ;;  %v15659_v11 = vld [vmem:[%s19071_s14 + $0x380] ss:$8 sps:$4 sm:$0xff]  }
 0xf98   :  { %10551 = vmatpush1.bf16.msra.mxu0 %v15548_v18  ;;  %v15628_v18 = vld [vmem:[%s19071_s14 + $0x2a4] ss:$8 sps:$4 sm:$0xff]  }
 0xf99   :  { %10552 = vmatprep.subr.bf16.mxu0 %v15553_v1  ;;  %v15634_v1 = vld [vmem:[%s19071_s14 + $0x2b4] ss:$8 sps:$4 sm:$0xff]  }
 0xf9a   :  { %11406 = vmatpush1.bf16.msra.mxu1 %v15698_v29  ;;  %v15667_v29 = vld [vmem:[%s19071_s14 + $0x394] ss:$8 sps:$4 sm:$0xff]  }
 0xf9b   :  { %11407 = vmatprep.subr.bf16.mxu1 %v15706_v41  ;;  %v15673_v41 = vld [vmem:[%s19071_s14 + $0x3a4] ss:$8 sps:$4 sm:$0xff]  }
 0xf9c   :  { %10553 = vmatpush1.bf16.msra.mxu0 %v15551_v39  ;;  %v15640_v39 = vld [vmem:[%s19071_s14 + $0x2c4] ss:$8 sps:$4 sm:$0xff]  }
 0xf9d   :  { %10554 = vmatprep.subr.bf16.mxu0 %v15556_v62  ;;  %v15646_v62 = vld [vmem:[%s19071_s14 + $0x2d4] ss:$8 sps:$4 sm:$0xff]  }
 0xf9e   :  { %11408 = vmatpush1.bf16.msra.mxu1 %v15704_v48  ;;  %v15685_v48 = vld [vmem:[%s19071_s14 + $0x3c4] ss:$8 sps:$4 sm:$0xff]  }
 0xfa0   :  { %10555 = vmatpush1.bf16.msra.mxu0 %v15554_v8  ;;  %v15652_v8 = vld [vmem:[%s19071_s14 + $0x2e4] ss:$8 sps:$4 sm:$0xff]  }
 0xfa1   :  { %10556 = vmatprep.subr.bf16.mxu0 %v15559_v55  ;;  %11426 = vmatmul.mubr.bf16.vlgmr.msra.gmra.mrb[4].mxu1 %v10168_v17  ;;  %v15658_v55 = vld [vmem:[%s19071_s14 + $0x2f4] ss:$8 sps:$4 sm:$0xff]  }
 0xfa2   :  { %v15691_v17 = vld [vmem:[%s19071_s14 + $0x3d4] ss:$8 sps:$4 sm:$0xff]  }
 0xfa4   :  { %10557 = vmatpush1.bf16.msra.mxu0 %v15557_v42  ;;  %v15661_v42 = vld [vmem:[%s19071_s14 + $0x384] ss:$8 sps:$4 sm:$0xff]  }
 0xfa5   :  { %10558 = vmatprep.subr.bf16.mxu0 %v15562_v0  ;;  %v10888_v0 = vrot.slane %v18699_v19, 4 }
 0xfa8   :  { %10559 = vmatpush1.bf16.msra.mxu0 %v15560_v52  ;;  %v15665_v52 = vld [vmem:[%s19071_s14 + $0x390] ss:$8 sps:$4 sm:$0xff]  }
 0xfa9   :  { %10687 = vmatprep.subr.bf16.mxu0 %v15565_v37  ;;  %v15679_v37 = vld [vmem:[%s19071_s14 + $0x3b4] ss:$8 sps:$4 sm:$0xff]  }
 0xfab   :  { %10577 = vmatmul.mubr.bf16.vlgmr.msra.gmra.mrb[64].mxu0 %v18673_v21  ;;  %v15593_v21 = vld [vmem:[%s19071_s14 + $0x220] ss:$8 sps:$4 sm:$0xff]  }
 0xfac   :  { %10688 = vmatpush1.bf16.msra.mxu0 %v15563_v51  ;;  %10719 = vmatprep.mubr.bf16.mxu0 %v19080_v23  ;;  %v15695_v51 = vld [vmem:[%s19071_s14 + $0x3e0] ss:$8 sps:$4 sm:$0xff]  }
 0xfad   :  { %10689 = vmatprep.subr.bf16.mxu0 %v15568_v33  ;;  %v15701_v33 = vld [vmem:[%s19071_s14 + $0x3f0] ss:$8 sps:$4 sm:$0xff]  }
 0xfb0   :  { %10690 = vmatpush1.bf16.msra.mxu0 %v15566_v7  ;;  %v11171_v7 = vrot.slane %v18749_v63, 4 }
 0xfb1   :  { %10691 = vmatprep.subr.bf16.mxu0 %v15571_v4 }
 0xfb4   :  { %10692 = vmatpush1.bf16.msra.mxu0 %v15569_v46 }
 0xfb5   :  { %10693 = vmatprep.subr.bf16.mxu0 %v15574_v49 }
 0xfb8   :  { %10694 = vmatpush1.bf16.msra.mxu0 %v15572_v40 }
 0xfb9   :  { %10695 = vmatprep.subr.bf16.mxu0 %v15577_v54 }
 0xfbc   :  { %10696 = vmatpush1.bf16.msra.mxu0 %v15575_v30 }
 0xfbd   :  { %10697 = vmatprep.subr.bf16.mxu0 %v15580_v25 }
 0xfc0   :  { %10698 = vmatpush1.bf16.msra.mxu0 %v15578_v44 }
 0xfc1   :  { %10699 = vmatprep.subr.bf16.mxu0 %v15583_v31 }
 0xfc4   :  { %10700 = vmatpush1.bf16.msra.mxu0 %v15581_v3 }
 0xfc5   :  { %10701 = vmatprep.subr.bf16.mxu0 %v15586_v50 }
 0xfc8   :  { %10702 = vmatpush1.bf16.msra.mxu0 %v15584_v53 }
 0xfc9   :  { %10827 = vmatprep.subr.bf16.mxu0 %v15589_v59 }
 0xfcb   :  { %10720 = vmatmul.mubr.bf16.vlgmr.msra.gmra.mrb[68].mxu0 %v10605_v60 }
 0xfcc   :  { %10828 = vmatpush1.bf16.msra.mxu0 %v15587_v27  ;;  %10859 = vmatprep.mubr.bf16.mxu0 %v19080_v23 }
 0xfcd   :  { %10829 = vmatprep.subr.bf16.mxu0 %v15592_v47 }
 0xfd0   :  { %10830 = vmatpush1.bf16.msra.mxu0 %v15590_v56 }
 0xfd1   :  { %10831 = vmatprep.subr.bf16.mxu0 %v15595_v2 }
 0xfd4   :  { %10832 = vmatpush1.bf16.msra.mxu0 %v15593_v21 }
 0xfd5   :  { %10833 = vmatprep.subr.bf16.mxu0 %v15598_v15 }
 0xfd8   :  { %10834 = vmatpush1.bf16.msra.mxu0 %v15596_v57 }
 0xfd9   :  { %10835 = vmatprep.subr.bf16.mxu0 %v15601_v36 }
 0xfdc   :  { %10836 = vmatpush1.bf16.msra.mxu0 %v15599_v16 }
 0xfdd   :  { %10837 = vmatprep.subr.bf16.mxu0 %v15604_v5 }
 0xfe0   :  { %10838 = vmatpush1.bf16.msra.mxu0 %v15602_v10 }
 0xfe1   :  { %10839 = vmatprep.subr.bf16.mxu0 %v15607_v26 }
 0xfe4   :  { %10840 = vmatpush1.bf16.msra.mxu0 %v15605_v14 }
 0xfe5   :  { %10841 = vmatprep.subr.bf16.mxu0 %v15610_v12 }
 0xfe8   :  { %10842 = vmatpush1.bf16.msra.mxu0 %v15608_v22 }
 0xfe9   :  { %10970 = vmatprep.subr.bf16.mxu0 %v15616_v6 }
 0xfeb   :  { %10860 = vmatmul.mubr.bf16.vlgmr.msra.gmra.mrb[72].mxu0 %v18699_v19  ;;  %v15671_v19 = vld [vmem:[%s19071_s14 + $0x3a0] ss:$8 sps:$4 sm:$0xff]  }
 0xfec   :  { %10971 = vmatpush1.bf16.msra.mxu0 %v15614_v61  ;;  %11002 = vmatprep.mubr.bf16.mxu0 %v19080_v23 }
 0xfed   :  { %10972 = vmatprep.subr.bf16.mxu0 %v15622_v24 }
 0xff0   :  { %10973 = vmatpush1.bf16.msra.mxu0 %v15620_v13 }
 0xff1   :  { %10974 = vmatprep.subr.bf16.mxu0 %v15628_v18 }
 0xff4   :  { %10975 = vmatpush1.bf16.msra.mxu0 %v15626_v34 }
 0xff5   :  { %10976 = vmatprep.subr.bf16.mxu0 %v15634_v1 }
 0xff8   :  { %10977 = vmatpush1.bf16.msra.mxu0 %v15632_v9 }
 0xff9   :  { %10978 = vmatprep.subr.bf16.mxu0 %v15640_v39 }
 0xffc   :  { %10979 = vmatpush1.bf16.msra.mxu0 %v15638_v38 }
 0xffd   :  { %10980 = vmatprep.subr.bf16.mxu0 %v15646_v62 }
0x1000   :  { %10981 = vmatpush1.bf16.msra.mxu0 %v15644_v28 }
0x1001   :  { %10982 = vmatprep.subr.bf16.mxu0 %v15652_v8 }
0x1004   :  { %10983 = vmatpush1.bf16.msra.mxu0 %v15650_v58 }
0x1005   :  { %10984 = vmatprep.subr.bf16.mxu0 %v15658_v55  ;;  %v11438_v55 = vlaneseq }
0x1008   :  { %10985 = vmatpush1.bf16.msra.mxu0 %v15656_v45  ;;  %v11439_v45 = vshrl.u32 %v11438_v55, 7 }
0x1009   :  { %11253 = vmatprep.subr.bf16.mxu0 %v15661_v42 }
0x100a   :  { %v11440_v42 = vsub.s32 0, %v11439_v45 }
0x100b   :  { %11003 = vmatmul.mubr.bf16.vlgmr.msra.gmra.mrb[76].mxu0 %v10888_v0  ;;  %v11444_v0 = vsub.s32 1, %v11439_v45 }
0x100c   :  { %11254 = vmatpush1.bf16.msra.mxu0 %v15659_v11  ;;  %11285 = vmatprep.mubr.bf16.mxu0 %v19080_v23  ;;  %v15677_v23 = vld [vmem:[%s19071_s14 + $0x3b0] ss:$8 sps:$4 sm:$0xff]   ;;  %v11436_v11 = vld [vmem:[%s19073_s15] sm:$0x3] }
0x100d   :  { %11255 = vmatprep.subr.bf16.mxu0 %v15667_v29 }
0x1010   :  { %11256 = vmatpush1.bf16.msra.mxu0 %v15665_v52 }
0x1011   :  { %11257 = vmatprep.subr.bf16.mxu0 %v15673_v41  ;;  %v11441_v41 = vrot.slane %v11436_v11, %v11440_v42 }
0x1014   :  { %11258 = vmatpush1.bf16.msra.mxu0 %v15671_v19 }
0x1015   :  { %11259 = vmatprep.subr.bf16.mxu0 %v15679_v37 }
0x1018   :  { %11260 = vmatpush1.bf16.msra.mxu0 %v15677_v23  ;;  %v11445_v23 = vrot.slane %v11436_v11, %v11444_v0 }
0x1019   :  { %11261 = vmatprep.subr.bf16.mxu0 %v15685_v48 }
0x101c   :  { %11262 = vmatpush1.bf16.msra.mxu0 %v15683_v20 }
0x101d   :  { %11263 = vmatprep.subr.bf16.mxu0 %v15691_v17 }
0x1020   :  { %11264 = vmatpush1.bf16.msra.mxu0 %v15689_v35 }
0x1021   :  { %11265 = vmatprep.subr.bf16.mxu0 %v15697_v32 }
0x1024   :  { %11266 = vmatpush1.bf16.msra.mxu0 %v15695_v51 }
0x1025   :  { %11267 = vmatprep.subr.bf16.mxu0 %v15703_v43 }
0x1028   :  { %11268 = vmatpush1.bf16.msra.mxu0 %v15701_v33 }
0x102b   :  { %11286 = vmatmul.mubr.bf16.vlgmr.msra.gmra.mrb[80].mxu0 %v11171_v7 }
0x103e   :  { %v10319_v4 = vpop.f32.mrb[56].mxu0 }
0x103f   :  { %v10321_v46 = vpop.f32.mrb[57].mxu0 }
0x1040   :  { %v10323_v49 = vpop.f32.mrb[58].mxu0 }
0x1041   :  { %v10324_v40 = vpop.f32.mrb[59].mxu0 }
0x1054   :  { %v11144_v54 = vpop.f32.mrb[0].mxu1 }
0x1055   :  { %v11146_v30 = vpop.f32.mrb[1].mxu1 }
0x1056   :  { %v11148_v44 = vpop.f32.mrb[2].mxu1 }
0x1057   :  { %v11149_v50 = vpop.f32.mrb[3].mxu1 }
0x105e   :  { %v10440_v25 = vpop.f32.mrb[60].mxu0 }
0x105f   :  { %v10441_v31 = vadd.f32 %v10440_v25, %v10319_v4  ;;  %v10442_v3 = vpop.f32.mrb[61].mxu0 }
0x1060   :  { %v10443_v53 = vadd.f32 %v10442_v3, %v10321_v46  ;;  %v10444_v59 = vpop.f32.mrb[62].mxu0 }
0x1061   :  { %v10445_v27 = vpop.f32.mrb[63].mxu0 }
0x1074   :  { %v11427_v60 = vpop.f32.mrb[4].mxu1 }
0x1075   :  { %v11429_v56 = vpop.f32.mrb[5].mxu1 }
0x1076   :  { %v11431_v21 = vpop.f32.mrb[6].mxu1 }
0x1077   :  { %v11432_v36 = vpop.f32.mrb[7].mxu1 }
0x107e   :  { %v10578_v47 = vpop.f32.mrb[64].mxu0 }
0x107f   :  { %v10585_v2 = vadd.f32 %v10578_v47, %v10441_v31  ;;  %v10580_v63 = vpop.f32.mrb[65].mxu0 }
0x1080   :  { %v10586_v15 = vadd.f32 %v10580_v63, %v10443_v53  ;;  %v10582_v57 = vpop.f32.mrb[66].mxu0 }
0x1081   :  { %v10583_v16 = vpop.f32.mrb[67].mxu0 }
0x109e   :  { %v10721_v5 = vpop.f32.mrb[68].mxu0 }
0x109f   :  { %v10728_v10 = vadd.f32 %v10721_v5, %v10585_v2  ;;  %v10723_v26 = vpop.f32.mrb[69].mxu0 }
0x10a0   :  { %v10729_v14 = vadd.f32 %v10723_v26, %v10586_v15  ;;  %v10725_v12 = vpop.f32.mrb[70].mxu0 }
0x10a1   :  { %v10726_v22 = vpop.f32.mrb[71].mxu0 }
0x10be   :  { %v10861_v6 = vpop.f32.mrb[72].mxu0 }
0x10bf   :  { %v10868_v61 = vadd.f32 %v10861_v6, %v10728_v10  ;;  %v10863_v24 = vpop.f32.mrb[73].mxu0 }
0x10c0   :  { %v10869_v13 = vadd.f32 %v10863_v24, %v10729_v14  ;;  %v10865_v18 = vpop.f32.mrb[74].mxu0 }
0x10c1   :  { %v10866_v34 = vpop.f32.mrb[75].mxu0 }
0x10de   :  { %v11004_v1 = vpop.f32.mrb[76].mxu0 }
0x10df   :  { %v11011_v9 = vadd.f32 %v11004_v1, %v10868_v61  ;;  %v11006_v39 = vpop.f32.mrb[77].mxu0 }
0x10e0   :  { %v11012_v38 = vadd.f32 %v11006_v39, %v10869_v13  ;;  %v11008_v62 = vpop.f32.mrb[78].mxu0 }
0x10e1   :  { %v11009_v28 = vpop.f32.mrb[79].mxu0  ;;  %v11151_v8 = vadd.f32 %v11144_v54, %v11011_v9 }
0x10e2   :  { %v11152_v58 = vadd.f32 %v11146_v30, %v11012_v38 }
0x10fe   :  { %v11287_v29 = vpop.f32.mrb[80].mxu0 }
0x10ff   :  { %v11294_v52 = vadd.f32 %v11287_v29, %v11151_v8  ;;  %v11289_v19 = vpop.f32.mrb[81].mxu0 }
0x1100   :  { %v11295_v37 = vadd.f32 %v11289_v19, %v11152_v58  ;;  %v11291_v48 = vpop.f32.mrb[82].mxu0 }
0x1101   :  { %v11434_v20 = vadd.f32 %v11427_v60, %v11294_v52  ;;  %v11292_v17 = vpop.f32.mrb[83].mxu0 }
0x1102   :  { %v11435_v35 = vadd.f32 %v11429_v56, %v11295_v37 }
0x1103   :  { %v11448_v32 = vadd.f32 %v11441_v41, %v11434_v20 }
0x1104   :  { %v11449_v51 = vadd.f32 %v11445_v23, %v11435_v35 }
0x1105   :  { %11450 = vst [vmem:[%s19074_s16] sm:$0xff] %v11448_v32 }
0x1106   :  { %11451 = vst [vmem:[%s19074_s16 + $0x8] sm:$0xff] %v11449_v51 }

</bundles_post_ra>
